<compile_context>
chip_gen: v6e
topology: v6e:2x2x1
jax: 0.10.0
libtpu: 0.0.40
codegen_flags: <defaults>
</compile_context>

<pallas_src>
import jax
import jax.numpy as jnp
import numpy as np
from jax.experimental import pallas as pl
from jax.experimental.pallas import tpu as pltpu

BN_EPS = 1e-5
VMEM_LIMIT_BYTES = 32 * 1024 * 1024   # safe default on v5e/v6e (128 MiB) and v7x (64 MiB)


def _compiler_params():
    return pltpu.CompilerParams(
        dimension_semantics=("parallel",),      # grid over images -> megacore-shardable
        vmem_limit_bytes=VMEM_LIMIT_BYTES,
    )


# ----------------------------- Pallas kernels ------------------------------ #

def _conv_stats_kernel(x_ref, w_ref, y_ref, ssum_ref, ssq_ref):
    """3x3 stride-1 conv on one (pre-padded) image + per-channel sum / sum-sq.

    x_ref: (1, H+2, W+2, Cin)   w_ref: (9, Cin, Cout)
    y_ref: (1, H*W, Cout)       ssum_ref / ssq_ref: (1, 1, Cout)
    """
    Cin = x_ref.shape[3]
    Cout = w_ref.shape[2]
    H = x_ref.shape[1] - 2
    W = x_ref.shape[2] - 2

    xpad = x_ref[0]                                        # (H+2, W+2, Cin)
    acc = jnp.zeros((H * W, Cout), dtype=jnp.float32)
    for k in range(9):                                     # static unroll: 9 MXU matmuls
        ky, kx = k // 3, k % 3
        patch = xpad[ky:ky + H, kx:kx + W, :].reshape(H * W, Cin)
        acc = acc + jnp.dot(patch, w_ref[k], preferred_element_type=jnp.float32)

    y_ref[0] = acc
    ssum_ref[0] = jnp.sum(acc, axis=0, keepdims=True)
    ssq_ref[0] = jnp.sum(acc * acc, axis=0, keepdims=True)


def _bn_relu_conv_stats_kernel(y1_ref, sc_ref, sh_ref, w_ref,
                               y2_ref, ssum_ref, ssq_ref, pad_ref):
    """Apply BN1 (precomputed scale/shift) + ReLU, then conv2 + BN2 partial stats.

    y1_ref: (1, H*W, C)  sc/sh: (1, C)  w_ref: (9, C, Cout)
    y2_ref: (1, H*W, Cout)  ssum/ssq: (1, 1, Cout)  pad_ref: VMEM (H+2, W+2, C)
    """
    HW = y1_ref.shape[1]
    C = sc_ref.shape[1]
    Cout = w_ref.shape[2]
    H = pad_ref.shape[0] - 2
    W = pad_ref.shape[1] - 2

    # BN1 apply + ReLU, entirely in VMEM (conv1 output never re-expanded in HBM).
    a = jnp.maximum(y1_ref[0] * sc_ref[...] + sh_ref[...], 0.0)     # (H*W, C)

    # Zero-padded image in VMEM scratch for conv2's halo.
    pad_ref[...] = jnp.zeros_like(pad_ref)
    pad_ref[1:H + 1, 1:W + 1, :] = a.reshape(H, W, C)

    acc = jnp.zeros((HW, Cout), dtype=jnp.float32)
    for k in range(9):
        ky, kx = k // 3, k % 3
        patch = pad_ref[ky:ky + H, kx:kx + W, :].reshape(HW, C)
        acc = acc + jnp.dot(patch, w_ref[k], preferred_element_type=jnp.float32)

    y2_ref[0] = acc
    ssum_ref[0] = jnp.sum(acc, axis=0, keepdims=True)
    ssq_ref[0] = jnp.sum(acc * acc, axis=0, keepdims=True)


def _bn_add_relu_kernel(y2_ref, sc_ref, sh_ref, r_ref, o_ref):
    """BN2 apply + residual add + ReLU (all elementwise, streamed per image)."""
    o_ref[0] = jnp.maximum(y2_ref[0] * sc_ref[...] + sh_ref[...] + r_ref[0], 0.0)


# --------------------------- pallas_call builders --------------------------- #

def _conv1_call(xpad, wmat):
    N, Hp2, Wp2, Cin = xpad.shape
    H, W = Hp2 - 2, Wp2 - 2
    Cout = wmat.shape[2]
    flops = 2 * N * H * W * 9 * Cin * Cout
    bytes_accessed = 4 * (xpad.size + wmat.size + N * H * W * Cout + 2 * N * Cout)
    return pl.pallas_call(
        _conv_stats_kernel,
        out_shape=(jax.ShapeDtypeStruct((N, H * W, Cout), jnp.float32),
                   jax.ShapeDtypeStruct((N, 1, Cout), jnp.float32),
                   jax.ShapeDtypeStruct((N, 1, Cout), jnp.float32)),
        grid=(N,),
        in_specs=[pl.BlockSpec((1, Hp2, Wp2, Cin), lambda n: (n, 0, 0, 0)),
                  pl.BlockSpec((9, Cin, Cout), lambda n: (0, 0, 0))],
        out_specs=(pl.BlockSpec((1, H * W, Cout), lambda n: (n, 0, 0)),
                   pl.BlockSpec((1, 1, Cout), lambda n: (n, 0, 0)),
                   pl.BlockSpec((1, 1, Cout), lambda n: (n, 0, 0))),
        compiler_params=_compiler_params(),
        cost_estimate=pl.CostEstimate(flops=flops, transcendentals=0,
                                      bytes_accessed=bytes_accessed),
    )(xpad, wmat)


def _conv2_call(y1, scale1, shift1, wmat, H, W):
    N, HW, C = y1.shape
    Cout = wmat.shape[2]
    flops = 2 * N * H * W * 9 * C * Cout
    bytes_accessed = 4 * (y1.size + wmat.size + N * HW * Cout + 2 * N * Cout)
    return pl.pallas_call(
        _bn_relu_conv_stats_kernel,
        out_shape=(jax.ShapeDtypeStruct((N, HW, Cout), jnp.float32),
                   jax.ShapeDtypeStruct((N, 1, Cout), jnp.float32),
                   jax.ShapeDtypeStruct((N, 1, Cout), jnp.float32)),
        grid=(N,),
        in_specs=[pl.BlockSpec((1, HW, C), lambda n: (n, 0, 0)),
                  pl.BlockSpec((1, C), lambda n: (0, 0)),
                  pl.BlockSpec((1, C), lambda n: (0, 0)),
                  pl.BlockSpec((9, C, Cout), lambda n: (0, 0, 0))],
        out_specs=(pl.BlockSpec((1, HW, Cout), lambda n: (n, 0, 0)),
                   pl.BlockSpec((1, 1, Cout), lambda n: (n, 0, 0)),
                   pl.BlockSpec((1, 1, Cout), lambda n: (n, 0, 0))),
        scratch_shapes=[pltpu.VMEM((H + 2, W + 2, C), jnp.float32)],
        compiler_params=_compiler_params(),
        cost_estimate=pl.CostEstimate(flops=flops, transcendentals=0,
                                      bytes_accessed=bytes_accessed),
    )(y1, scale1, shift1, wmat)


def _bn_add_relu_call(y2, scale2, shift2, res):
    N, HW, C = y2.shape
    bytes_accessed = 4 * (2 * y2.size + res.size)
    return pl.pallas_call(
        _bn_add_relu_kernel,
        out_shape=jax.ShapeDtypeStruct((N, HW, C), jnp.float32),
        grid=(N,),
        in_specs=[pl.BlockSpec((1, HW, C), lambda n: (n, 0, 0)),
                  pl.BlockSpec((1, C), lambda n: (0, 0)),
                  pl.BlockSpec((1, C), lambda n: (0, 0)),
                  pl.BlockSpec((1, HW, C), lambda n: (n, 0, 0))],
        out_specs=pl.BlockSpec((1, HW, C), lambda n: (n, 0, 0)),
        compiler_params=_compiler_params(),
        cost_estimate=pl.CostEstimate(flops=4 * N * HW * C, transcendentals=0,
                                      bytes_accessed=bytes_accessed),
    )(y2, scale2, shift2, res)


# ------------------------------- JAX glue ----------------------------------- #

def _prepare_conv_weight(w_oihw):
    """PyTorch (O, I, 3, 3) -> (9, Cin, Cout); tap k = ky*3 + kx. Hoisted out of the hot path."""
    Cout, Cin = w_oihw.shape[0], w_oihw.shape[1]
    return jnp.transpose(w_oihw, (2, 3, 1, 0)).reshape(9, Cin, Cout).astype(jnp.float32)


@jax.jit
def basic_block_forward(x_nchw, w1m, g1, b1, w2m, g2, b2):
    """BasicBlock forward (stride=1, no downsample, inplanes == planes), train-mode BN."""
    N, C, H, W = x_nchw.shape
    C1 = w1m.shape[2]
    C2 = w2m.shape[2]
    M = N * H * W

    x_nhwc = jnp.transpose(x_nchw, (0, 2, 3, 1)).astype(jnp.float32)
    xpad = jnp.pad(x_nhwc, ((0, 0), (1, 1), (1, 1), (0, 0)))

    # ---- pass 1: conv1 + BN1 partial stats (Pallas) ----
    y1, s1_sum, s1_sq = _conv1_call(xpad, w1m)
    sum1 = jnp.sum(s1_sum[:, 0, :], axis=0)
    sumsq1 = jnp.sum(s1_sq[:, 0, :], axis=0)
    mean1 = sum1 / M
    var1 = sumsq1 / M - mean1 * mean1              # biased (training-mode) variance
    scale1 = g1 * jax.lax.rsqrt(var1 + BN_EPS)
    shift1 = b1 - mean1 * scale1

    # ---- pass 2: BN1 apply + ReLU + conv2 + BN2 partial stats (Pallas, fused) ----
    y2, s2_sum, s2_sq = _conv2_call(y1, scale1.reshape(1, C1), shift1.reshape(1, C1),
                                    w2m, H, W)
    sum2 = jnp.sum(s2_sum[:, 0, :], axis=0)
    sumsq2 = jnp.sum(s2_sq[:, 0, :], axis=0)
    mean2 = sum2 / M
    var2 = sumsq2 / M - mean2 * mean2
    scale2 = g2 * jax.lax.rsqrt(var2 + BN_EPS)
    shift2 = b2 - mean2 * scale2

    # ---- pass 3: BN2 apply + residual add + ReLU (Pallas) ----
    res = x_nhwc.reshape(N, H * W, C)
    out = _bn_add_relu_call(y2, scale2.reshape(1, C2), shift2.reshape(1, C2), res)
    return jnp.transpose(out.reshape(N, H, W, C2), (0, 3, 1, 2))


# ----------------------------- pure-JAX reference --------------------------- #

def _reference(x, w1, g1, b1, w2, g2, b2):
    conv = lambda a, w: jax.lax.conv_general_dilated(
        a, w, (1, 1), [(1, 1), (1, 1)],
        dimension_numbers=("NCHW", "OIHW", "NCHW"))

    def bn(y, g, b):
        mean = y.mean(axis=(0, 2, 3), keepdims=True)
        var = ((y - mean) ** 2).mean(axis=(0, 2, 3), keepdims=True)
        return ((y - mean) * jax.lax.rsqrt(var + BN_EPS)
                * g.reshape(1, -1, 1, 1) + b.reshape(1, -1, 1, 1))

    out = jnp.maximum(bn(conv(x, w1), g1, b1), 0.0)
    out = bn(conv(out, w2), g2, b2) + x
    return jnp.maximum(out, 0.0)


# --------------------------------- main ------------------------------------ #

if __name__ == "__main__":
    N, C, H, W = 2, 8, 16, 16          # inplanes == planes, stride=1, no downsample
    key = jax.random.PRNGKey(0)
    kx, kw1, kw2, kg1, kb1, kg2, kb2 = jax.random.split(key, 7)

    x = jax.random.normal(kx, (N, C, H, W), dtype=jnp.float32)
    w1 = 0.1 * jax.random.normal(kw1, (C, C, 3, 3), dtype=jnp.float32)
    w2 = 0.1 * jax.random.normal(kw2, (C, C, 3, 3), dtype=jnp.float32)
    g1 = 1.0 + 0.1 * jax.random.normal(kg1, (C,), dtype=jnp.float32)
    b1 = 0.1 * jax.random.normal(kb1, (C,), dtype=jnp.float32)
    g2 = 1.0 + 0.1 * jax.random.normal(kg2, (C,), dtype=jnp.float32)
    b2 = 0.1 * jax.random.normal(kb2, (C,), dtype=jnp.float32)

    # weight reordering hoisted out of the per-call hot path
    w1m = _prepare_conv_weight(w1)
    w2m = _prepare_conv_weight(w2)

    out = basic_block_forward(x, w1m, g1, b1, w2m, g2, b2)
    out = jax.block_until_ready(out)

    ref = _reference(x, w1, g1, b1, w2, g2, b2)
    np.testing.assert_allclose(np.asarray(out), np.asarray(ref),
                               rtol=2e-3, atol=2e-3)
    print("KERNEL_OK")
</pallas_src>

<mosaic_0001>
module attributes {stable_mosaic.version = 11 : i64} {
  func.func @_conv_stats_kernel(%arg0: i32, %arg1: memref<1x18x18x8xf32, #tpu.memory_space<vmem>>, %arg2: memref<9x8x8xf32, #tpu.memory_space<vmem>>, %arg3: memref<1x256x8xf32, #tpu.memory_space<vmem>>, %arg4: memref<1x1x8xf32, #tpu.memory_space<vmem>>, %arg5: memref<1x1x8xf32, #tpu.memory_space<vmem>>) attributes {dimension_semantics = [#tpu.dimension_semantics<parallel>], iteration_bounds = array<i64: 2>, scalar_prefetch = 0 : i64, scratch_operands = 0 : i64, tpu.core_type = #tpu.core_type<tc>, window_params = [{transform_indices = @transform_0, window_bounds = array<i64: 1, 18, 18, 8>}, {pipeline_mode = #tpu.pipeline_mode<synchronous>, transform_indices = @transform_1, window_bounds = array<i64: 9, 8, 8>}, {transform_indices = @transform_2, window_bounds = array<i64: 1, 256, 8>}, {transform_indices = @transform_3, window_bounds = array<i64: 1, 1, 8>}, {transform_indices = @transform_4, window_bounds = array<i64: 1, 1, 8>}]} {
    %c0 = arith.constant 0 : index
    %c0_0 = arith.constant 0 : index
    %c0_1 = arith.constant 0 : index
    %c0_2 = arith.constant 0 : index
    %0 = vector.load %arg1[%c0, %c0_0, %c0_1, %c0_2] : memref<1x18x18x8xf32, #tpu.memory_space<vmem>>, vector<1x18x18x8xf32>
    %1 = vector.shape_cast %0 : vector<1x18x18x8xf32> to vector<18x18x8xf32>
    %cst = arith.constant 0.000000e+00 : f32
    %2 = vector.broadcast %cst : f32 to vector<256x8xf32>
    %3 = vector.extract_strided_slice %1 {offsets = [0, 0, 0], sizes = [16, 16, 8], strides = [1, 1, 1]} : vector<18x18x8xf32> to vector<16x16x8xf32>
    %4 = vector.shape_cast %3 : vector<16x16x8xf32> to vector<256x8xf32>
    %c0_3 = arith.constant 0 : index
    %c0_4 = arith.constant 0 : index
    %c0_5 = arith.constant 0 : index
    %5 = vector.load %arg2[%c0_3, %c0_4, %c0_5] : memref<9x8x8xf32, #tpu.memory_space<vmem>>, vector<1x8x8xf32>
    %6 = vector.shape_cast %5 : vector<1x8x8xf32> to vector<8x8xf32>
    %cst_6 = arith.constant dense<0.000000e+00> : vector<256x8xf32>
    %7 = tpu.matmul %4, %6, %cst_6 {dimension_numbers = #tpu.dot_dimension_numbers<[1], [0], [0], [1], [0, 0, 1, 1], [], []>} : vector<256x8xf32>, vector<8x8xf32>, vector<256x8xf32> -> vector<256x8xf32>
    %8 = arith.addf %2, %7 : vector<256x8xf32>
    %9 = vector.extract_strided_slice %1 {offsets = [0, 1, 0], sizes = [16, 16, 8], strides = [1, 1, 1]} : vector<18x18x8xf32> to vector<16x16x8xf32>
    %10 = vector.shape_cast %9 : vector<16x16x8xf32> to vector<256x8xf32>
    %c1 = arith.constant 1 : index
    %c0_7 = arith.constant 0 : index
    %c0_8 = arith.constant 0 : index
    %11 = vector.load %arg2[%c1, %c0_7, %c0_8] : memref<9x8x8xf32, #tpu.memory_space<vmem>>, vector<1x8x8xf32>
    %12 = vector.shape_cast %11 : vector<1x8x8xf32> to vector<8x8xf32>
    %cst_9 = arith.constant dense<0.000000e+00> : vector<256x8xf32>
    %13 = tpu.matmul %10, %12, %cst_9 {dimension_numbers = #tpu.dot_dimension_numbers<[1], [0], [0], [1], [0, 0, 1, 1], [], []>} : vector<256x8xf32>, vector<8x8xf32>, vector<256x8xf32> -> vector<256x8xf32>
    %14 = arith.addf %8, %13 : vector<256x8xf32>
    %15 = vector.extract_strided_slice %1 {offsets = [0, 2, 0], sizes = [16, 16, 8], strides = [1, 1, 1]} : vector<18x18x8xf32> to vector<16x16x8xf32>
    %16 = vector.shape_cast %15 : vector<16x16x8xf32> to vector<256x8xf32>
    %c2 = arith.constant 2 : index
    %c0_10 = arith.constant 0 : index
    %c0_11 = arith.constant 0 : index
    %17 = vector.load %arg2[%c2, %c0_10, %c0_11] : memref<9x8x8xf32, #tpu.memory_space<vmem>>, vector<1x8x8xf32>
    %18 = vector.shape_cast %17 : vector<1x8x8xf32> to vector<8x8xf32>
    %cst_12 = arith.constant dense<0.000000e+00> : vector<256x8xf32>
    %19 = tpu.matmul %16, %18, %cst_12 {dimension_numbers = #tpu.dot_dimension_numbers<[1], [0], [0], [1], [0, 0, 1, 1], [], []>} : vector<256x8xf32>, vector<8x8xf32>, vector<256x8xf32> -> vector<256x8xf32>
    %20 = arith.addf %14, %19 : vector<256x8xf32>
    %21 = vector.extract_strided_slice %1 {offsets = [1, 0, 0], sizes = [16, 16, 8], strides = [1, 1, 1]} : vector<18x18x8xf32> to vector<16x16x8xf32>
    %22 = vector.shape_cast %21 : vector<16x16x8xf32> to vector<256x8xf32>
    %c3 = arith.constant 3 : index
    %c0_13 = arith.constant 0 : index
    %c0_14 = arith.constant 0 : index
    %23 = vector.load %arg2[%c3, %c0_13, %c0_14] : memref<9x8x8xf32, #tpu.memory_space<vmem>>, vector<1x8x8xf32>
    %24 = vector.shape_cast %23 : vector<1x8x8xf32> to vector<8x8xf32>
    %cst_15 = arith.constant dense<0.000000e+00> : vector<256x8xf32>
    %25 = tpu.matmul %22, %24, %cst_15 {dimension_numbers = #tpu.dot_dimension_numbers<[1], [0], [0], [1], [0, 0, 1, 1], [], []>} : vector<256x8xf32>, vector<8x8xf32>, vector<256x8xf32> -> vector<256x8xf32>
    %26 = arith.addf %20, %25 : vector<256x8xf32>
    %27 = vector.extract_strided_slice %1 {offsets = [1, 1, 0], sizes = [16, 16, 8], strides = [1, 1, 1]} : vector<18x18x8xf32> to vector<16x16x8xf32>
    %28 = vector.shape_cast %27 : vector<16x16x8xf32> to vector<256x8xf32>
    %c4 = arith.constant 4 : index
    %c0_16 = arith.constant 0 : index
    %c0_17 = arith.constant 0 : index
    %29 = vector.load %arg2[%c4, %c0_16, %c0_17] : memref<9x8x8xf32, #tpu.memory_space<vmem>>, vector<1x8x8xf32>
    %30 = vector.shape_cast %29 : vector<1x8x8xf32> to vector<8x8xf32>
    %cst_18 = arith.constant dense<0.000000e+00> : vector<256x8xf32>
    %31 = tpu.matmul %28, %30, %cst_18 {dimension_numbers = #tpu.dot_dimension_numbers<[1], [0], [0], [1], [0, 0, 1, 1], [], []>} : vector<256x8xf32>, vector<8x8xf32>, vector<256x8xf32> -> vector<256x8xf32>
    %32 = arith.addf %26, %31 : vector<256x8xf32>
    %33 = vector.extract_strided_slice %1 {offsets = [1, 2, 0], sizes = [16, 16, 8], strides = [1, 1, 1]} : vector<18x18x8xf32> to vector<16x16x8xf32>
    %34 = vector.shape_cast %33 : vector<16x16x8xf32> to vector<256x8xf32>
    %c5 = arith.constant 5 : index
    %c0_19 = arith.constant 0 : index
    %c0_20 = arith.constant 0 : index
    %35 = vector.load %arg2[%c5, %c0_19, %c0_20] : memref<9x8x8xf32, #tpu.memory_space<vmem>>, vector<1x8x8xf32>
    %36 = vector.shape_cast %35 : vector<1x8x8xf32> to vector<8x8xf32>
    %cst_21 = arith.constant dense<0.000000e+00> : vector<256x8xf32>
    %37 = tpu.matmul %34, %36, %cst_21 {dimension_numbers = #tpu.dot_dimension_numbers<[1], [0], [0], [1], [0, 0, 1, 1], [], []>} : vector<256x8xf32>, vector<8x8xf32>, vector<256x8xf32> -> vector<256x8xf32>
    %38 = arith.addf %32, %37 : vector<256x8xf32>
    %39 = vector.extract_strided_slice %1 {offsets = [2, 0, 0], sizes = [16, 16, 8], strides = [1, 1, 1]} : vector<18x18x8xf32> to vector<16x16x8xf32>
    %40 = vector.shape_cast %39 : vector<16x16x8xf32> to vector<256x8xf32>
    %c6 = arith.constant 6 : index
    %c0_22 = arith.constant 0 : index
    %c0_23 = arith.constant 0 : index
    %41 = vector.load %arg2[%c6, %c0_22, %c0_23] : memref<9x8x8xf32, #tpu.memory_space<vmem>>, vector<1x8x8xf32>
    %42 = vector.shape_cast %41 : vector<1x8x8xf32> to vector<8x8xf32>
    %cst_24 = arith.constant dense<0.000000e+00> : vector<256x8xf32>
    %43 = tpu.matmul %40, %42, %cst_24 {dimension_numbers = #tpu.dot_dimension_numbers<[1], [0], [0], [1], [0, 0, 1, 1], [], []>} : vector<256x8xf32>, vector<8x8xf32>, vector<256x8xf32> -> vector<256x8xf32>
    %44 = arith.addf %38, %43 : vector<256x8xf32>
    %45 = vector.extract_strided_slice %1 {offsets = [2, 1, 0], sizes = [16, 16, 8], strides = [1, 1, 1]} : vector<18x18x8xf32> to vector<16x16x8xf32>
    %46 = vector.shape_cast %45 : vector<16x16x8xf32> to vector<256x8xf32>
    %c7 = arith.constant 7 : index
    %c0_25 = arith.constant 0 : index
    %c0_26 = arith.constant 0 : index
    %47 = vector.load %arg2[%c7, %c0_25, %c0_26] : memref<9x8x8xf32, #tpu.memory_space<vmem>>, vector<1x8x8xf32>
    %48 = vector.shape_cast %47 : vector<1x8x8xf32> to vector<8x8xf32>
    %cst_27 = arith.constant dense<0.000000e+00> : vector<256x8xf32>
    %49 = tpu.matmul %46, %48, %cst_27 {dimension_numbers = #tpu.dot_dimension_numbers<[1], [0], [0], [1], [0, 0, 1, 1], [], []>} : vector<256x8xf32>, vector<8x8xf32>, vector<256x8xf32> -> vector<256x8xf32>
    %50 = arith.addf %44, %49 : vector<256x8xf32>
    %51 = vector.extract_strided_slice %1 {offsets = [2, 2, 0], sizes = [16, 16, 8], strides = [1, 1, 1]} : vector<18x18x8xf32> to vector<16x16x8xf32>
    %52 = vector.shape_cast %51 : vector<16x16x8xf32> to vector<256x8xf32>
    %c8 = arith.constant 8 : index
    %c0_28 = arith.constant 0 : index
    %c0_29 = arith.constant 0 : index
    %53 = vector.load %arg2[%c8, %c0_28, %c0_29] : memref<9x8x8xf32, #tpu.memory_space<vmem>>, vector<1x8x8xf32>
    %54 = vector.shape_cast %53 : vector<1x8x8xf32> to vector<8x8xf32>
    %cst_30 = arith.constant dense<0.000000e+00> : vector<256x8xf32>
    %55 = tpu.matmul %52, %54, %cst_30 {dimension_numbers = #tpu.dot_dimension_numbers<[1], [0], [0], [1], [0, 0, 1, 1], [], []>} : vector<256x8xf32>, vector<8x8xf32>, vector<256x8xf32> -> vector<256x8xf32>
    %56 = arith.addf %50, %55 : vector<256x8xf32>
    %c0_31 = arith.constant 0 : index
    %c0_32 = arith.constant 0 : index
    %c0_33 = arith.constant 0 : index
    %57 = vector.load %arg3[%c0_31, %c0_32, %c0_33] : memref<1x256x8xf32, #tpu.memory_space<vmem>>, vector<1x256x8xf32>
    %58 = vector.shape_cast %57 : vector<1x256x8xf32> to vector<256x8xf32>
    %59 = vector.shape_cast %56 : vector<256x8xf32> to vector<1x256x8xf32>
    tpu.vector_store %arg3[%c0_31, %c0_32, %c0_33], %59 {strides = array<i32>} : memref<1x256x8xf32, #tpu.memory_space<vmem>>, vector<1x256x8xf32>,
    %cst_34 = arith.constant dense<0.000000e+00> : vector<8xf32>
    %60 = vector.multi_reduction <add>, %56, %cst_34 [0] : vector<256x8xf32> to vector<8xf32>
    %61 = vector.shape_cast %60 : vector<8xf32> to vector<1x8xf32>
    %c0_35 = arith.constant 0 : index
    %c0_36 = arith.constant 0 : index
    %c0_37 = arith.constant 0 : index
    %62 = vector.load %arg4[%c0_35, %c0_36, %c0_37] : memref<1x1x8xf32, #tpu.memory_space<vmem>>, vector<1x1x8xf32>
    %63 = vector.shape_cast %62 : vector<1x1x8xf32> to vector<1x8xf32>
    %64 = vector.shape_cast %61 : vector<1x8xf32> to vector<1x1x8xf32>
    tpu.vector_store %arg4[%c0_35, %c0_36, %c0_37], %64 {strides = array<i32>} : memref<1x1x8xf32, #tpu.memory_space<vmem>>, vector<1x1x8xf32>,
    %65 = arith.mulf %56, %56 : vector<256x8xf32>
    %cst_38 = arith.constant dense<0.000000e+00> : vector<8xf32>
    %66 = vector.multi_reduction <add>, %65, %cst_38 [0] : vector<256x8xf32> to vector<8xf32>
    %67 = vector.shape_cast %66 : vector<8xf32> to vector<1x8xf32>
    %c0_39 = arith.constant 0 : index
    %c0_40 = arith.constant 0 : index
    %c0_41 = arith.constant 0 : index
    %68 = vector.load %arg5[%c0_39, %c0_40, %c0_41] : memref<1x1x8xf32, #tpu.memory_space<vmem>>, vector<1x1x8xf32>
    %69 = vector.shape_cast %68 : vector<1x1x8xf32> to vector<1x8xf32>
    %70 = vector.shape_cast %67 : vector<1x8xf32> to vector<1x1x8xf32>
    tpu.vector_store %arg5[%c0_39, %c0_40, %c0_41], %70 {strides = array<i32>} : memref<1x1x8xf32, #tpu.memory_space<vmem>>, vector<1x1x8xf32>,
    return
  }
  func.func @transform_0(%arg0: i32) -> (i32, i32, i32, i32) {
    %c0_i32 = arith.constant 0 : i32
    %c0_i32_0 = arith.constant 0 : i32
    %c0_i32_1 = arith.constant 0 : i32
    %c0_i32_2 = arith.constant 0 : i32
    return %arg0, %c0_i32, %c0_i32_0, %c0_i32_1 : i32, i32, i32, i32
  }
  func.func @transform_1(%arg0: i32) -> (i32, i32, i32) {
    %c0_i32 = arith.constant 0 : i32
    %c0_i32_0 = arith.constant 0 : i32
    %c0_i32_1 = arith.constant 0 : i32
    %c0_i32_2 = arith.constant 0 : i32
    return %c0_i32, %c0_i32_0, %c0_i32_1 : i32, i32, i32
  }
  func.func @transform_2(%arg0: i32) -> (i32, i32, i32) {
    %c0_i32 = arith.constant 0 : i32
    %c0_i32_0 = arith.constant 0 : i32
    %c0_i32_1 = arith.constant 0 : i32
    return %arg0, %c0_i32, %c0_i32_0 : i32, i32, i32
  }
  func.func @transform_3(%arg0: i32) -> (i32, i32, i32) {
    %c0_i32 = arith.constant 0 : i32
    %c0_i32_0 = arith.constant 0 : i32
    %c0_i32_1 = arith.constant 0 : i32
    return %arg0, %c0_i32, %c0_i32_0 : i32, i32, i32
  }
  func.func @transform_4(%arg0: i32) -> (i32, i32, i32) {
    %c0_i32 = arith.constant 0 : i32
    %c0_i32_0 = arith.constant 0 : i32
    %c0_i32_1 = arith.constant 0 : i32
    return %arg0, %c0_i32, %c0_i32_0 : i32, i32, i32
  }
}

module attributes {stable_mosaic.version = 11 : i64} {
  func.func @_bn_add_relu_kernel(%arg0: i32, %arg1: memref<1x256x8xf32, #tpu.memory_space<vmem>>, %arg2: memref<1x8xf32, #tpu.memory_space<vmem>>, %arg3: memref<1x8xf32, #tpu.memory_space<vmem>>, %arg4: memref<1x256x8xf32, #tpu.memory_space<vmem>>, %arg5: memref<1x256x8xf32, #tpu.memory_space<vmem>>) attributes {dimension_semantics = [#tpu.dimension_semantics<parallel>], iteration_bounds = array<i64: 2>, scalar_prefetch = 0 : i64, scratch_operands = 0 : i64, tpu.core_type = #tpu.core_type<tc>, window_params = [{transform_indices = @transform_0, window_bounds = array<i64: 1, 256, 8>}, {pipeline_mode = #tpu.pipeline_mode<synchronous>, transform_indices = @transform_1, window_bounds = array<i64: 1, 8>}, {pipeline_mode = #tpu.pipeline_mode<synchronous>, transform_indices = @transform_2, window_bounds = array<i64: 1, 8>}, {transform_indices = @transform_3, window_bounds = array<i64: 1, 256, 8>}, {transform_indices = @transform_4, window_bounds = array<i64: 1, 256, 8>}]} {
    %c0 = arith.constant 0 : index
    %c0_0 = arith.constant 0 : index
    %c0_1 = arith.constant 0 : index
    %0 = vector.load %arg1[%c0, %c0_0, %c0_1] : memref<1x256x8xf32, #tpu.memory_space<vmem>>, vector<1x256x8xf32>
    %1 = vector.shape_cast %0 : vector<1x256x8xf32> to vector<256x8xf32>
    %c0_2 = arith.constant 0 : index
    %c0_3 = arith.constant 0 : index
    %2 = vector.load %arg2[%c0_2, %c0_3] : memref<1x8xf32, #tpu.memory_space<vmem>>, vector<1x8xf32>
    %3 = vector.broadcast %2 : vector<1x8xf32> to vector<256x8xf32>
    %4 = arith.mulf %1, %3 : vector<256x8xf32>
    %c0_4 = arith.constant 0 : index
    %c0_5 = arith.constant 0 : index
    %5 = vector.load %arg3[%c0_4, %c0_5] : memref<1x8xf32, #tpu.memory_space<vmem>>, vector<1x8xf32>
    %6 = vector.broadcast %5 : vector<1x8xf32> to vector<256x8xf32>
    %7 = arith.addf %4, %6 : vector<256x8xf32>
    %c0_6 = arith.constant 0 : index
    %c0_7 = arith.constant 0 : index
    %c0_8 = arith.constant 0 : index
    %8 = vector.load %arg4[%c0_6, %c0_7, %c0_8] : memref<1x256x8xf32, #tpu.memory_space<vmem>>, vector<1x256x8xf32>
    %9 = vector.shape_cast %8 : vector<1x256x8xf32> to vector<256x8xf32>
    %10 = arith.addf %7, %9 : vector<256x8xf32>
    %cst = arith.constant 0.000000e+00 : f32
    %11 = vector.broadcast %cst : f32 to vector<256x8xf32>
    %12 = arith.maximumf %10, %11 : vector<256x8xf32>
    %c0_9 = arith.constant 0 : index
    %c0_10 = arith.constant 0 : index
    %c0_11 = arith.constant 0 : index
    %13 = vector.load %arg5[%c0_9, %c0_10, %c0_11] : memref<1x256x8xf32, #tpu.memory_space<vmem>>, vector<1x256x8xf32>
    %14 = vector.shape_cast %13 : vector<1x256x8xf32> to vector<256x8xf32>
    %15 = vector.shape_cast %12 : vector<256x8xf32> to vector<1x256x8xf32>
    tpu.vector_store %arg5[%c0_9, %c0_10, %c0_11], %15 {strides = array<i32>} : memref<1x256x8xf32, #tpu.memory_space<vmem>>, vector<1x256x8xf32>,
    return
  }
  func.func @transform_0(%arg0: i32) -> (i32, i32, i32) {
    %c0_i32 = arith.constant 0 : i32
    %c0_i32_0 = arith.constant 0 : i32
    %c0_i32_1 = arith.constant 0 : i32
    return %arg0, %c0_i32, %c0_i32_0 : i32, i32, i32
  }
  func.func @transform_1(%arg0: i32) -> (i32, i32) {
    %c0_i32 = arith.constant 0 : i32
    %c0_i32_0 = arith.constant 0 : i32
    %c0_i32_1 = arith.constant 0 : i32
    return %c0_i32, %c0_i32_0 : i32, i32
  }
  func.func @transform_2(%arg0: i32) -> (i32, i32) {
    %c0_i32 = arith.constant 0 : i32
    %c0_i32_0 = arith.constant 0 : i32
    %c0_i32_1 = arith.constant 0 : i32
    return %c0_i32, %c0_i32_0 : i32, i32
  }
  func.func @transform_3(%arg0: i32) -> (i32, i32, i32) {
    %c0_i32 = arith.constant 0 : i32
    %c0_i32_0 = arith.constant 0 : i32
    %c0_i32_1 = arith.constant 0 : i32
    return %arg0, %c0_i32, %c0_i32_0 : i32, i32, i32
  }
  func.func @transform_4(%arg0: i32) -> (i32, i32, i32) {
    %c0_i32 = arith.constant 0 : i32
    %c0_i32_0 = arith.constant 0 : i32
    %c0_i32_1 = arith.constant 0 : i32
    return %arg0, %c0_i32, %c0_i32_0 : i32, i32, i32
  }
}

module attributes {stable_mosaic.version = 11 : i64} {
  func.func @_bn_relu_conv_stats_kernel(%arg0: i32, %arg1: memref<1x256x8xf32, #tpu.memory_space<vmem>>, %arg2: memref<1x8xf32, #tpu.memory_space<vmem>>, %arg3: memref<1x8xf32, #tpu.memory_space<vmem>>, %arg4: memref<9x8x8xf32, #tpu.memory_space<vmem>>, %arg5: memref<1x256x8xf32, #tpu.memory_space<vmem>>, %arg6: memref<1x1x8xf32, #tpu.memory_space<vmem>>, %arg7: memref<1x1x8xf32, #tpu.memory_space<vmem>>, %arg8: memref<18x18x8xf32, #tpu.memory_space<vmem>>) attributes {dimension_semantics = [#tpu.dimension_semantics<parallel>], iteration_bounds = array<i64: 2>, scalar_prefetch = 0 : i64, scratch_operands = 1 : i64, tpu.core_type = #tpu.core_type<tc>, window_params = [{transform_indices = @transform_0, window_bounds = array<i64: 1, 256, 8>}, {pipeline_mode = #tpu.pipeline_mode<synchronous>, transform_indices = @transform_1, window_bounds = array<i64: 1, 8>}, {pipeline_mode = #tpu.pipeline_mode<synchronous>, transform_indices = @transform_2, window_bounds = array<i64: 1, 8>}, {pipeline_mode = #tpu.pipeline_mode<synchronous>, transform_indices = @transform_3, window_bounds = array<i64: 9, 8, 8>}, {transform_indices = @transform_4, window_bounds = array<i64: 1, 256, 8>}, {transform_indices = @transform_5, window_bounds = array<i64: 1, 1, 8>}, {transform_indices = @transform_6, window_bounds = array<i64: 1, 1, 8>}]} {
    %c0 = arith.constant 0 : index
    %c0_0 = arith.constant 0 : index
    %c0_1 = arith.constant 0 : index
    %0 = vector.load %arg1[%c0, %c0_0, %c0_1] : memref<1x256x8xf32, #tpu.memory_space<vmem>>, vector<1x256x8xf32>
    %1 = vector.shape_cast %0 : vector<1x256x8xf32> to vector<256x8xf32>
    %c0_2 = arith.constant 0 : index
    %c0_3 = arith.constant 0 : index
    %2 = vector.load %arg2[%c0_2, %c0_3] : memref<1x8xf32, #tpu.memory_space<vmem>>, vector<1x8xf32>
    %3 = vector.broadcast %2 : vector<1x8xf32> to vector<256x8xf32>
    %4 = arith.mulf %1, %3 : vector<256x8xf32>
    %c0_4 = arith.constant 0 : index
    %c0_5 = arith.constant 0 : index
    %5 = vector.load %arg3[%c0_4, %c0_5] : memref<1x8xf32, #tpu.memory_space<vmem>>, vector<1x8xf32>
    %6 = vector.broadcast %5 : vector<1x8xf32> to vector<256x8xf32>
    %7 = arith.addf %4, %6 : vector<256x8xf32>
    %cst = arith.constant 0.000000e+00 : f32
    %8 = vector.broadcast %cst : f32 to vector<256x8xf32>
    %9 = arith.maximumf %7, %8 : vector<256x8xf32>
    %cst_6 = arith.constant 0.000000e+00 : f32
    %10 = vector.broadcast %cst_6 : f32 to vector<18x18x8xf32>
    %c0_7 = arith.constant 0 : index
    %c0_8 = arith.constant 0 : index
    %c0_9 = arith.constant 0 : index
    %11 = vector.load %arg8[%c0_7, %c0_8, %c0_9] : memref<18x18x8xf32, #tpu.memory_space<vmem>>, vector<18x18x8xf32>
    tpu.vector_store %arg8[%c0_7, %c0_8, %c0_9], %10 {strides = array<i32>} : memref<18x18x8xf32, #tpu.memory_space<vmem>>, vector<18x18x8xf32>,
    %12 = vector.shape_cast %9 : vector<256x8xf32> to vector<16x16x8xf32>
    %c1 = arith.constant 1 : index
    %c1_10 = arith.constant 1 : index
    %c0_11 = arith.constant 0 : index
    %13 = vector.load %arg8[%c1, %c1_10, %c0_11] : memref<18x18x8xf32, #tpu.memory_space<vmem>>, vector<16x16x8xf32>
    tpu.vector_store %arg8[%c1, %c1_10, %c0_11], %12 {strides = array<i32>} : memref<18x18x8xf32, #tpu.memory_space<vmem>>, vector<16x16x8xf32>,
    %cst_12 = arith.constant 0.000000e+00 : f32
    %14 = vector.broadcast %cst_12 : f32 to vector<256x8xf32>
    %c0_13 = arith.constant 0 : index
    %c0_14 = arith.constant 0 : index
    %c0_15 = arith.constant 0 : index
    %15 = vector.load %arg8[%c0_13, %c0_14, %c0_15] : memref<18x18x8xf32, #tpu.memory_space<vmem>>, vector<16x16x8xf32>
    %16 = vector.shape_cast %15 : vector<16x16x8xf32> to vector<256x8xf32>
    %c0_16 = arith.constant 0 : index
    %c0_17 = arith.constant 0 : index
    %c0_18 = arith.constant 0 : index
    %17 = vector.load %arg4[%c0_16, %c0_17, %c0_18] : memref<9x8x8xf32, #tpu.memory_space<vmem>>, vector<1x8x8xf32>
    %18 = vector.shape_cast %17 : vector<1x8x8xf32> to vector<8x8xf32>
    %cst_19 = arith.constant dense<0.000000e+00> : vector<256x8xf32>
    %19 = tpu.matmul %16, %18, %cst_19 {dimension_numbers = #tpu.dot_dimension_numbers<[1], [0], [0], [1], [0, 0, 1, 1], [], []>} : vector<256x8xf32>, vector<8x8xf32>, vector<256x8xf32> -> vector<256x8xf32>
    %20 = arith.addf %14, %19 : vector<256x8xf32>
    %c0_20 = arith.constant 0 : index
    %c1_21 = arith.constant 1 : index
    %c0_22 = arith.constant 0 : index
    %21 = vector.load %arg8[%c0_20, %c1_21, %c0_22] : memref<18x18x8xf32, #tpu.memory_space<vmem>>, vector<16x16x8xf32>
    %22 = vector.shape_cast %21 : vector<16x16x8xf32> to vector<256x8xf32>
    %c1_23 = arith.constant 1 : index
    %c0_24 = arith.constant 0 : index
    %c0_25 = arith.constant 0 : index
    %23 = vector.load %arg4[%c1_23, %c0_24, %c0_25] : memref<9x8x8xf32, #tpu.memory_space<vmem>>, vector<1x8x8xf32>
    %24 = vector.shape_cast %23 : vector<1x8x8xf32> to vector<8x8xf32>
    %cst_26 = arith.constant dense<0.000000e+00> : vector<256x8xf32>
    %25 = tpu.matmul %22, %24, %cst_26 {dimension_numbers = #tpu.dot_dimension_numbers<[1], [0], [0], [1], [0, 0, 1, 1], [], []>} : vector<256x8xf32>, vector<8x8xf32>, vector<256x8xf32> -> vector<256x8xf32>
    %26 = arith.addf %20, %25 : vector<256x8xf32>
    %c0_27 = arith.constant 0 : index
    %c2 = arith.constant 2 : index
    %c0_28 = arith.constant 0 : index
    %27 = vector.load %arg8[%c0_27, %c2, %c0_28] : memref<18x18x8xf32, #tpu.memory_space<vmem>>, vector<16x16x8xf32>
    %28 = vector.shape_cast %27 : vector<16x16x8xf32> to vector<256x8xf32>
    %c2_29 = arith.constant 2 : index
    %c0_30 = arith.constant 0 : index
    %c0_31 = arith.constant 0 : index
    %29 = vector.load %arg4[%c2_29, %c0_30, %c0_31] : memref<9x8x8xf32, #tpu.memory_space<vmem>>, vector<1x8x8xf32>
    %30 = vector.shape_cast %29 : vector<1x8x8xf32> to vector<8x8xf32>
    %cst_32 = arith.constant dense<0.000000e+00> : vector<256x8xf32>
    %31 = tpu.matmul %28, %30, %cst_32 {dimension_numbers = #tpu.dot_dimension_numbers<[1], [0], [0], [1], [0, 0, 1, 1], [], []>} : vector<256x8xf32>, vector<8x8xf32>, vector<256x8xf32> -> vector<256x8xf32>
    %32 = arith.addf %26, %31 : vector<256x8xf32>
    %c1_33 = arith.constant 1 : index
    %c0_34 = arith.constant 0 : index
    %c0_35 = arith.constant 0 : index
    %33 = vector.load %arg8[%c1_33, %c0_34, %c0_35] : memref<18x18x8xf32, #tpu.memory_space<vmem>>, vector<16x16x8xf32>
    %34 = vector.shape_cast %33 : vector<16x16x8xf32> to vector<256x8xf32>
    %c3 = arith.constant 3 : index
    %c0_36 = arith.constant 0 : index
    %c0_37 = arith.constant 0 : index
    %35 = vector.load %arg4[%c3, %c0_36, %c0_37] : memref<9x8x8xf32, #tpu.memory_space<vmem>>, vector<1x8x8xf32>
    %36 = vector.shape_cast %35 : vector<1x8x8xf32> to vector<8x8xf32>
    %cst_38 = arith.constant dense<0.000000e+00> : vector<256x8xf32>
    %37 = tpu.matmul %34, %36, %cst_38 {dimension_numbers = #tpu.dot_dimension_numbers<[1], [0], [0], [1], [0, 0, 1, 1], [], []>} : vector<256x8xf32>, vector<8x8xf32>, vector<256x8xf32> -> vector<256x8xf32>
    %38 = arith.addf %32, %37 : vector<256x8xf32>
    %c1_39 = arith.constant 1 : index
    %c1_40 = arith.constant 1 : index
    %c0_41 = arith.constant 0 : index
    %39 = vector.load %arg8[%c1_39, %c1_40, %c0_41] : memref<18x18x8xf32, #tpu.memory_space<vmem>>, vector<16x16x8xf32>
    %40 = vector.shape_cast %39 : vector<16x16x8xf32> to vector<256x8xf32>
    %c4 = arith.constant 4 : index
    %c0_42 = arith.constant 0 : index
    %c0_43 = arith.constant 0 : index
    %41 = vector.load %arg4[%c4, %c0_42, %c0_43] : memref<9x8x8xf32, #tpu.memory_space<vmem>>, vector<1x8x8xf32>
    %42 = vector.shape_cast %41 : vector<1x8x8xf32> to vector<8x8xf32>
    %cst_44 = arith.constant dense<0.000000e+00> : vector<256x8xf32>
    %43 = tpu.matmul %40, %42, %cst_44 {dimension_numbers = #tpu.dot_dimension_numbers<[1], [0], [0], [1], [0, 0, 1, 1], [], []>} : vector<256x8xf32>, vector<8x8xf32>, vector<256x8xf32> -> vector<256x8xf32>
    %44 = arith.addf %38, %43 : vector<256x8xf32>
    %c1_45 = arith.constant 1 : index
    %c2_46 = arith.constant 2 : index
    %c0_47 = arith.constant 0 : index
    %45 = vector.load %arg8[%c1_45, %c2_46, %c0_47] : memref<18x18x8xf32, #tpu.memory_space<vmem>>, vector<16x16x8xf32>
    %46 = vector.shape_cast %45 : vector<16x16x8xf32> to vector<256x8xf32>
    %c5 = arith.constant 5 : index
    %c0_48 = arith.constant 0 : index
    %c0_49 = arith.constant 0 : index
    %47 = vector.load %arg4[%c5, %c0_48, %c0_49] : memref<9x8x8xf32, #tpu.memory_space<vmem>>, vector<1x8x8xf32>
    %48 = vector.shape_cast %47 : vector<1x8x8xf32> to vector<8x8xf32>
    %cst_50 = arith.constant dense<0.000000e+00> : vector<256x8xf32>
    %49 = tpu.matmul %46, %48, %cst_50 {dimension_numbers = #tpu.dot_dimension_numbers<[1], [0], [0], [1], [0, 0, 1, 1], [], []>} : vector<256x8xf32>, vector<8x8xf32>, vector<256x8xf32> -> vector<256x8xf32>
    %50 = arith.addf %44, %49 : vector<256x8xf32>
    %c2_51 = arith.constant 2 : index
    %c0_52 = arith.constant 0 : index
    %c0_53 = arith.constant 0 : index
    %51 = vector.load %arg8[%c2_51, %c0_52, %c0_53] : memref<18x18x8xf32, #tpu.memory_space<vmem>>, vector<16x16x8xf32>
    %52 = vector.shape_cast %51 : vector<16x16x8xf32> to vector<256x8xf32>
    %c6 = arith.constant 6 : index
    %c0_54 = arith.constant 0 : index
    %c0_55 = arith.constant 0 : index
    %53 = vector.load %arg4[%c6, %c0_54, %c0_55] : memref<9x8x8xf32, #tpu.memory_space<vmem>>, vector<1x8x8xf32>
    %54 = vector.shape_cast %53 : vector<1x8x8xf32> to vector<8x8xf32>
    %cst_56 = arith.constant dense<0.000000e+00> : vector<256x8xf32>
    %55 = tpu.matmul %52, %54, %cst_56 {dimension_numbers = #tpu.dot_dimension_numbers<[1], [0], [0], [1], [0, 0, 1, 1], [], []>} : vector<256x8xf32>, vector<8x8xf32>, vector<256x8xf32> -> vector<256x8xf32>
    %56 = arith.addf %50, %55 : vector<256x8xf32>
    %c2_57 = arith.constant 2 : index
    %c1_58 = arith.constant 1 : index
    %c0_59 = arith.constant 0 : index
    %57 = vector.load %arg8[%c2_57, %c1_58, %c0_59] : memref<18x18x8xf32, #tpu.memory_space<vmem>>, vector<16x16x8xf32>
    %58 = vector.shape_cast %57 : vector<16x16x8xf32> to vector<256x8xf32>
    %c7 = arith.constant 7 : index
    %c0_60 = arith.constant 0 : index
    %c0_61 = arith.constant 0 : index
    %59 = vector.load %arg4[%c7, %c0_60, %c0_61] : memref<9x8x8xf32, #tpu.memory_space<vmem>>, vector<1x8x8xf32>
    %60 = vector.shape_cast %59 : vector<1x8x8xf32> to vector<8x8xf32>
    %cst_62 = arith.constant dense<0.000000e+00> : vector<256x8xf32>
    %61 = tpu.matmul %58, %60, %cst_62 {dimension_numbers = #tpu.dot_dimension_numbers<[1], [0], [0], [1], [0, 0, 1, 1], [], []>} : vector<256x8xf32>, vector<8x8xf32>, vector<256x8xf32> -> vector<256x8xf32>
    %62 = arith.addf %56, %61 : vector<256x8xf32>
    %c2_63 = arith.constant 2 : index
    %c2_64 = arith.constant 2 : index
    %c0_65 = arith.constant 0 : index
    %63 = vector.load %arg8[%c2_63, %c2_64, %c0_65] : memref<18x18x8xf32, #tpu.memory_space<vmem>>, vector<16x16x8xf32>
    %64 = vector.shape_cast %63 : vector<16x16x8xf32> to vector<256x8xf32>
    %c8 = arith.constant 8 : index
    %c0_66 = arith.constant 0 : index
    %c0_67 = arith.constant 0 : index
    %65 = vector.load %arg4[%c8, %c0_66, %c0_67] : memref<9x8x8xf32, #tpu.memory_space<vmem>>, vector<1x8x8xf32>
    %66 = vector.shape_cast %65 : vector<1x8x8xf32> to vector<8x8xf32>
    %cst_68 = arith.constant dense<0.000000e+00> : vector<256x8xf32>
    %67 = tpu.matmul %64, %66, %cst_68 {dimension_numbers = #tpu.dot_dimension_numbers<[1], [0], [0], [1], [0, 0, 1, 1], [], []>} : vector<256x8xf32>, vector<8x8xf32>, vector<256x8xf32> -> vector<256x8xf32>
    %68 = arith.addf %62, %67 : vector<256x8xf32>
    %c0_69 = arith.constant 0 : index
    %c0_70 = arith.constant 0 : index
    %c0_71 = arith.constant 0 : index
    %69 = vector.load %arg5[%c0_69, %c0_70, %c0_71] : memref<1x256x8xf32, #tpu.memory_space<vmem>>, vector<1x256x8xf32>
    %70 = vector.shape_cast %69 : vector<1x256x8xf32> to vector<256x8xf32>
    %71 = vector.shape_cast %68 : vector<256x8xf32> to vector<1x256x8xf32>
    tpu.vector_store %arg5[%c0_69, %c0_70, %c0_71], %71 {strides = array<i32>} : memref<1x256x8xf32, #tpu.memory_space<vmem>>, vector<1x256x8xf32>,
    %cst_72 = arith.constant dense<0.000000e+00> : vector<8xf32>
    %72 = vector.multi_reduction <add>, %68, %cst_72 [0] : vector<256x8xf32> to vector<8xf32>
    %73 = vector.shape_cast %72 : vector<8xf32> to vector<1x8xf32>
    %c0_73 = arith.constant 0 : index
    %c0_74 = arith.constant 0 : index
    %c0_75 = arith.constant 0 : index
    %74 = vector.load %arg6[%c0_73, %c0_74, %c0_75] : memref<1x1x8xf32, #tpu.memory_space<vmem>>, vector<1x1x8xf32>
    %75 = vector.shape_cast %74 : vector<1x1x8xf32> to vector<1x8xf32>
    %76 = vector.shape_cast %73 : vector<1x8xf32> to vector<1x1x8xf32>
    tpu.vector_store %arg6[%c0_73, %c0_74, %c0_75], %76 {strides = array<i32>} : memref<1x1x8xf32, #tpu.memory_space<vmem>>, vector<1x1x8xf32>,
    %77 = arith.mulf %68, %68 : vector<256x8xf32>
    %cst_76 = arith.constant dense<0.000000e+00> : vector<8xf32>
    %78 = vector.multi_reduction <add>, %77, %cst_76 [0] : vector<256x8xf32> to vector<8xf32>
    %79 = vector.shape_cast %78 : vector<8xf32> to vector<1x8xf32>
    %c0_77 = arith.constant 0 : index
    %c0_78 = arith.constant 0 : index
    %c0_79 = arith.constant 0 : index
    %80 = vector.load %arg7[%c0_77, %c0_78, %c0_79] : memref<1x1x8xf32, #tpu.memory_space<vmem>>, vector<1x1x8xf32>
    %81 = vector.shape_cast %80 : vector<1x1x8xf32> to vector<1x8xf32>
    %82 = vector.shape_cast %79 : vector<1x8xf32> to vector<1x1x8xf32>
    tpu.vector_store %arg7[%c0_77, %c0_78, %c0_79], %82 {strides = array<i32>} : memref<1x1x8xf32, #tpu.memory_space<vmem>>, vector<1x1x8xf32>,
    return
  }
  func.func @transform_0(%arg0: i32) -> (i32, i32, i32) {
    %c0_i32 = arith.constant 0 : i32
    %c0_i32_0 = arith.constant 0 : i32
    %c0_i32_1 = arith.constant 0 : i32
    return %arg0, %c0_i32, %c0_i32_0 : i32, i32, i32
  }
  func.func @transform_1(%arg0: i32) -> (i32, i32) {
    %c0_i32 = arith.constant 0 : i32
    %c0_i32_0 = arith.constant 0 : i32
    %c0_i32_1 = arith.constant 0 : i32
    return %c0_i32, %c0_i32_0 : i32, i32
  }
  func.func @transform_2(%arg0: i32) -> (i32, i32) {
    %c0_i32 = arith.constant 0 : i32
    %c0_i32_0 = arith.constant 0 : i32
    %c0_i32_1 = arith.constant 0 : i32
    return %c0_i32, %c0_i32_0 : i32, i32
  }
  func.func @transform_3(%arg0: i32) -> (i32, i32, i32) {
    %c0_i32 = arith.constant 0 : i32
    %c0_i32_0 = arith.constant 0 : i32
    %c0_i32_1 = arith.constant 0 : i32
    %c0_i32_2 = arith.constant 0 : i32
    return %c0_i32, %c0_i32_0, %c0_i32_1 : i32, i32, i32
  }
  func.func @transform_4(%arg0: i32) -> (i32, i32, i32) {
    %c0_i32 = arith.constant 0 : i32
    %c0_i32_0 = arith.constant 0 : i32
    %c0_i32_1 = arith.constant 0 : i32
    return %arg0, %c0_i32, %c0_i32_0 : i32, i32, i32
  }
  func.func @transform_5(%arg0: i32) -> (i32, i32, i32) {
    %c0_i32 = arith.constant 0 : i32
    %c0_i32_0 = arith.constant 0 : i32
    %c0_i32_1 = arith.constant 0 : i32
    return %arg0, %c0_i32, %c0_i32_0 : i32, i32, i32
  }
  func.func @transform_6(%arg0: i32) -> (i32, i32, i32) {
    %c0_i32 = arith.constant 0 : i32
    %c0_i32_0 = arith.constant 0 : i32
    %c0_i32_1 = arith.constant 0 : i32
    return %arg0, %c0_i32, %c0_i32_0 : i32, i32, i32
  }
}

</mosaic_0001>

<bundles_post_ra>
// kernel: basic_block_forward.5
= control target key start
LH: loop header
LB: loop body
LE: loop exit
PB: predicated region body
PF: predicated region fallthrough
CT: control target
= control target key end

     0   :  { %s583_s15 = smov 0   ;;  %s816_s0 = inlined_call_operand.vmem [shape: f32[2,256,8], index: 0, kind: input, shape index: {}]   ;;  %s817_s1 = inlined_call_operand.vmem [shape: f32[1,8], index: 1, kind: input, shape index: {}]   ;;  %s818_s2 = inlined_call_operand.vmem [shape: f32[1,8], index: 2, kind: input, shape index: {}]   ;;  %s819_s3 = inlined_call_operand.vmem [shape: f32[2,256,8], index: 3, kind: input, shape index: {}]   ;;  %s820_s4 = inlined_call_operand.vmem [shape: f32[2,256,8], index: 4, kind: output, shape index: {}]  }
   0x1 LB: > { %s524_s16 = sadd.s32 4294967295, %s556_s15   ;;  %p528_p0 = scmp.ge.s32.totalorder %s556_s15, 1  ;;  %s556_s15 = sphi %s583_s15, %s14_s15  }
   0x2   : > { %p172_p1 = scmp.lt.s32.totalorder %s556_s15, 3 }
   0x4   : > { %p173_p2 = pnand %p528_p0, %p172_p1 }
   0x5   : > { %p203_p3 = scmp.lt.s32.totalorder (!%p173_p2), %s524_s16, 1 }
   0x6   : > { %176 = sbr.rel (%p173_p2) target bundleno = 53 (0x35), region = 36 }
   0xb   : > { %s822_s16 = smov (!%p203_p3, %s524_s16), 1  ;;  %v596_v0 = vld [vmem:[%s817_s1] ss:$0 sm:$0xff]  ;;  %vm424_vm0 = vcmask 64512  }
   0xc   : > { %s591_s17 = sshll.u32 %s822_s16, 8  ;;  %v614_v2 = vld [vmem:[%s818_s2] ss:$0 sm:$0xff] }
   0xd   : > { %s602_s22 = scalar_lea.vmem %s816_s0, %s591_s17  ;;  %s608_s25 = scalar_lea.vmem %s819_s3, %s591_s17 }
   0xe   : > { %v218_v1 = vld [vmem:[%s602_s22] sm:$0xff]  ;;  %v219_v3 = vld [vmem:[%s602_s22 + $0x8] sm:$0xff]  ;;  %v220_v7 = vld [vmem:[%s602_s22 + $0x10] sm:$0xff]  ;;  %s644_s30 = scalar_lea.vmem %s820_s4, %s591_s17 }
   0xf   : > { %v257_v4 = vmul.f32 %v596_v0, %v218_v1  ;;  %v328_v5 = vld [vmem:[%s608_s25] sm:$0xff]  ;;  %v258_v6 = vmul.f32 %v596_v0, %v219_v3  ;;  %v329_v8 = vld [vmem:[%s608_s25 + $0x8] sm:$0xff]  ;;  %v259_v9 = vmul.f32 %v596_v0, %v220_v7  ;;  %v221_v10 = vld [vmem:[%s602_s22 + $0x18] sm:$0xff] }
  0x10   : > { %v222_v11 = vld [vmem:[%s602_s22 + $0x20] sm:$0xff]  ;;  %v330_v14 = vld [vmem:[%s608_s25 + $0x10] sm:$0xff]  ;;  %v260_v15 = vmul.f32 %v596_v0, %v221_v10  ;;  %v331_v16 = vld [vmem:[%s608_s25 + $0x18] sm:$0xff] }
  0x11   : > { %v296_v12 = vadd.f32 %v614_v2, %v257_v4  ;;  %v297_v13 = vadd.f32 %v614_v2, %v258_v6  ;;  %v261_v17 = vmul.f32 %v596_v0, %v222_v11  ;;  %v223_v18 = vld [vmem:[%s602_s22 + $0x28] sm:$0xff]  ;;  %v298_v19 = vadd.f32 %v614_v2, %v259_v9  ;;  %v332_v20 = vld [vmem:[%s608_s25 + $0x20] sm:$0xff]  ;;  %v224_v22 = vld [vmem:[%s602_s22 + $0x30] sm:$0xff] }
  0x12   : > { %v262_v21 = vmul.f32 %v596_v0, %v223_v18  ;;  %v225_v23 = vld [vmem:[%s602_s22 + $0x38] sm:$0xff]  ;;  %v299_v26 = vadd.f32 %v614_v2, %v260_v15  ;;  %v333_v28 = vld [vmem:[%s608_s25 + $0x28] sm:$0xff]  ;;  %v263_v31 = vmul.f32 %v596_v0, %v224_v22  ;;  %v226_v33 = vld [vmem:[%s602_s22 + $0x40] sm:$0xff] }
  0x13   : > { %v360_v24 = vadd.f32 %v328_v5, %v296_v12  ;;  %v361_v25 = vadd.f32 %v329_v8, %v297_v13  ;;  %v300_v27 = vadd.f32 %v614_v2, %v261_v17  ;;  %v362_v29 = vadd.f32 %v330_v14, %v298_v19  ;;  %v227_v34 = vld [vmem:[%s602_s22 + $0x48] sm:$0xff]  ;;  %v334_v39 = vld [vmem:[%s608_s25 + $0x30] sm:$0xff]  ;;  %v335_v40 = vld [vmem:[%s608_s25 + $0x38] sm:$0xff] }
  0x14   : > { %v301_v30 = vadd.f32 %v614_v2, %v262_v21  ;;  %v264_v32 = vmul.f32 %v596_v0, %v225_v23  ;;  %v363_v37 = vadd.f32 %v331_v16, %v299_v26  ;;  %v228_v41 = vld [vmem:[%s602_s22 + $0x50] sm:$0xff]  ;;  %v302_v44 = vadd.f32 %v614_v2, %v263_v31  ;;  %v229_v46 = vld [vmem:[%s602_s22 + $0x58] sm:$0xff]  ;;  %v230_v47 = vld [vmem:[%s602_s22 + $0x60] sm:$0xff] }
  0x15   : > { %v392_v35 = vmax.f32 %v360_v24, 0.0  ;;  %v393_v36 = vmax.f32 %v361_v25, 0.0  ;;  %v364_v38 = vadd.f32 %v332_v20, %v300_v27  ;;  %v394_v42 = vmax.f32 %v362_v29, 0.0  ;;  %v231_v52 = vld [vmem:[%s602_s22 + $0x68] sm:$0xff]  ;;  %v336_v56 = vld [vmem:[%s608_s25 + $0x40] sm:$0xff]  ;;  %v338_v61 = vld [vmem:[%s608_s25 + $0x50] sm:$0xff] }
  0x16   : > { %v365_v43 = vadd.f32 %v333_v28, %v301_v30  ;;  %v303_v45 = vadd.f32 %v614_v2, %v264_v32  ;;  %v395_v48 = vmax.f32 %v363_v37, 0.0  ;;  %v265_v50 = vmul.f32 %v596_v0, %v226_v33  ;;  %v337_v57 = vld [vmem:[%s608_s25 + $0x48] sm:$0xff]  ;;  %v232_v1 = vld [vmem:[%s602_s22 + $0x70] sm:$0xff]  ;;  %v233_v3 = vld [vmem:[%s602_s22 + $0x78] sm:$0xff] }
  0x17   : > { %425 = vst.msk [vmem:[%s644_s30] sm:$0xff] %vm424_vm0, %v392_v35  ;;  %426 = vst.msk [vmem:[%s644_s30 + $0x8] sm:$0xff] %vm424_vm0, %v393_v36  ;;  %v396_v49 = vmax.f32 %v364_v38, 0.0  ;;  %v266_v51 = vmul.f32 %v596_v0, %v227_v34  ;;  %v366_v54 = vadd.f32 %v334_v39, %v302_v44  ;;  %v267_v58 = vmul.f32 %v596_v0, %v228_v41  ;;  %v339_v7 = vld [vmem:[%s608_s25 + $0x58] sm:$0xff]  ;;  %v340_v8 = vld [vmem:[%s608_s25 + $0x60] sm:$0xff] }
  0x18   : > { %427 = vst.msk [vmem:[%s644_s30 + $0x10] sm:$0xff] %vm424_vm0, %v394_v42  ;;  %v397_v53 = vmax.f32 %v365_v43, 0.0  ;;  %v367_v55 = vadd.f32 %v335_v40, %v303_v45  ;;  %428 = vst.msk [vmem:[%s644_s30 + $0x18] sm:$0xff] %vm424_vm0, %v395_v48  ;;  %v304_v59 = vadd.f32 %v614_v2, %v265_v50  ;;  %v268_v62 = vmul.f32 %v596_v0, %v229_v46  ;;  %v341_v14 = vld [vmem:[%s608_s25 + $0x68] sm:$0xff]  ;;  %v234_v19 = vld [vmem:[%s602_s22 + $0x80] sm:$0xff] }
  0x19   : > { %429 = vst.msk [vmem:[%s644_s30 + $0x20] sm:$0xff] %vm424_vm0, %v396_v49  ;;  %v305_v60 = vadd.f32 %v614_v2, %v266_v51  ;;  %v269_v63 = vmul.f32 %v596_v0, %v230_v47  ;;  %v398_v4 = vmax.f32 %v366_v54, 0.0  ;;  %v306_v6 = vadd.f32 %v614_v2, %v267_v58  ;;  %v235_v20 = vld [vmem:[%s602_s22 + $0x88] sm:$0xff]  ;;  %v342_v25 = vld [vmem:[%s608_s25 + $0x70] sm:$0xff]  ;;  %v343_v26 = vld [vmem:[%s608_s25 + $0x78] sm:$0xff] }
  0x1a   : > { %430 = vst.msk [vmem:[%s644_s30 + $0x28] sm:$0xff] %vm424_vm0, %v397_v53  ;;  %v399_v5 = vmax.f32 %v367_v55, 0.0  ;;  %v270_v9 = vmul.f32 %v596_v0, %v231_v52  ;;  %v368_v10 = vadd.f32 %v336_v56, %v304_v59  ;;  %v307_v12 = vadd.f32 %v614_v2, %v268_v62  ;;  %v236_v27 = vld [vmem:[%s602_s22 + $0x90] sm:$0xff]  ;;  %v237_v32 = vld [vmem:[%s602_s22 + $0x98] sm:$0xff]  ;;  %v238_v33 = vld [vmem:[%s602_s22 + $0xa0] sm:$0xff] }
  0x1b   : > { %v369_v11 = vadd.f32 %v337_v57, %v305_v60  ;;  %v308_v13 = vadd.f32 %v614_v2, %v269_v63  ;;  %431 = vst.msk [vmem:[%s644_s30 + $0x30] sm:$0xff] %vm424_vm0, %v398_v4  ;;  %v370_v15 = vadd.f32 %v338_v61, %v306_v6  ;;  %v271_v17 = vmul.f32 %v596_v0, %v232_v1  ;;  %v239_v38 = vld [vmem:[%s602_s22 + $0xa8] sm:$0xff]  ;;  %v344_v42 = vld [vmem:[%s608_s25 + $0x80] sm:$0xff]  ;;  %v346_v47 = vld [vmem:[%s608_s25 + $0x90] sm:$0xff] }
  0x1c   : > { %432 = vst.msk [vmem:[%s644_s30 + $0x38] sm:$0xff] %vm424_vm0, %v399_v5  ;;  %v309_v16 = vadd.f32 %v614_v2, %v270_v9  ;;  %v272_v18 = vmul.f32 %v596_v0, %v233_v3  ;;  %v400_v21 = vmax.f32 %v368_v10, 0.0  ;;  %v371_v23 = vadd.f32 %v339_v7, %v307_v12  ;;  %v345_v43 = vld [vmem:[%s608_s25 + $0x88] sm:$0xff]  ;;  %v240_v50 = vld [vmem:[%s602_s22 + $0xb0] sm:$0xff]  ;;  %v241_v51 = vld [vmem:[%s602_s22 + $0xb8] sm:$0xff] }
  0x1d   : > { %v401_v22 = vmax.f32 %v369_v11, 0.0  ;;  %v372_v24 = vadd.f32 %v340_v8, %v308_v13  ;;  %v402_v28 = vmax.f32 %v370_v15, 0.0  ;;  %v310_v30 = vadd.f32 %v614_v2, %v271_v17  ;;  %v347_v55 = vld [vmem:[%s608_s25 + $0x98] sm:$0xff]  ;;  %v348_v56 = vld [vmem:[%s608_s25 + $0xa0] sm:$0xff]  ;;  %v349_v62 = vld [vmem:[%s608_s25 + $0xa8] sm:$0xff] }
  0x1e   : > { %v373_v29 = vadd.f32 %v341_v14, %v309_v16  ;;  %v311_v31 = vadd.f32 %v614_v2, %v272_v18  ;;  %433 = vst.msk [vmem:[%s644_s30 + $0x40] sm:$0xff] %vm424_vm0, %v400_v21  ;;  %v403_v34 = vmax.f32 %v371_v23, 0.0  ;;  %v273_v36 = vmul.f32 %v596_v0, %v234_v19  ;;  %v242_v5 = vld [vmem:[%s602_s22 + $0xc0] sm:$0xff]  ;;  %v243_v6 = vld [vmem:[%s602_s22 + $0xc8] sm:$0xff]  ;;  %v350_v11 = vld [vmem:[%s608_s25 + $0xb0] sm:$0xff] }
  0x1f   : > { %434 = vst.msk [vmem:[%s644_s30 + $0x48] sm:$0xff] %vm424_vm0, %v401_v22  ;;  %v404_v35 = vmax.f32 %v372_v24, 0.0  ;;  %v274_v37 = vmul.f32 %v596_v0, %v235_v20  ;;  %435 = vst.msk [vmem:[%s644_s30 + $0x50] sm:$0xff] %vm424_vm0, %v402_v28  ;;  %v374_v40 = vadd.f32 %v342_v25, %v310_v30  ;;  %v275_v44 = vmul.f32 %v596_v0, %v236_v27  ;;  %v351_v12 = vld [vmem:[%s608_s25 + $0xb8] sm:$0xff]  ;;  %v244_v13 = vld [vmem:[%s602_s22 + $0xd0] sm:$0xff] }
  0x20   : > { %v405_v39 = vmax.f32 %v373_v29, 0.0  ;;  %v375_v41 = vadd.f32 %v343_v26, %v311_v31  ;;  %436 = vst.msk [vmem:[%s644_s30 + $0x58] sm:$0xff] %vm424_vm0, %v403_v34  ;;  %v312_v45 = vadd.f32 %v614_v2, %v273_v36  ;;  %v276_v48 = vmul.f32 %v596_v0, %v237_v32  ;;  %v245_v18 = vld [vmem:[%s602_s22 + $0xd8] sm:$0xff]  ;;  %v246_v19 = vld [vmem:[%s602_s22 + $0xe0] sm:$0xff]  ;;  %v247_v24 = vld [vmem:[%s602_s22 + $0xe8] sm:$0xff] }
  0x21   : > { %437 = vst.msk [vmem:[%s644_s30 + $0x60] sm:$0xff] %vm424_vm0, %v404_v35  ;;  %v313_v46 = vadd.f32 %v614_v2, %v274_v37  ;;  %v277_v49 = vmul.f32 %v596_v0, %v238_v33  ;;  %v406_v52 = vmax.f32 %v374_v40, 0.0  ;;  %v314_v54 = vadd.f32 %v614_v2, %v275_v44  ;;  %v352_v28 = vld [vmem:[%s608_s25 + $0xc0] sm:$0xff]  ;;  %v353_v29 = vld [vmem:[%s608_s25 + $0xc8] sm:$0xff]  ;;  %v354_v33 = vld [vmem:[%s608_s25 + $0xd0] sm:$0xff] }
  0x22   : > { %438 = vst.msk [vmem:[%s644_s30 + $0x68] sm:$0xff] %vm424_vm0, %v405_v39  ;;  %v407_v53 = vmax.f32 %v375_v41, 0.0  ;;  %v278_v57 = vmul.f32 %v596_v0, %v239_v38  ;;  %v376_v58 = vadd.f32 %v344_v42, %v312_v45  ;;  %v315_v60 = vadd.f32 %v614_v2, %v276_v48  ;;  %v248_v36 = vld [vmem:[%s602_s22 + $0xf0] sm:$0xff]  ;;  %v249_v37 = vld [vmem:[%s602_s22 + $0xf8] sm:$0xff]  ;;  %v356_v42 = vld [vmem:[%s608_s25 + $0xe0] sm:$0xff] }
  0x23   : > { %v377_v59 = vadd.f32 %v345_v43, %v313_v46  ;;  %v316_v61 = vadd.f32 %v614_v2, %v277_v49  ;;  %439 = vst.msk [vmem:[%s644_s30 + $0x70] sm:$0xff] %vm424_vm0, %v406_v52  ;;  %v378_v63 = vadd.f32 %v346_v47, %v314_v54  ;;  %v279_v3 = vmul.f32 %v596_v0, %v240_v50  ;;  %v355_v41 = vld [vmem:[%s608_s25 + $0xd8] sm:$0xff]  ;;  %v357_v48 = vld [vmem:[%s608_s25 + $0xe8] sm:$0xff] }
  0x24   : > { %440 = vst.msk [vmem:[%s644_s30 + $0x78] sm:$0xff] %vm424_vm0, %v407_v53  ;;  %v317_v1 = vadd.f32 %v614_v2, %v278_v57  ;;  %v280_v4 = vmul.f32 %v596_v0, %v241_v51  ;;  %v408_v7 = vmax.f32 %v376_v58, 0.0  ;;  %v379_v9 = vadd.f32 %v347_v55, %v315_v60  ;;  %v358_v57 = vld [vmem:[%s608_s25 + $0xf0] sm:$0xff]  ;;  %v359_v58 = vld [vmem:[%s608_s25 + $0xf8] sm:$0xff] }
  0x25   : > { %v409_v8 = vmax.f32 %v377_v59, 0.0  ;;  %v380_v10 = vadd.f32 %v348_v56, %v316_v61  ;;  %v410_v14 = vmax.f32 %v378_v63, 0.0  ;;  %v318_v16 = vadd.f32 %v614_v2, %v279_v3 }
  0x26   : > { %v381_v15 = vadd.f32 %v349_v62, %v317_v1  ;;  %v319_v17 = vadd.f32 %v614_v2, %v280_v4  ;;  %441 = vst.msk [vmem:[%s644_s30 + $0x80] sm:$0xff] %vm424_vm0, %v408_v7  ;;  %v411_v20 = vmax.f32 %v379_v9, 0.0  ;;  %v281_v22 = vmul.f32 %v596_v0, %v242_v5 }
  0x27   : > { %442 = vst.msk [vmem:[%s644_s30 + $0x88] sm:$0xff] %vm424_vm0, %v409_v8  ;;  %v412_v21 = vmax.f32 %v380_v10, 0.0  ;;  %v282_v23 = vmul.f32 %v596_v0, %v243_v6  ;;  %443 = vst.msk [vmem:[%s644_s30 + $0x90] sm:$0xff] %vm424_vm0, %v410_v14  ;;  %v382_v26 = vadd.f32 %v350_v11, %v318_v16  ;;  %v283_v30 = vmul.f32 %v596_v0, %v244_v13 }
  0x28   : > { %v413_v25 = vmax.f32 %v381_v15, 0.0  ;;  %v383_v27 = vadd.f32 %v351_v12, %v319_v17  ;;  %444 = vst.msk [vmem:[%s644_s30 + $0x98] sm:$0xff] %vm424_vm0, %v411_v20  ;;  %v320_v31 = vadd.f32 %v614_v2, %v281_v22  ;;  %v284_v34 = vmul.f32 %v596_v0, %v245_v18 }
  0x29   : > { %445 = vst.msk [vmem:[%s644_s30 + $0xa0] sm:$0xff] %vm424_vm0, %v412_v21  ;;  %v321_v32 = vadd.f32 %v614_v2, %v282_v23  ;;  %v285_v35 = vmul.f32 %v596_v0, %v246_v19  ;;  %v414_v38 = vmax.f32 %v382_v26, 0.0  ;;  %v322_v40 = vadd.f32 %v614_v2, %v283_v30 }
  0x2a   : > { %446 = vst.msk [vmem:[%s644_s30 + $0xa8] sm:$0xff] %vm424_vm0, %v413_v25  ;;  %v415_v39 = vmax.f32 %v383_v27, 0.0  ;;  %v286_v43 = vmul.f32 %v596_v0, %v247_v24  ;;  %v384_v44 = vadd.f32 %v352_v28, %v320_v31  ;;  %v323_v46 = vadd.f32 %v614_v2, %v284_v34 }
  0x2b   : > { %v385_v45 = vadd.f32 %v353_v29, %v321_v32  ;;  %v324_v47 = vadd.f32 %v614_v2, %v285_v35  ;;  %447 = vst.msk [vmem:[%s644_s30 + $0xb0] sm:$0xff] %vm424_vm0, %v414_v38  ;;  %v386_v49 = vadd.f32 %v354_v33, %v322_v40  ;;  %v287_v51 = vmul.f32 %v596_v0, %v248_v36 }
  0x2c   : > { %448 = vst.msk [vmem:[%s644_s30 + $0xb8] sm:$0xff] %vm424_vm0, %v415_v39  ;;  %v325_v50 = vadd.f32 %v614_v2, %v286_v43  ;;  %v288_v52 = vmul.f32 %v596_v0, %v249_v37  ;;  %v416_v53 = vmax.f32 %v384_v44, 0.0  ;;  %v387_v55 = vadd.f32 %v355_v41, %v323_v46 }
  0x2d   : > { %v417_v54 = vmax.f32 %v385_v45, 0.0  ;;  %v388_v56 = vadd.f32 %v356_v42, %v324_v47  ;;  %v418_v59 = vmax.f32 %v386_v49, 0.0  ;;  %v326_v61 = vadd.f32 %v614_v2, %v287_v51 }
  0x2e   : > { %v389_v60 = vadd.f32 %v357_v48, %v325_v50  ;;  %v327_v62 = vadd.f32 %v614_v2, %v288_v52  ;;  %449 = vst.msk [vmem:[%s644_s30 + $0xc0] sm:$0xff] %vm424_vm0, %v416_v53  ;;  %v419_v0 = vmax.f32 %v387_v55, 0.0 }
  0x2f   : > { %450 = vst.msk [vmem:[%s644_s30 + $0xc8] sm:$0xff] %vm424_vm0, %v417_v54  ;;  %v420_v63 = vmax.f32 %v388_v56, 0.0  ;;  %451 = vst.msk [vmem:[%s644_s30 + $0xd0] sm:$0xff] %vm424_vm0, %v418_v59  ;;  %v390_v3 = vadd.f32 %v358_v57, %v326_v61 }
  0x30   : > { %v421_v1 = vmax.f32 %v389_v60, 0.0  ;;  %v391_v4 = vadd.f32 %v359_v58, %v327_v62  ;;  %452 = vst.msk [vmem:[%s644_s30 + $0xd8] sm:$0xff] %vm424_vm0, %v419_v0 }
  0x31   : > { %453 = vst.msk [vmem:[%s644_s30 + $0xe0] sm:$0xff] %vm424_vm0, %v420_v63  ;;  %v422_v5 = vmax.f32 %v390_v3, 0.0 }
  0x32   : > { %454 = vst.msk [vmem:[%s644_s30 + $0xe8] sm:$0xff] %vm424_vm0, %v421_v1  ;;  %v423_v6 = vmax.f32 %v391_v4, 0.0 }
  0x33   : > { %455 = vst.msk [vmem:[%s644_s30 + $0xf0] sm:$0xff] %vm424_vm0, %v422_v5 }
  0x34   : > { %456 = vst.msk [vmem:[%s644_s30 + $0xf8] sm:$0xff] %vm424_vm0, %v423_v6 }
  0x35 PF: > { %s14_s15 = sadd.s32 1, %s556_s15  }
  0x36   : > { %p11_p4 = scmp.ge.s32.totalorder %s14_s15, 4  }
  0x38   :  { %13 = sbr.rel (!%p11_p4) target bundleno = 1 (0x1), region = 69 }

// kernel: basic_block_forward.3
= control target key start
LH: loop header
LB: loop body
LE: loop exit
PB: predicated region body
PF: predicated region fallthrough
CT: control target
= control target key end

     0   :  { %s4396_s15 = smov 0   ;;  %s6140_s0 = inlined_call_operand.vmem [shape: f32[2,18,18,8], index: 0, kind: input, shape index: {}]   ;;  %s6141_s1 = inlined_call_operand.vmem [shape: f32[9,8,8], index: 1, kind: input, shape index: {}]   ;;  %s6142_s2 = inlined_call_operand.vmem [shape: f32[2,256,8], index: 2, kind: output, shape index: {0}]   ;;  %s6143_s3 = inlined_call_operand.vmem [shape: f32[2,1,8], index: 3, kind: output, shape index: {1}]   ;;  %s6144_s4 = inlined_call_operand.vmem [shape: f32[2,1,8], index: 4, kind: output, shape index: {2}]  }
   0x1 LB: > { %s3298_s16 = sadd.s32 4294967295, %s4369_s15   ;;  %p3302_p0 = scmp.ge.s32.totalorder %s4369_s15, 1  ;;  %s4369_s15 = sphi %s4396_s15, %s15_s15  }
   0x2   : > { %p167_p1 = scmp.lt.s32.totalorder %s4369_s15, 3 }
   0x4   : > { %p168_p2 = pnand %p3302_p0, %p167_p1 }
   0x6   : > { %171 = sbr.rel (%p168_p2) target bundleno = 526 (0x20e), region = 28 }
   0xb   : > { %v3306_v0 = vld [vmem:[%s6141_s1 + $0x8] sm:$0xff]  ;;  %p199_p3 = scmp.lt.s32.totalorder %s3298_s16, 1  ;;  %v269_v1 = vld [vmem:[%s6141_s1] sm:$0xff]  ;;  %v3371_v2 = vld [vmem:[%s6141_s1 + $0x10] sm:$0xff]  ;;  %vm318_vm0 = vcmask 1046528   ;;  %vm401_vm1 = vcmask 64512  }
   0xc   : > { %4352 = vmatprep.subr.mxu1 %v3306_v0  ;;  %3902 = vmatprep.subr.mxu0 %v3306_v0  ;;  %v4462_v21 = vld [vmem:[%s6141_s1 + $0x18] sm:$0xff]  ;;  %v4480_v28 = vld [vmem:[%s6141_s1 + $0x20] sm:$0xff]  ;;  %vm980_vm2 = vcmask 1045504   ;;  %vm3089_vm3 = vcmask 57344  }
   0xd   : > { %4353 = vmatpush3.msra.mxu1 %v3306_v0  ;;  %3903 = vmatpush3.msra.mxu0 %v3306_v0  ;;  %s6434_s16 = smov (!%p199_p3, %s3298_s16), 1 }
   0xe   : > { %3952 = vmatprep.subr.mxu1 %v269_v1  ;;  %4002 = vmatprep.subr.mxu0 %v3371_v2  ;;  %s4354_s23 = smul.u32 432, %s6434_s16  ;;  %s3604_s13 = sshll.u32 %s6434_s16, 8 }
   0xf   : > { %s5878_s18 = scalar_lea.vmem %s6142_s2, %s3604_s13  ;;  %s211_s21 = scalar_lea.vmem %s6143_s3, %s6434_s16 }
  0x10   : > { %s4419_s26 = scalar_lea.vmem %s6140_s0, %s4354_s23  ;;  %s214_s24 = scalar_lea.vmem %s6144_s4, %s6434_s16 }
  0x11   : > { %v4422_v3 = vld [vmem:[%s4419_s26] sm:$0xff]  ;;  %v4425_v4 = vld [vmem:[%s4419_s26 + $0x8] sm:$0xff]  ;;  %v4437_v10 = vld [vmem:[%s4419_s26 + $0x10] sm:$0x3] }
  0x12   : > { %v4428_v5 = vld [vmem:[%s4419_s26 + $0xc0] sm:$0xff]  ;;  %v319_v6 = vrot.slane %v4422_v3, 1  ;;  %v320_v7 = vrot.slane %v4425_v4, 1  ;;  %v4433_v8 = vld [vmem:[%s4419_s26 + $0xc8] sm:$0xff]  ;;  %v322_v12 = vrot.slane %v4437_v10, 1  ;;  %v4445_v14 = vld [vmem:[%s4419_s26 + $0x18] sm:$0xff] }
  0x13   : > { %v359_v9 = vrot.slane %v4428_v5, 1  ;;  %v360_v11 = vrot.slane %v4433_v8, 1  ;;  %v4442_v13 = vld [vmem:[%s4419_s26 + $0xd0] sm:$0x3]  ;;  %v4450_v17 = vld [vmem:[%s4419_s26 + $0x20] sm:$0xff]  ;;  %v324_v18 = vrot.slane %v4445_v14, 1 }
  0x14   : > { %v321_v15 = vsel %vm318_vm0, %v319_v6, %v320_v7  ;;  %v362_v16 = vrot.slane %v4442_v13, 1  ;;  %v4454_v19 = vld [vmem:[%s4419_s26 + $0xd8] sm:$0xff]  ;;  %v4457_v20 = vld [vmem:[%s4419_s26 + $0xe0] sm:$0xff]  ;;  %v323_v23 = vsel %vm318_vm0, %v320_v7, %v322_v12  ;;  %v325_v24 = vrot.slane %v4450_v17, 1  ;;  %v4472_v26 = vld [vmem:[%s4419_s26 + $0x28] sm:$0x3] }
  0x15   : > { %3904 = vmatprep.mubr.msk.f32.mxu0 %vm401_vm1, %v321_v15  ;;  %v4466_v22 = vsel %vm318_vm0, %v359_v9, %v360_v11  ;;  %v364_v25 = vrot.slane %v4454_v19, 1  ;;  %v4475_v27 = vld [vmem:[%s4419_s26 + $0xe8] sm:$0x3]  ;;  %v365_v30 = vrot.slane %v4457_v20, 1  ;;  %v327_v31 = vrot.slane %v4472_v26, 1  ;;  %v4492_v33 = vld [vmem:[%s4419_s26 + $0x30] sm:$0xff] }
  0x16   : > { %6227 = vst [vmem:[#allocation2_spill] sm:$0xff] %v4466_v22  ;;  %3928 = vmatprep.mubr.msk.f32.mxu1 %vm401_vm1, %v4466_v22  ;;  %3905 = vmatmul.mubr.msk.f32.vlgmr.msra.gmra.mxu0 %vm401_vm1, %v323_v23  ;;  %v4486_v29 = vsel %vm318_vm0, %v360_v11, %v362_v16  ;;  %v367_v32 = vrot.slane %v4475_v27, 1  ;;  %v4495_v34 = vld [vmem:[%s4419_s26 + $0x38] sm:$0xff]  ;;  %v4498_v35 = vld [vmem:[%s4419_s26 + $0xf0] sm:$0xff]  ;;  %v4503_v36 = vsel %vm318_vm0, %v324_v18, %v325_v24  ;;  %v329_v37 = vrot.slane %v4492_v33, 1  ;;  %v4530_v47 = vld [vmem:[%s4419_s26 + $0x48] sm:$0xff] }
  0x17   : > { %6228 = vst [vmem:[#allocation3_spill] sm:$0xff] %v4486_v29  ;;  %3929 = vmatmul.mubr.msk.f32.vlgmr.msra.gmra.mxu1 %vm401_vm1, %v4486_v29  ;;  %4003 = vmatpush3.msra.mxu0 %v3371_v2  ;;  %6229 = vst [vmem:[#allocation4_spill] sm:$0xff] %v4503_v36  ;;  %v330_v38 = vrot.slane %v4495_v34, 1  ;;  %v4508_v39 = vld [vmem:[%s4419_s26 + $0xf8] sm:$0xff]  ;;  %v369_v40 = vrot.slane %v4498_v35, 1  ;;  %v4517_v42 = vsel %vm318_vm0, %v364_v25, %v365_v30  ;;  %v4533_v48 = vld [vmem:[%s4419_s26 + $0x50] sm:$0xff] }
  0x18   : > { %v4512_v41 = vld [vmem:[%s4419_s26 + $0x40] sm:$0x3]  ;;  %3953 = vmatpush3.msra.mxu1 %v269_v1  ;;  %3907 = vmatprep.mubr.msk.f32.mxu0 %vm401_vm1, %v4503_v36  ;;  %6230 = vst [vmem:[#allocation5_spill] sm:$0xff] %v4517_v42  ;;  %v4520_v43 = vsel %vm318_vm0, %v325_v24, %v327_v31  ;;  %v4523_v44 = vsel %vm318_vm0, %v365_v30, %v367_v32  ;;  %v370_v45 = vrot.slane %v4508_v39, 1  ;;  %v334_v52 = vrot.slane %v4530_v47, 1  ;;  %v4544_v53 = vld [vmem:[%s4419_s26 + $0x108] sm:$0xff] }
  0x19   : > { %6231 = vst [vmem:[#allocation6_spill] sm:$0xff] %v4520_v43  ;;  %6232 = vst [vmem:[#allocation7_spill] sm:$0xff] %v4523_v44  ;;  %v4527_v46 = vld [vmem:[%s4419_s26 + $0x100] sm:$0x3]  ;;  %3931 = vmatprep.mubr.msk.f32.mxu1 %vm401_vm1, %v4517_v42  ;;  %v4538_v49 = vsel %vm318_vm0, %v329_v37, %v330_v38  ;;  %v332_v50 = vrot.slane %v4512_v41, 1  ;;  %v4547_v54 = vld [vmem:[%s4419_s26 + $0x110] sm:$0xff]  ;;  %4052 = vmatprep.subr.mxu1 %v4462_v21 }
  0x1a   : > { %6233 = vst [vmem:[#allocation8_spill] sm:$0xff] %v4538_v49  ;;  %v372_v51 = vrot.slane %v4527_v46, 1  ;;  %v4550_v55 = vld [vmem:[%s4419_s26 + $0x60] sm:$0xff]  ;;  %3908 = vmatmul.mubr.msk.f32.gmra.mxu0 %vm401_vm1, %v4520_v43  ;;  %v4556_v56 = vsel %vm318_vm0, %v369_v40, %v370_v45  ;;  %v335_v57 = vrot.slane %v4533_v48, 1  ;;  %v374_v58 = vrot.slane %v4544_v53, 1  ;;  %v4565_v61 = vld [vmem:[%s4419_s26 + $0x68] sm:$0xff]  ;;  %4102 = vmatprep.subr.mxu0 %v4480_v28 }
  0x1b   : > { %6234 = vst [vmem:[#allocation9_spill] sm:$0xff] %v4556_v56  ;;  %v375_v59 = vrot.slane %v4547_v54, 1  ;;  %v4562_v60 = vld [vmem:[%s4419_s26 + $0x58] sm:$0x3]  ;;  %3932 = vmatmul.mubr.msk.f32.gmra.mxu1 %vm401_vm1, %v4523_v44  ;;  %3910 = vmatprep.mubr.msk.f32.mxu0 %vm401_vm1, %v4538_v49  ;;  %v4573_v62 = vsel %vm318_vm0, %v330_v38, %v332_v50  ;;  %v339_v1 = vrot.slane %v4550_v55, 1  ;;  %v4581_v2 = vld [vmem:[%s4419_s26 + $0x120] sm:$0xff] }
  0x1c   : > { %6235 = vst [vmem:[#allocation10_spill] sm:$0xff] %v4573_v62  ;;  %v337_v63 = vrot.slane %v4562_v60, 1  ;;  %v4577_v0 = vld [vmem:[%s4419_s26 + $0x118] sm:$0x3]  ;;  %v4584_v6 = vld [vmem:[%s4419_s26 + $0x128] sm:$0xff]  ;;  %3934 = vmatprep.mubr.msk.f32.mxu1 %vm401_vm1, %v4556_v56  ;;  %v4589_v7 = vsel %vm318_vm0, %v370_v45, %v372_v51  ;;  %v4592_v9 = vsel %vm318_vm0, %v334_v52, %v335_v57  ;;  %v340_v12 = vrot.slane %v4565_v61, 1 }
  0x1d   : > { %6236 = vst [vmem:[#allocation11_spill] sm:$0xff] %v4589_v7  ;;  %6237 = vst [vmem:[#allocation12_spill] sm:$0xff] %v4592_v9  ;;  %v377_v11 = vrot.slane %v4577_v0, 1  ;;  %v4597_v15 = vld [vmem:[%s4419_s26 + $0x70] sm:$0x3]  ;;  %v4603_v18 = vsel %vm318_vm0, %v374_v58, %v375_v59  ;;  %v379_v23 = vrot.slane %v4581_v2, 1 }
  0x1e   : > { %v4600_v16 = vld [vmem:[%s4419_s26 + $0x130] sm:$0x3]  ;;  %6238 = vst [vmem:[#allocation13_spill] sm:$0xff] %v4603_v18  ;;  %v380_v24 = vrot.slane %v4584_v6, 1  ;;  %v4608_v25 = vld [vmem:[%s4419_s26 + $0x78] sm:$0xff]  ;;  %v4611_v30 = vld [vmem:[%s4419_s26 + $0x80] sm:$0xff]  ;;  %3911 = vmatmul.mubr.msk.f32.gmra.mxu0 %vm401_vm1, %v4573_v62  ;;  %v4626_v37 = vsel %vm318_vm0, %v335_v57, %v337_v63  ;;  %v4636_v50 = vsel %vm318_vm0, %v339_v1, %v340_v12 }
  0x1f   : > { %v4616_v31 = vld [vmem:[%s4419_s26 + $0x138] sm:$0xff]  ;;  %v4619_v32 = vld [vmem:[%s4419_s26 + $0x140] sm:$0xff]  ;;  %3935 = vmatmul.mubr.msk.f32.gmra.mxu1 %vm401_vm1, %v4589_v7  ;;  %3913 = vmatprep.mubr.msk.f32.mxu0 %vm401_vm1, %v4592_v9  ;;  %6239 = vst [vmem:[#allocation14_spill] sm:$0xff] %v4626_v37  ;;  %v342_v38 = vrot.slane %v4597_v15, 1  ;;  %v382_v40 = vrot.slane %v4600_v16, 1  ;;  %v4633_v45 = vsel %vm318_vm0, %v375_v59, %v377_v11  ;;  %6241 = vst [vmem:[#allocation16_spill] sm:$0xff] %v4636_v50 }
  0x20   : > { %3937 = vmatprep.mubr.msk.f32.mxu1 %vm401_vm1, %v4603_v18  ;;  %6240 = vst [vmem:[#allocation15_spill] sm:$0xff] %v4633_v45  ;;  %v344_v51 = vrot.slane %v4608_v25, 1  ;;  %v345_v52 = vrot.slane %v4611_v30, 1  ;;  %v4641_v57 = vld [vmem:[%s4419_s26 + $0x88] sm:$0x3]  ;;  %v4647_v63 = vsel %vm318_vm0, %v379_v23, %v380_v24  ;;  %v384_v7 = vrot.slane %v4616_v31, 1 }
  0x21   : > { %v4644_v58 = vld [vmem:[%s4419_s26 + $0x148] sm:$0x3]  ;;  %6242 = vst [vmem:[#allocation17_spill] sm:$0xff] %v4647_v63  ;;  %v385_v18 = vrot.slane %v4619_v32, 1  ;;  %v4652_v59 = vld [vmem:[%s4419_s26 + $0x90] sm:$0xff]  ;;  %v4655_v1 = vld [vmem:[%s4419_s26 + $0x98] sm:$0xff]  ;;  %v4670_v23 = vsel %vm318_vm0, %v340_v12, %v342_v38  ;;  %v4677_v29 = vsel %vm318_vm0, %v380_v24, %v382_v40 }
  0x22   : > { %3914 = vmatmul.mubr.msk.f32.gmra.mxu0 %vm401_vm1, %v4626_v37  ;;  %v4660_v11 = vld [vmem:[%s4419_s26 + $0x150] sm:$0xff]  ;;  %v4663_v56 = vld [vmem:[%s4419_s26 + $0x158] sm:$0xff]  ;;  %6244 = vst [vmem:[#allocation19_spill] sm:$0xff] %v4670_v23  ;;  %v347_v44 = vrot.slane %v4641_v57, 1  ;;  %v387_v42 = vrot.slane %v4644_v58, 1  ;;  %6245 = vst [vmem:[#allocation20_spill] sm:$0xff] %v4677_v29 }
  0x23   : > { %6243 = vst [vmem:[#allocation18_spill] sm:$0xff] %v4663_v56  ;;  %3938 = vmatmul.mubr.msk.f32.gmra.mxu1 %vm401_vm1, %v4633_v45  ;;  %3916 = vmatprep.mubr.msk.f32.mxu0 %vm401_vm1, %v4636_v50  ;;  %v4680_v45 = vsel %vm318_vm0, %v344_v51, %v345_v52  ;;  %v349_v22 = vrot.slane %v4652_v59, 1  ;;  %v350_v12 = vrot.slane %v4655_v1, 1  ;;  %v4685_v38 = vld [vmem:[%s4419_s26 + $0xa0] sm:$0x3]  ;;  %v4688_v50 = vsel %vm318_vm0, %v384_v7, %v385_v18  ;;  %v4696_v24 = vld [vmem:[%s4419_s26 + $0xa8] sm:$0xff] }
  0x24   : > { %3940 = vmatprep.mubr.msk.f32.mxu1 %vm401_vm1, %v4647_v63  ;;  %6246 = vst [vmem:[#allocation21_spill] sm:$0xff] %v4680_v45  ;;  %6247 = vst [vmem:[#allocation22_spill] sm:$0xff] %v4688_v50  ;;  %v389_v37 = vrot.slane %v4660_v11, 1  ;;  %v390_v9 = vrot.slane %v4663_v56, 1  ;;  %v4693_v63 = vld [vmem:[%s4419_s26 + $0x160] sm:$0x3]  ;;  %v4714_v7 = vsel %vm318_vm0, %v345_v52, %v347_v44  ;;  %v4717_v49 = vsel %vm318_vm0, %v385_v18, %v387_v42 }
  0x25   : > { %v4699_v40 = vld [vmem:[%s4419_s26 + $0xb0] sm:$0xff]  ;;  %v4704_v51 = vld [vmem:[%s4419_s26 + $0x168] sm:$0xff]  ;;  %6249 = vst [vmem:[#allocation24_spill] sm:$0xff] %v4714_v7  ;;  %6250 = vst [vmem:[#allocation25_spill] sm:$0xff] %v4717_v49  ;;  %v352_v43 = vrot.slane %v4685_v38, 1  ;;  %v392_v36 = vrot.slane %v4693_v63, 1 }
  0x26   : > { %3917 = vmatmul.mubr.msk.f32.gmra.mxu0 %vm401_vm1, %v4670_v23  ;;  %v4707_v62 = vld [vmem:[%s4419_s26 + $0x170] sm:$0xff]  ;;  %v4723_v23 = vsel %vm318_vm0, %v349_v22, %v350_v12  ;;  %v4729_v56 = vld [vmem:[%s4419_s26 + $0xb8] sm:$0x3]  ;;  %v4732_v44 = vsel %vm318_vm0, %v389_v37, %v390_v9  ;;  %v394_v42 = vrot.slane %v4704_v51, 1 }
  0x27   : > { %6248 = vst [vmem:[#allocation23_spill] sm:$0xff] %v4707_v62  ;;  %3941 = vmatmul.mubr.msk.f32.gmra.mxu1 %vm401_vm1, %v4677_v29  ;;  %3919 = vmatprep.mubr.msk.f32.mxu0 %vm401_vm1, %v4680_v45  ;;  %6251 = vst [vmem:[#allocation26_spill] sm:$0xff] %v4723_v23  ;;  %v354_v29 = vrot.slane %v4696_v24, 1  ;;  %v355_v45 = vrot.slane %v4699_v40, 1  ;;  %v395_v18 = vrot.slane %v4707_v62, 1  ;;  %v4746_v22 = vsel %vm318_vm0, %v350_v12, %v352_v43 }
  0x28   : > { %3943 = vmatprep.mubr.msk.f32.mxu1 %vm401_vm1, %v4688_v50  ;;  %6252 = vst [vmem:[#allocation27_spill] sm:$0xff] %v4732_v44  ;;  %v4737_v52 = vld [vmem:[%s4419_s26 + $0x178] sm:$0x3]  ;;  %6253 = vst [vmem:[#allocation28_spill] sm:$0xff] %v4746_v22  ;;  %v357_v37 = vrot.slane %v4729_v56, 1  ;;  %v981_v50 = vrot.slane %v4422_v3, 2  ;;  %v4753_v62 = vsel %vm318_vm0, %v390_v9, %v392_v36 }
  0x29   : > { %6254 = vst [vmem:[#allocation29_spill] sm:$0xff] %v4753_v62  ;;  %v4761_v43 = vsel %vm318_vm0, %v394_v42, %v395_v18  ;;  %v984_v12 = vrot.slane %v4437_v10, 2  ;;  %v986_v10 = vrot.slane %v4445_v14, 2  ;;  %v987_v42 = vrot.slane %v4450_v17, 2 }
  0x2a   : > { %3920 = vmatmul.mubr.msk.f32.gmra.mxu0 %vm401_vm1, %v4714_v7  ;;  %v4756_v7 = vsel %vm318_vm0, %v354_v29, %v355_v45  ;;  %6256 = vst [vmem:[#allocation31_spill] sm:$0xff] %v4761_v43  ;;  %v4771_v29 = vsel %vm318_vm0, %v355_v45, %v357_v37  ;;  %v989_v37 = vrot.slane %v4472_v26, 2  ;;  %v994_v26 = vrot.slane %v4512_v41, 2 }
  0x2b   : > { %3944 = vmatmul.mubr.msk.f32.gmra.mxu1 %vm401_vm1, %v4717_v49  ;;  %3922 = vmatprep.mubr.msk.f32.mxu0 %vm401_vm1, %v4723_v23  ;;  %6255 = vst [vmem:[#allocation30_spill] sm:$0xff] %v4756_v7  ;;  %v397_v49 = vrot.slane %v4737_v52, 1  ;;  %v982_v23 = vrot.slane %v4425_v4, 2  ;;  %6257 = vst [vmem:[#allocation32_spill] sm:$0xff] %v4771_v29  ;;  %v999_v41 = vrot.slane %v4562_v60, 2 }
  0x2c   : > { %3946 = vmatprep.mubr.msk.f32.mxu1 %vm401_vm1, %v4732_v44 }
  0x2d   : > { %v4776_v36 = vsel %vm318_vm0, %v395_v18, %v397_v49  ;;  %v983_v9 = vsel %vm980_vm2, %v981_v50, %v982_v23  ;;  %v985_v45 = vsel %vm980_vm2, %v982_v23, %v984_v12  ;;  %v991_v49 = vrot.slane %v4492_v33, 2  ;;  %v4811_v23 = vld [vmem:[%s6141_s1 + $0x30] sm:$0xff] }
  0x2e   : > { %3923 = vmatmul.mubr.msk.f32.gmra.mxu0 %vm401_vm1, %v4746_v22  ;;  %6258 = vst [vmem:[#allocation33_spill] sm:$0xff] %v4776_v36  ;;  %v992_v50 = vrot.slane %v4495_v34, 2  ;;  %v4794_v18 = vsel %vm980_vm2, %v986_v10, %v987_v42 }
  0x2f   : > { %3947 = vmatmul.mubr.msk.f32.gmra.mxu1 %vm401_vm1, %v4753_v62  ;;  %3925 = vmatprep.mubr.msk.f32.mxu0 %vm401_vm1, %v4756_v7 }
  0x30   : > { %3949 = vmatprep.mubr.msk.f32.mxu1 %vm401_vm1, %v4761_v43  ;;  %v4817_v12 = vsel %vm980_vm2, %v991_v49, %v992_v50 }
  0x32   : > { %3926 = vmatmul.mubr.msk.f32.gmra.mxu0 %vm401_vm1, %v4771_v29 }
  0x33   : > { %3950 = vmatmul.mubr.msk.f32.gmra.mxu1 %vm401_vm1, %v4776_v36  ;;  %4004 = vmatprep.mubr.msk.f32.mxu0 %vm401_vm1, %v983_v9  ;;  %v4799_v9 = vld [vmem:[%s6141_s1 + $0x28] sm:$0xff] }
  0x34   : > { %3954 = vmatprep.mubr.msk.f32.mxu1 %vm401_vm1, %v4422_v3  ;;  %v4805_v3 = vsel %vm980_vm2, %v987_v42, %v989_v37  ;;  %v1001_v42 = vrot.slane %v4550_v55, 2  ;;  %v1004_v37 = vrot.slane %v4597_v15, 2 }
  0x36   : > { %4005 = vmatmul.mubr.msk.f32.vlgmr.msra.gmra.mxu0 %vm401_vm1, %v985_v45  ;;  %v1002_v45 = vrot.slane %v4565_v61, 2 }
  0x37   : > { %3955 = vmatmul.mubr.msk.f32.vlgmr.msra.gmra.mxu1 %vm401_vm1, %v4425_v4  ;;  %4103 = vmatpush3.msra.mxu0 %v4480_v28  ;;  %v996_v4 = vrot.slane %v4530_v47, 2  ;;  %v997_v28 = vrot.slane %v4533_v48, 2 }
  0x38   : > { %4053 = vmatpush3.msra.mxu1 %v4462_v21  ;;  %3957 = vmatprep.mubr.msk.f32.mxu1 %vm401_vm1, %v4445_v14  ;;  %v4832_v21 = vsel %vm980_vm2, %v992_v50, %v994_v26  ;;  %v4855_v49 = vsel %vm980_vm2, %v1001_v42, %v1002_v45  ;;  %v1006_v50 = vrot.slane %v4608_v25, 2  ;;  %v1007_v26 = vrot.slane %v4611_v30, 2 }
  0x39   : > { %4007 = vmatprep.mubr.msk.f32.mxu0 %vm401_vm1, %v4794_v18  ;;  %4152 = vmatprep.subr.mxu1 %v4799_v9  ;;  %v4838_v10 = vsel %vm980_vm2, %v996_v4, %v997_v28  ;;  %v4849_v60 = vsel %vm980_vm2, %v997_v28, %v999_v41  ;;  %v4866_v15 = vsel %vm980_vm2, %v1002_v45, %v1004_v37  ;;  %v1009_v4 = vrot.slane %v4641_v57, 2 }
  0x3a   : > { %4008 = vmatmul.mubr.msk.f32.gmra.mxu0 %vm401_vm1, %v4805_v3  ;;  %4202 = vmatprep.subr.mxu0 %v4811_v23  ;;  %6259 = vst [vmem:[#allocation34_spill] sm:$0xff] %v4866_v15  ;;  %v4872_v28 = vsel %vm980_vm2, %v1006_v50, %v1007_v26  ;;  %v1011_v41 = vrot.slane %v4652_v59, 2  ;;  %v1012_v42 = vrot.slane %v4655_v1, 2  ;;  %v1014_v45 = vrot.slane %v4685_v38, 2 }
  0x3b   : > { %3958 = vmatmul.mubr.msk.f32.gmra.mxu1 %vm401_vm1, %v4450_v17  ;;  %4010 = vmatprep.mubr.msk.f32.mxu0 %vm401_vm1, %v4817_v12  ;;  %v4883_v57 = vsel %vm980_vm2, %v1007_v26, %v1009_v4  ;;  %v1016_v50 = vrot.slane %v4696_v24, 2  ;;  %v1019_v26 = vrot.slane %v4729_v56, 2 }
  0x3c   : > { %3960 = vmatprep.mubr.msk.f32.mxu1 %vm401_vm1, %v4492_v33  ;;  %6260 = vst [vmem:[#allocation35_spill] sm:$0xff] %v4883_v57  ;;  %v4889_v37 = vsel %vm980_vm2, %v1011_v41, %v1012_v42  ;;  %v4900_v38 = vsel %vm980_vm2, %v1012_v42, %v1014_v45  ;;  %v1021_v41 = vrot.slane %v4428_v5, 2  ;;  %v1024_v42 = vrot.slane %v4442_v13, 2 }
  0x3d   : > { %6261 = vst [vmem:[#allocation36_spill] sm:$0xff] %v4900_v38 }
  0x3e   : > { %4011 = vmatmul.mubr.msk.f32.gmra.mxu0 %vm401_vm1, %v4832_v21 }
  0x3f   : > { %3961 = vmatmul.mubr.msk.f32.gmra.mxu1 %vm401_vm1, %v4495_v34  ;;  %4013 = vmatprep.mubr.msk.f32.mxu0 %vm401_vm1, %v4838_v10 }
  0x40   : > { %3963 = vmatprep.mubr.msk.f32.mxu1 %vm401_vm1, %v4530_v47 }
  0x42   : > { %4014 = vmatmul.mubr.msk.f32.gmra.mxu0 %vm401_vm1, %v4849_v60 }
  0x43   : > { %3964 = vmatmul.mubr.msk.f32.gmra.mxu1 %vm401_vm1, %v4533_v48  ;;  %4016 = vmatprep.mubr.msk.f32.mxu0 %vm401_vm1, %v4855_v49 }
  0x44   : > { %3966 = vmatprep.mubr.msk.f32.mxu1 %vm401_vm1, %v4550_v55 }
  0x46   : > { %4017 = vmatmul.mubr.msk.f32.gmra.mxu0 %vm401_vm1, %v4866_v15  ;;  %v1017_v15 = vrot.slane %v4699_v40, 2 }
  0x47   : > { %3967 = vmatmul.mubr.msk.f32.gmra.mxu1 %vm401_vm1, %v4565_v61  ;;  %4019 = vmatprep.mubr.msk.f32.mxu0 %vm401_vm1, %v4872_v28 }
  0x48   : > { %3969 = vmatprep.mubr.msk.f32.mxu1 %vm401_vm1, %v4608_v25  ;;  %v4906_v4 = vsel %vm980_vm2, %v1016_v50, %v1017_v15  ;;  %v4917_v56 = vsel %vm980_vm2, %v1017_v15, %v1019_v26  ;;  %v1026_v50 = vrot.slane %v4454_v19, 2  ;;  %v1029_v15 = vrot.slane %v4475_v27, 2 }
  0x49   : > { %6262 = vst [vmem:[#allocation37_spill] sm:$0xff] %v4917_v56 }
  0x4a   : > { %4020 = vmatmul.mubr.msk.f32.gmra.mxu0 %vm401_vm1, %v4883_v57  ;;  %v1022_v57 = vrot.slane %v4433_v8, 2 }
  0x4b   : > { %3970 = vmatmul.mubr.msk.f32.gmra.mxu1 %vm401_vm1, %v4611_v30  ;;  %4022 = vmatprep.mubr.msk.f32.mxu0 %vm401_vm1, %v4889_v37 }
  0x4c   : > { %3972 = vmatprep.mubr.msk.f32.mxu1 %vm401_vm1, %v4652_v59  ;;  %v4923_v45 = vsel %vm980_vm2, %v1021_v41, %v1022_v57  ;;  %v4934_v13 = vsel %vm980_vm2, %v1022_v57, %v1024_v42  ;;  %v1031_v41 = vrot.slane %v4498_v35, 2  ;;  %v1034_v57 = vrot.slane %v4527_v46, 2 }
  0x4d   : > { %6263 = vst [vmem:[#allocation38_spill] sm:$0xff] %v4934_v13 }
  0x4e   : > { %4023 = vmatmul.mubr.msk.f32.gmra.mxu0 %vm401_vm1, %v4900_v38  ;;  %v1027_v38 = vrot.slane %v4457_v20, 2 }
  0x4f   : > { %3973 = vmatmul.mubr.msk.f32.gmra.mxu1 %vm401_vm1, %v4655_v1  ;;  %4025 = vmatprep.mubr.msk.f32.mxu0 %vm401_vm1, %v4906_v4 }
  0x50   : > { %3975 = vmatprep.mubr.msk.f32.mxu1 %vm401_vm1, %v4696_v24  ;;  %v4940_v26 = vsel %vm980_vm2, %v1026_v50, %v1027_v38  ;;  %v4951_v27 = vsel %vm980_vm2, %v1027_v38, %v1029_v15  ;;  %v1036_v50 = vrot.slane %v4544_v53, 2  ;;  %v1039_v38 = vrot.slane %v4577_v0, 2 }
  0x51   : > { %6264 = vst [vmem:[#allocation39_spill] sm:$0xff] %v4951_v27 }
  0x52   : > { %4026 = vmatmul.mubr.msk.f32.gmra.mxu0 %vm401_vm1, %v4917_v56  ;;  %v1032_v56 = vrot.slane %v4508_v39, 2 }
  0x53   : > { %3976 = vmatmul.mubr.msk.f32.gmra.mxu1 %vm401_vm1, %v4699_v40  ;;  %4028 = vmatprep.mubr.msk.f32.mxu0 %vm401_vm1, %v4923_v45 }
  0x54   : > { %3978 = vmatprep.mubr.msk.f32.mxu1 %vm401_vm1, %v4428_v5  ;;  %v4957_v42 = vsel %vm980_vm2, %v1031_v41, %v1032_v56  ;;  %v4968_v46 = vsel %vm980_vm2, %v1032_v56, %v1034_v57  ;;  %v1041_v41 = vrot.slane %v4581_v2, 2  ;;  %v1044_v56 = vrot.slane %v4600_v16, 2 }
  0x55   : > { %6265 = vst [vmem:[#allocation40_spill] sm:$0xff] %v4968_v46 }
  0x56   : > { %4029 = vmatmul.mubr.msk.f32.gmra.mxu0 %vm401_vm1, %v4934_v13  ;;  %v1037_v13 = vrot.slane %v4547_v54, 2 }
  0x57   : > { %3979 = vmatmul.mubr.msk.f32.gmra.mxu1 %vm401_vm1, %v4433_v8  ;;  %4031 = vmatprep.mubr.msk.f32.mxu0 %vm401_vm1, %v4940_v26 }
  0x58   : > { %3981 = vmatprep.mubr.msk.f32.mxu1 %vm401_vm1, %v4454_v19  ;;  %v4974_v15 = vsel %vm980_vm2, %v1036_v50, %v1037_v13  ;;  %v4985_v0 = vsel %vm980_vm2, %v1037_v13, %v1039_v38  ;;  %v1046_v50 = vrot.slane %v4616_v31, 2  ;;  %v1049_v13 = vrot.slane %v4644_v58, 2 }
  0x59   : > { %6266 = vst [vmem:[#allocation41_spill] sm:$0xff] %v4974_v15  ;;  %6267 = vst [vmem:[#allocation42_spill] sm:$0xff] %v4985_v0 }
  0x5a   : > { %4032 = vmatmul.mubr.msk.f32.gmra.mxu0 %vm401_vm1, %v4951_v27  ;;  %v1042_v27 = vrot.slane %v4584_v6, 2 }
  0x5b   : > { %3982 = vmatmul.mubr.msk.f32.gmra.mxu1 %vm401_vm1, %v4457_v20  ;;  %4034 = vmatprep.mubr.msk.f32.mxu0 %vm401_vm1, %v4957_v42 }
  0x5c   : > { %3984 = vmatprep.mubr.msk.f32.mxu1 %vm401_vm1, %v4498_v35  ;;  %v4991_v57 = vsel %vm980_vm2, %v1041_v41, %v1042_v27  ;;  %v5002_v16 = vsel %vm980_vm2, %v1042_v27, %v1044_v56  ;;  %v1051_v41 = vrot.slane %v4660_v11, 2  ;;  %v1054_v27 = vrot.slane %v4693_v63, 2 }
  0x5d   : > { %6268 = vst [vmem:[#allocation43_spill] sm:$0xff] %v4991_v57  ;;  %6269 = vst [vmem:[#allocation44_spill] sm:$0xff] %v5002_v16 }
  0x5e   : > { %4035 = vmatmul.mubr.msk.f32.gmra.mxu0 %vm401_vm1, %v4968_v46  ;;  %v1047_v46 = vrot.slane %v4619_v32, 2 }
  0x5f   : > { %3985 = vmatmul.mubr.msk.f32.gmra.mxu1 %vm401_vm1, %v4508_v39  ;;  %4037 = vmatprep.mubr.msk.f32.mxu0 %vm401_vm1, %v4974_v15 }
  0x60   : > { %3987 = vmatprep.mubr.msk.f32.mxu1 %vm401_vm1, %v4544_v53  ;;  %v5008_v38 = vsel %vm980_vm2, %v1046_v50, %v1047_v46  ;;  %v5019_v58 = vsel %vm980_vm2, %v1047_v46, %v1049_v13  ;;  %v1056_v50 = vrot.slane %v4704_v51, 2  ;;  %v1059_v46 = vrot.slane %v4737_v52, 2  ;;  %v6273_v52 = vld [vmem:[#allocation4_spill] sm:$0xff] }
  0x62   : > { %4038 = vmatmul.mubr.msk.f32.gmra.mxu0 %vm401_vm1, %v4985_v0  ;;  %v6270_v0 = vld [vmem:[#allocation18_spill] sm:$0xff] }
  0x63   : > { %3988 = vmatmul.mubr.msk.f32.gmra.mxu1 %vm401_vm1, %v4547_v54  ;;  %4040 = vmatprep.mubr.msk.f32.mxu0 %vm401_vm1, %v4991_v57  ;;  %v1052_v15 = vrot.slane %v6270_v0, 2 }
  0x64   : > { %3990 = vmatprep.mubr.msk.f32.mxu1 %vm401_vm1, %v4581_v2 }
  0x65   : > { %v5025_v56 = vsel %vm980_vm2, %v1051_v41, %v1052_v15  ;;  %v5036_v63 = vsel %vm980_vm2, %v1052_v15, %v1054_v27  ;;  %v6274_v41 = vld [vmem:[#allocation6_spill] sm:$0xff] }
  0x66   : > { %4041 = vmatmul.mubr.msk.f32.gmra.mxu0 %vm401_vm1, %v5002_v16  ;;  %v6271_v16 = vld [vmem:[#allocation23_spill] sm:$0xff]  ;;  %v5076_v27 = vld [vmem:[%s6141_s1 + $0x40] sm:$0xff] }
  0x67   : > { %3991 = vmatmul.mubr.msk.f32.gmra.mxu1 %vm401_vm1, %v4584_v6  ;;  %4043 = vmatprep.mubr.msk.f32.mxu0 %vm401_vm1, %v5008_v38  ;;  %v1057_v57 = vrot.slane %v6271_v16, 2 }
  0x68   : > { %3993 = vmatprep.mubr.msk.f32.mxu1 %vm401_vm1, %v4616_v31 }
  0x69   : > { %v5042_v13 = vsel %vm980_vm2, %v1056_v50, %v1057_v57  ;;  %v5051_v15 = vsel %vm980_vm2, %v1057_v57, %v1059_v46  ;;  %v5068_v57 = vld [vmem:[%s6141_s1 + $0x38] sm:$0xff]  ;;  %v6276_v50 = vld [vmem:[#allocation10_spill] sm:$0xff]  ;;  %v6280_v46 = vld [vmem:[#allocation19_spill] sm:$0xff] }
  0x6a   : > { %4044 = vmatmul.mubr.msk.f32.gmra.mxu0 %vm401_vm1, %v5019_v58  ;;  %6272 = vst [vmem:[#allocation18_spill] sm:$0xff] %v5051_v15 }
  0x6b   : > { %3994 = vmatmul.mubr.msk.f32.gmra.mxu1 %vm401_vm1, %v4619_v32  ;;  %4046 = vmatprep.mubr.msk.f32.mxu0 %vm401_vm1, %v5025_v56 }
  0x6c   : > { %3996 = vmatprep.mubr.msk.f32.mxu1 %vm401_vm1, %v4660_v11 }
  0x6e   : > { %4047 = vmatmul.mubr.msk.f32.gmra.mxu0 %vm401_vm1, %v5036_v63 }
  0x6f   : > { %3997 = vmatmul.mubr.msk.f32.gmra.mxu1 %vm401_vm1, %v6270_v0  ;;  %4049 = vmatprep.mubr.msk.f32.mxu0 %vm401_vm1, %v5042_v13 }
  0x70   : > { %3999 = vmatprep.mubr.msk.f32.mxu1 %vm401_vm1, %v4704_v51 }
  0x72   : > { %4050 = vmatmul.mubr.msk.f32.gmra.mxu0 %vm401_vm1, %v5051_v15 }
  0x73   : > { %4000 = vmatmul.mubr.msk.f32.gmra.mxu1 %vm401_vm1, %v6271_v16  ;;  %4104 = vmatprep.mubr.msk.f32.mxu0 %vm401_vm1, %v6273_v52  ;;  %v6281_v52 = vld [vmem:[#allocation21_spill] sm:$0xff] }
  0x74   : > { %4054 = vmatprep.mubr.msk.f32.mxu1 %vm401_vm1, %v4445_v14  ;;  %v6275_v14 = vld [vmem:[#allocation8_spill] sm:$0xff] }
  0x76   : > { %4105 = vmatmul.mubr.msk.f32.vlgmr.msra.gmra.mxu0 %vm401_vm1, %v6274_v41  ;;  %v6282_v41 = vld [vmem:[#allocation24_spill] sm:$0xff] }
  0x77   : > { %4055 = vmatmul.mubr.msk.f32.vlgmr.msra.gmra.mxu1 %vm401_vm1, %v4450_v17  ;;  %4203 = vmatpush3.msra.mxu0 %v4811_v23  ;;  %v6277_v17 = vld [vmem:[#allocation12_spill] sm:$0xff] }
  0x78   : > { %4153 = vmatpush3.msra.mxu1 %v4799_v9  ;;  %4057 = vmatprep.mubr.msk.f32.mxu1 %vm401_vm1, %v4492_v33  ;;  %v6278_v9 = vld [vmem:[#allocation14_spill] sm:$0xff]  ;;  %v6279_v23 = vld [vmem:[#allocation16_spill] sm:$0xff] }
  0x79   : > { %4107 = vmatprep.mubr.msk.f32.mxu0 %vm401_vm1, %v6275_v14  ;;  %4252 = vmatprep.subr.mxu1 %v5068_v57 }
  0x7a   : > { %4108 = vmatmul.mubr.msk.f32.gmra.mxu0 %vm401_vm1, %v6276_v50  ;;  %4302 = vmatprep.subr.mxu0 %v5076_v27 }
  0x7b   : > { %4058 = vmatmul.mubr.msk.f32.gmra.mxu1 %vm401_vm1, %v4495_v34  ;;  %4110 = vmatprep.mubr.msk.f32.mxu0 %vm401_vm1, %v6277_v17 }
  0x7c   : > { %4060 = vmatprep.mubr.msk.f32.mxu1 %vm401_vm1, %v4530_v47 }
  0x7e   : > { %4111 = vmatmul.mubr.msk.f32.gmra.mxu0 %vm401_vm1, %v6278_v9 }
  0x7f   : > { %4061 = vmatmul.mubr.msk.f32.gmra.mxu1 %vm401_vm1, %v4533_v48  ;;  %4113 = vmatprep.mubr.msk.f32.mxu0 %vm401_vm1, %v6279_v23  ;;  %v6283_v23 = vld [vmem:[#allocation26_spill] sm:$0xff] }
  0x80   : > { %4063 = vmatprep.mubr.msk.f32.mxu1 %vm401_vm1, %v4550_v55 }
  0x82   : > { %4114 = vmatmul.mubr.msk.f32.gmra.mxu0 %vm401_vm1, %v6280_v46 }
  0x83   : > { %4064 = vmatmul.mubr.msk.f32.gmra.mxu1 %vm401_vm1, %v4565_v61  ;;  %4116 = vmatprep.mubr.msk.f32.mxu0 %vm401_vm1, %v6281_v52  ;;  %v5190_v52 = vld [vmem:[%s4419_s26 + $0x190] sm:$0x3] }
  0x84   : > { %4066 = vmatprep.mubr.msk.f32.mxu1 %vm401_vm1, %v4608_v25 }
  0x86   : > { %4117 = vmatmul.mubr.msk.f32.gmra.mxu0 %vm401_vm1, %v6282_v41  ;;  %v5177_v41 = vld [vmem:[%s4419_s26 + $0x188] sm:$0xff] }
  0x87   : > { %4067 = vmatmul.mubr.msk.f32.gmra.mxu1 %vm401_vm1, %v4611_v30  ;;  %4119 = vmatprep.mubr.msk.f32.mxu0 %vm401_vm1, %v6283_v23  ;;  %v6284_v23 = vld [vmem:[#allocation2_spill] sm:$0xff] }
  0x88   : > { %4069 = vmatprep.mubr.msk.f32.mxu1 %vm401_vm1, %v4652_v59 }
  0x8a   : > { %4120 = vmatmul.mubr.msk.f32.gmra.mxu0 %vm401_vm1, %v4746_v22  ;;  %v6285_v22 = vld [vmem:[#allocation3_spill] sm:$0xff] }
  0x8b   : > { %4070 = vmatmul.mubr.msk.f32.gmra.mxu1 %vm401_vm1, %v4655_v1  ;;  %4122 = vmatprep.mubr.msk.f32.mxu0 %vm401_vm1, %v4756_v7  ;;  %v6286_v7 = vld [vmem:[#allocation5_spill] sm:$0xff] }
  0x8c   : > { %4072 = vmatprep.mubr.msk.f32.mxu1 %vm401_vm1, %v4696_v24 }
  0x8e   : > { %4123 = vmatmul.mubr.msk.f32.gmra.mxu0 %vm401_vm1, %v4771_v29  ;;  %v6287_v29 = vld [vmem:[#allocation7_spill] sm:$0xff] }
  0x8f   : > { %4073 = vmatmul.mubr.msk.f32.gmra.mxu1 %vm401_vm1, %v4699_v40  ;;  %4125 = vmatprep.mubr.msk.f32.mxu0 %vm401_vm1, %v6284_v23  ;;  %v6288_v23 = vld [vmem:[#allocation9_spill] sm:$0xff] }
  0x90   : > { %4075 = vmatprep.mubr.msk.f32.mxu1 %vm401_vm1, %v4428_v5 }
  0x92   : > { %4126 = vmatmul.mubr.msk.f32.gmra.mxu0 %vm401_vm1, %v6285_v22  ;;  %v6289_v22 = vld [vmem:[#allocation11_spill] sm:$0xff] }
  0x93   : > { %4076 = vmatmul.mubr.msk.f32.gmra.mxu1 %vm401_vm1, %v4433_v8  ;;  %4128 = vmatprep.mubr.msk.f32.mxu0 %vm401_vm1, %v6286_v7  ;;  %v6290_v7 = vld [vmem:[#allocation13_spill] sm:$0xff] }
  0x94   : > { %4078 = vmatprep.mubr.msk.f32.mxu1 %vm401_vm1, %v4454_v19 }
  0x96   : > { %4129 = vmatmul.mubr.msk.f32.gmra.mxu0 %vm401_vm1, %v6287_v29  ;;  %v6291_v29 = vld [vmem:[#allocation15_spill] sm:$0xff] }
  0x97   : > { %4079 = vmatmul.mubr.msk.f32.gmra.mxu1 %vm401_vm1, %v4457_v20  ;;  %4131 = vmatprep.mubr.msk.f32.mxu0 %vm401_vm1, %v6288_v23  ;;  %v6292_v23 = vld [vmem:[#allocation17_spill] sm:$0xff] }
  0x98   : > { %4081 = vmatprep.mubr.msk.f32.mxu1 %vm401_vm1, %v4498_v35 }
  0x9a   : > { %4132 = vmatmul.mubr.msk.f32.gmra.mxu0 %vm401_vm1, %v6289_v22  ;;  %v6293_v22 = vld [vmem:[#allocation20_spill] sm:$0xff] }
  0x9b   : > { %4082 = vmatmul.mubr.msk.f32.gmra.mxu1 %vm401_vm1, %v4508_v39  ;;  %4134 = vmatprep.mubr.msk.f32.mxu0 %vm401_vm1, %v6290_v7  ;;  %v6294_v7 = vld [vmem:[#allocation22_spill] sm:$0xff] }
  0x9c   : > { %4084 = vmatprep.mubr.msk.f32.mxu1 %vm401_vm1, %v4544_v53 }
  0x9e   : > { %4135 = vmatmul.mubr.msk.f32.gmra.mxu0 %vm401_vm1, %v6291_v29  ;;  %v5174_v29 = vld [vmem:[%s4419_s26 + $0x180] sm:$0xff] }
  0x9f   : > { %4085 = vmatmul.mubr.msk.f32.gmra.mxu1 %vm401_vm1, %v4547_v54  ;;  %4137 = vmatprep.mubr.msk.f32.mxu0 %vm401_vm1, %v6292_v23  ;;  %v6295_v23 = vld [vmem:[#allocation25_spill] sm:$0xff] }
  0xa0   : > { %4087 = vmatprep.mubr.msk.f32.mxu1 %vm401_vm1, %v4581_v2 }
  0xa2   : > { %4138 = vmatmul.mubr.msk.f32.gmra.mxu0 %vm401_vm1, %v6293_v22  ;;  %v1651_v22 = vrot.slane %v5177_v41, 1 }
  0xa3   : > { %4088 = vmatmul.mubr.msk.f32.gmra.mxu1 %vm401_vm1, %v4584_v6  ;;  %4140 = vmatprep.mubr.msk.f32.mxu0 %vm401_vm1, %v6294_v7  ;;  %v1650_v7 = vrot.slane %v5174_v29, 1 }
  0xa4   : > { %4090 = vmatprep.mubr.msk.f32.mxu1 %vm401_vm1, %v4616_v31 }
  0xa6   : > { %4141 = vmatmul.mubr.msk.f32.gmra.mxu0 %vm401_vm1, %v6295_v23  ;;  %v5202_v23 = vsel %vm318_vm0, %v1650_v7, %v1651_v22 }
  0xa7   : > { %4091 = vmatmul.mubr.msk.f32.gmra.mxu1 %vm401_vm1, %v4619_v32  ;;  %4143 = vmatprep.mubr.msk.f32.mxu0 %vm401_vm1, %v4732_v44  ;;  %v1653_v44 = vrot.slane %v5190_v52, 1  ;;  %6296 = vst [vmem:[#allocation23_spill] sm:$0xff] %v5202_v23 }
  0xa8   : > { %4093 = vmatprep.mubr.msk.f32.mxu1 %vm401_vm1, %v4660_v11 }
  0xaa   : > { %4144 = vmatmul.mubr.msk.f32.gmra.mxu0 %vm401_vm1, %v4753_v62  ;;  %v5211_v62 = vsel %vm318_vm0, %v1651_v22, %v1653_v44  ;;  %v6308_v22 = vld [vmem:[#allocation44_spill] sm:$0xff] }
  0xab   : > { %4094 = vmatmul.mubr.msk.f32.gmra.mxu1 %vm401_vm1, %v6270_v0  ;;  %4146 = vmatprep.mubr.msk.f32.mxu0 %vm401_vm1, %v4761_v43  ;;  %6297 = vst [vmem:[#allocation4_spill] sm:$0xff] %v5211_v62 }
  0xac   : > { %4096 = vmatprep.mubr.msk.f32.mxu1 %vm401_vm1, %v4704_v51 }
  0xae   : > { %4147 = vmatmul.mubr.msk.f32.gmra.mxu0 %vm401_vm1, %v4776_v36  ;;  %v5386_v36 = vld [vmem:[%s4419_s26 + $0x198] sm:$0xff] }
  0xaf   : > { %4097 = vmatmul.mubr.msk.f32.gmra.mxu1 %vm401_vm1, %v6271_v16  ;;  %4149 = vmatprep.mubr.msk.f32.mxu0 %vm401_vm1, %v5202_v23 }
  0xb0   : > { %4099 = vmatprep.mubr.msk.f32.mxu1 %vm401_vm1, %v5174_v29 }
  0xb2   : > { %4150 = vmatmul.mubr.msk.f32.gmra.mxu0 %vm401_vm1, %v5211_v62 }
  0xb3   : > { %4100 = vmatmul.mubr.msk.f32.gmra.mxu1 %vm401_vm1, %v5177_v41  ;;  %4204 = vmatprep.mubr.msk.f32.mxu0 %vm401_vm1, %v4492_v33  ;;  %v6298_v33 = vld [vmem:[#allocation34_spill] sm:$0xff] }
  0xb4   : > { %4154 = vmatprep.mubr.msk.f32.mxu1 %vm401_vm1, %v4794_v18 }
  0xb6   : > { %4205 = vmatmul.mubr.msk.f32.vlgmr.msra.gmra.mxu0 %vm401_vm1, %v4495_v34  ;;  %v6299_v34 = vld [vmem:[#allocation35_spill] sm:$0xff] }
  0xb7   : > { %4155 = vmatmul.mubr.msk.f32.vlgmr.msra.gmra.mxu1 %vm401_vm1, %v4805_v3  ;;  %4303 = vmatpush3.msra.mxu0 %v5076_v27 }
  0xb8   : > { %4253 = vmatpush3.msra.mxu1 %v5068_v57  ;;  %4157 = vmatprep.mubr.msk.f32.mxu1 %vm401_vm1, %v4817_v12  ;;  %v1918_v57 = vrot.slane %v5174_v29, 2 }
  0xb9   : > { %4207 = vmatprep.mubr.msk.f32.mxu0 %vm401_vm1, %v4530_v47  ;;  %v6300_v47 = vld [vmem:[#allocation36_spill] sm:$0xff] }
  0xba   : > { %4208 = vmatmul.mubr.msk.f32.gmra.mxu0 %vm401_vm1, %v4533_v48  ;;  %v6301_v48 = vld [vmem:[#allocation37_spill] sm:$0xff] }
  0xbb   : > { %4158 = vmatmul.mubr.msk.f32.gmra.mxu1 %vm401_vm1, %v4832_v21  ;;  %4210 = vmatprep.mubr.msk.f32.mxu0 %vm401_vm1, %v4550_v55  ;;  %v6302_v55 = vld [vmem:[#allocation38_spill] sm:$0xff] }
  0xbc   : > { %4160 = vmatprep.mubr.msk.f32.mxu1 %vm401_vm1, %v4838_v10 }
  0xbe   : > { %4211 = vmatmul.mubr.msk.f32.gmra.mxu0 %vm401_vm1, %v4565_v61 }
  0xbf   : > { %4161 = vmatmul.mubr.msk.f32.gmra.mxu1 %vm401_vm1, %v4849_v60  ;;  %4213 = vmatprep.mubr.msk.f32.mxu0 %vm401_vm1, %v4608_v25  ;;  %v6304_v25 = vld [vmem:[#allocation40_spill] sm:$0xff] }
  0xc0   : > { %4163 = vmatprep.mubr.msk.f32.mxu1 %vm401_vm1, %v4855_v49 }
  0xc2   : > { %4214 = vmatmul.mubr.msk.f32.gmra.mxu0 %vm401_vm1, %v4611_v30  ;;  %v6305_v30 = vld [vmem:[#allocation41_spill] sm:$0xff] }
  0xc3   : > { %4164 = vmatmul.mubr.msk.f32.gmra.mxu1 %vm401_vm1, %v6298_v33  ;;  %4216 = vmatprep.mubr.msk.f32.mxu0 %vm401_vm1, %v4652_v59 }
  0xc4   : > { %4166 = vmatprep.mubr.msk.f32.mxu1 %vm401_vm1, %v4872_v28 }
  0xc6   : > { %4217 = vmatmul.mubr.msk.f32.gmra.mxu0 %vm401_vm1, %v4655_v1 }
  0xc7   : > { %4167 = vmatmul.mubr.msk.f32.gmra.mxu1 %vm401_vm1, %v6299_v34  ;;  %4219 = vmatprep.mubr.msk.f32.mxu0 %vm401_vm1, %v4696_v24  ;;  %v6306_v24 = vld [vmem:[#allocation42_spill] sm:$0xff] }
  0xc8   : > { %4169 = vmatprep.mubr.msk.f32.mxu1 %vm401_vm1, %v4889_v37 }
  0xca   : > { %4220 = vmatmul.mubr.msk.f32.gmra.mxu0 %vm401_vm1, %v4699_v40  ;;  %v6307_v40 = vld [vmem:[#allocation43_spill] sm:$0xff] }
  0xcb   : > { %4170 = vmatmul.mubr.msk.f32.gmra.mxu1 %vm401_vm1, %v6300_v47  ;;  %4222 = vmatprep.mubr.msk.f32.mxu0 %vm401_vm1, %v4428_v5 }
  0xcc   : > { %4172 = vmatprep.mubr.msk.f32.mxu1 %vm401_vm1, %v4906_v4 }
  0xce   : > { %4223 = vmatmul.mubr.msk.f32.gmra.mxu0 %vm401_vm1, %v4433_v8 }
  0xcf   : > { %4173 = vmatmul.mubr.msk.f32.gmra.mxu1 %vm401_vm1, %v6301_v48  ;;  %4225 = vmatprep.mubr.msk.f32.mxu0 %vm401_vm1, %v4454_v19  ;;  %v6303_v19 = vld [vmem:[#allocation39_spill] sm:$0xff] }
  0xd0   : > { %4175 = vmatprep.mubr.msk.f32.mxu1 %vm401_vm1, %v4923_v45 }
  0xd2   : > { %4226 = vmatmul.mubr.msk.f32.gmra.mxu0 %vm401_vm1, %v4457_v20 }
  0xd3   : > { %4176 = vmatmul.mubr.msk.f32.gmra.mxu1 %vm401_vm1, %v6302_v55  ;;  %4228 = vmatprep.mubr.msk.f32.mxu0 %vm401_vm1, %v4498_v35 }
  0xd4   : > { %4178 = vmatprep.mubr.msk.f32.mxu1 %vm401_vm1, %v4940_v26 }
  0xd6   : > { %v5289_v5 = vpop.f32.mrf.mxu0  ;;  %4229 = vmatmul.mubr.msk.f32.gmra.mxu0 %vm401_vm1, %v4508_v39 }
  0xd7   : > { %v5293_v8 = vpop.f32.mrf.mxu1  ;;  %4179 = vmatmul.mubr.msk.f32.gmra.mxu1 %vm401_vm1, %v6303_v19  ;;  %4231 = vmatprep.mubr.msk.f32.mxu0 %vm401_vm1, %v4544_v53 }
  0xd8   : > { %v5299_v20 = vpop.f32.mrf.mxu0  ;;  %4181 = vmatprep.mubr.msk.f32.mxu1 %vm401_vm1, %v4957_v42 }
  0xd9   : > { %v5303_v35 = vpop.f32.mrf.mxu1 }
  0xda   : > { %v5305_v61 = vpop.f32.mrf.mxu0  ;;  %4232 = vmatmul.mubr.msk.f32.gmra.mxu0 %vm401_vm1, %v4547_v54 }
  0xdb   : > { %v5309_v39 = vpop.f32.mrf.mxu1  ;;  %4182 = vmatmul.mubr.msk.f32.gmra.mxu1 %vm401_vm1, %v6304_v25  ;;  %4234 = vmatprep.mubr.msk.f32.mxu0 %vm401_vm1, %v4581_v2 }
  0xdc   : > { %v5315_v53 = vpop.f32.mrf.mxu0  ;;  %4184 = vmatprep.mubr.msk.f32.mxu1 %vm401_vm1, %v6305_v30 }
  0xdd   : > { %v5319_v59 = vpop.f32.mrf.mxu1 }
  0xde   : > { %v5321_v1 = vpop.f32.mrf.mxu0  ;;  %4235 = vmatmul.mubr.msk.f32.gmra.mxu0 %vm401_vm1, %v4584_v6 }
  0xdf   : > { %v5325_v54 = vpop.f32.mrf.mxu1  ;;  %4185 = vmatmul.mubr.msk.f32.gmra.mxu1 %vm401_vm1, %v6306_v24  ;;  %4237 = vmatprep.mubr.msk.f32.mxu0 %vm401_vm1, %v4616_v31 }
  0xe0   : > { %v5331_v2 = vpop.f32.mrf.mxu0  ;;  %4187 = vmatprep.mubr.msk.f32.mxu1 %vm401_vm1, %v6307_v40 }
  0xe1   : > { %v5335_v7 = vpop.f32.mrf.mxu1 }
  0xe2   : > { %v5337_v44 = vpop.f32.mrf.mxu0  ;;  %4238 = vmatmul.mubr.msk.f32.gmra.mxu0 %vm401_vm1, %v4619_v32 }
  0xe3   : > { %v5341_v6 = vpop.f32.mrf.mxu1  ;;  %4188 = vmatmul.mubr.msk.f32.gmra.mxu1 %vm401_vm1, %v6308_v22  ;;  %4240 = vmatprep.mubr.msk.f32.mxu0 %vm401_vm1, %v4660_v11 }
  0xe4   : > { %v5347_v31 = vpop.f32.mrf.mxu0  ;;  %4190 = vmatprep.mubr.msk.f32.mxu1 %vm401_vm1, %v5008_v38 }
  0xe5   : > { %v5351_v18 = vpop.f32.mrf.mxu1 }
  0xe6   : > { %v5353_v3 = vpop.f32.mrf.mxu0  ;;  %4241 = vmatmul.mubr.msk.f32.gmra.mxu0 %vm401_vm1, %v6270_v0  ;;  %v1919_v0 = vrot.slane %v5177_v41, 2 }
  0xe7   : > { %v5357_v32 = vpop.f32.mrf.mxu1  ;;  %4191 = vmatmul.mubr.msk.f32.gmra.mxu1 %vm401_vm1, %v5019_v58  ;;  %4243 = vmatprep.mubr.msk.f32.mxu0 %vm401_vm1, %v4704_v51 }
  0xe8   : > { %6309 = vst [vmem:[#allocation6_spill] sm:$0xff] %v5357_v32  ;;  %v5363_v11 = vpop.f32.mrf.mxu0  ;;  %4193 = vmatprep.mubr.msk.f32.mxu1 %vm401_vm1, %v5025_v56  ;;  %v5405_v32 = vld [vmem:[%s4419_s26 + $0x1a0] sm:$0xff] }
  0xe9   : > { %v5368_v27 = vpop.f32.mrf.mxu1 }
  0xea   : > { %6310 = vst [vmem:[#allocation8_spill] sm:$0xff] %v5368_v27  ;;  %v5371_v62 = vpop.f32.mrf.mxu0  ;;  %4244 = vmatmul.mubr.msk.f32.gmra.mxu0 %vm401_vm1, %v6271_v16  ;;  %v1921_v27 = vrot.slane %v5190_v52, 2  ;;  %v5392_v16 = vsel %vm980_vm2, %v1918_v57, %v1919_v0 }
  0xeb   : > { %v5375_v23 = vpop.f32.mrf.mxu1  ;;  %4194 = vmatmul.mubr.msk.f32.gmra.mxu1 %vm401_vm1, %v5036_v63  ;;  %4246 = vmatprep.mubr.msk.f32.mxu0 %vm401_vm1, %v5174_v29  ;;  %6313 = vst [vmem:[#allocation14_spill] sm:$0xff] %v5392_v16 }
  0xec   : > { %6311 = vst [vmem:[#allocation10_spill] sm:$0xff] %v5375_v23  ;;  %v5381_v51 = vpop.f32.mrf.mxu0  ;;  %4196 = vmatprep.mubr.msk.f32.mxu1 %vm401_vm1, %v5042_v13  ;;  %v5412_v57 = vsel %vm980_vm2, %v1919_v0, %v1921_v27 }
  0xed   : > { %v5389_v43 = vpop.f32.mrf.mxu1  ;;  %6315 = vst [vmem:[#allocation34_spill] sm:$0xff] %v5412_v57 }
  0xee   : > { %6312 = vst [vmem:[#allocation12_spill] sm:$0xff] %v5389_v43  ;;  %v5394_v23 = vpop.f32.mrf.mxu0  ;;  %4247 = vmatmul.mubr.msk.f32.gmra.mxu0 %vm401_vm1, %v5177_v41 }
  0xef   : > { %v5398_v29 = vpop.f32.mrf.mxu1  ;;  %4197 = vmatmul.mubr.msk.f32.gmra.mxu1 %vm401_vm1, %v5051_v15  ;;  %4249 = vmatprep.mubr.msk.f32.mxu0 %vm401_vm1, %v5386_v36 }
  0xf0   : > { %6314 = vst [vmem:[#allocation19_spill] sm:$0xff] %v5398_v29  ;;  %v5407_v52 = vpop.f32.mrf.mxu0  ;;  %4199 = vmatprep.mubr.msk.f32.mxu1 %vm401_vm1, %v5392_v16 }
  0xf1   : > { %v5414_v43 = vpop.f32.mrf.mxu1 }
  0xf2   : > { %6316 = vst [vmem:[#allocation35_spill] sm:$0xff] %v5414_v43  ;;  %v5416_v41 = vpop.f32.mrf.mxu0  ;;  %4250 = vmatmul.mubr.msk.f32.gmra.mxu0 %vm401_vm1, %v5405_v32 }
  0xf3   : > { %v5420_v29 = vpop.f32.mrf.mxu1  ;;  %4200 = vmatmul.mubr.msk.f32.gmra.mxu1 %vm401_vm1, %v5412_v57  ;;  %4304 = vmatprep.mubr.msk.f32.mxu0 %vm401_vm1, %v4817_v12 }
  0xf4   : > { %6317 = vst [vmem:[#allocation36_spill] sm:$0xff] %v5420_v29  ;;  %v5426_v15 = vpop.f32.mrf.mxu0  ;;  %4254 = vmatprep.mubr.msk.f32.mxu1 %vm401_vm1, %v6275_v14 }
  0xf5   : > { %v5430_v27 = vpop.f32.mrf.mxu1 }
  0xf6   : > { %6318 = vst [vmem:[#allocation37_spill] sm:$0xff] %v5430_v27  ;;  %v4006_v0 = vpop.f32.mrf.mxu0  ;;  %4305 = vmatmul.mubr.msk.f32.vlgmr.msra.gmra.mxu0 %vm401_vm1, %v4832_v21 }
  0xf7   : > { %v3956_v43 = vpop.f32.mrf.mxu1  ;;  %4255 = vmatmul.mubr.msk.f32.vlgmr.msra.gmra.mxu1 %vm401_vm1, %v6276_v50  ;;  %4307 = vmatprep.mubr.msk.f32.mxu0 %vm401_vm1, %v4838_v10 }
  0xf8   : > { %v827_v12 = vadd.f32 %v3956_v43, %v5289_v5  ;;  %v1193_v29 = vpop.f32.mrf.mxu0  ;;  %4257 = vmatprep.mubr.msk.f32.mxu1 %vm401_vm1, %v6277_v17  ;;  %v6319_v17 = vld [vmem:[#allocation16_spill] sm:$0xff] }
  0xf9   : > { %v821_v14 = vpop.f32.mrf.mxu1 }
  0xfa   : > { %v5441_v57 = vadd.f32 %v4006_v0, %v827_v12  ;;  %v822_v27 = vadd.f32 %v821_v14, %v5299_v20  ;;  %v4009_v16 = vpop.f32.mrf.mxu0  ;;  %4308 = vmatmul.mubr.msk.f32.gmra.mxu0 %vm401_vm1, %v4849_v60  ;;  %v6321_v14 = vld [vmem:[#allocation24_spill] sm:$0xff] }
  0xfb   : > { %v3959_v21 = vpop.f32.mrf.mxu1  ;;  %4258 = vmatmul.mubr.msk.f32.gmra.mxu1 %vm401_vm1, %v6278_v9  ;;  %4310 = vmatprep.mubr.msk.f32.mxu0 %vm401_vm1, %v4855_v49 }
  0xfc   : > { %v5450_v43 = vadd.f32 %v1193_v29, %v822_v27  ;;  %v837_v10 = vadd.f32 %v3959_v21, %v5305_v61  ;;  %v1203_v50 = vpop.f32.mrf.mxu0  ;;  %4260 = vmatprep.mubr.msk.f32.mxu1 %vm401_vm1, %v6319_v17 }
  0xfd   : > { %v831_v5 = vpop.f32.mrf.mxu1 }
  0xfe   : > { %v5455_v20 = vadd.f32 %v4009_v16, %v837_v10  ;;  %v832_v60 = vadd.f32 %v831_v5, %v5315_v53  ;;  %v4012_v0 = vpop.f32.mrf.mxu0  ;;  %4311 = vmatmul.mubr.msk.f32.gmra.mxu0 %vm401_vm1, %v6298_v33  ;;  %v6320_v16 = vld [vmem:[#allocation21_spill] sm:$0xff]  ;;  %v6322_v10 = vld [vmem:[#allocation26_spill] sm:$0xff] }
  0xff   : > { %v3962_v9 = vpop.f32.mrf.mxu1  ;;  %4261 = vmatmul.mubr.msk.f32.gmra.mxu1 %vm401_vm1, %v6280_v46  ;;  %4313 = vmatprep.mubr.msk.f32.mxu0 %vm401_vm1, %v4872_v28 }
 0x100   : > { %v5464_v49 = vadd.f32 %v1203_v50, %v832_v60  ;;  %v847_v61 = vadd.f32 %v3962_v9, %v5321_v1  ;;  %v1213_v29 = vpop.f32.mrf.mxu0  ;;  %4263 = vmatprep.mubr.msk.f32.mxu1 %vm401_vm1, %v6320_v16  ;;  %v6323_v60 = vld [vmem:[#allocation28_spill] sm:$0xff]  ;;  %v6324_v9 = vld [vmem:[#allocation30_spill] sm:$0xff] }
 0x101   : > { %v841_v53 = vpop.f32.mrf.mxu1 }
 0x102   : > { %v5469_v27 = vadd.f32 %v4012_v0, %v847_v61  ;;  %v842_v33 = vadd.f32 %v841_v53, %v5331_v2  ;;  %v4015_v12 = vpop.f32.mrf.mxu0  ;;  %4314 = vmatmul.mubr.msk.f32.gmra.mxu0 %vm401_vm1, %v6299_v34  ;;  %v6325_v53 = vld [vmem:[#allocation32_spill] sm:$0xff] }
 0x103   : > { %v3965_v46 = vpop.f32.mrf.mxu1  ;;  %4264 = vmatmul.mubr.msk.f32.gmra.mxu1 %vm401_vm1, %v6321_v14  ;;  %4316 = vmatprep.mubr.msk.f32.mxu0 %vm401_vm1, %v4889_v37 }
 0x104   : > { %v5478_v28 = vadd.f32 %v1213_v29, %v842_v33  ;;  %v857_v1 = vadd.f32 %v3965_v46, %v5337_v44  ;;  %v1223_v21 = vpop.f32.mrf.mxu0  ;;  %4266 = vmatprep.mubr.msk.f32.mxu1 %vm401_vm1, %v6322_v10 }
 0x105   : > { %v851_v2 = vpop.f32.mrf.mxu1 }
 0x106   : > { %v5483_v50 = vadd.f32 %v4015_v12, %v857_v1  ;;  %v852_v34 = vadd.f32 %v851_v2, %v5347_v31  ;;  %v4018_v17 = vpop.f32.mrf.mxu0  ;;  %4317 = vmatmul.mubr.msk.f32.gmra.mxu0 %vm401_vm1, %v6300_v47  ;;  %v6326_v12 = vld [vmem:[#allocation2_spill] sm:$0xff]  ;;  %v6328_v2 = vld [vmem:[#allocation5_spill] sm:$0xff] }
 0x107   : > { %v3968_v5 = vpop.f32.mrf.mxu1  ;;  %4267 = vmatmul.mubr.msk.f32.gmra.mxu1 %vm401_vm1, %v6323_v60  ;;  %4319 = vmatprep.mubr.msk.f32.mxu0 %vm401_vm1, %v4906_v4  ;;  %v6329_v60 = vld [vmem:[#allocation7_spill] sm:$0xff] }
 0x108   : > { %v5492_v37 = vadd.f32 %v1223_v21, %v852_v34  ;;  %v867_v44 = vadd.f32 %v3968_v5, %v5353_v3  ;;  %v1233_v0 = vpop.f32.mrf.mxu0  ;;  %4269 = vmatprep.mubr.msk.f32.mxu1 %vm401_vm1, %v6324_v9  ;;  %v6327_v21 = vld [vmem:[#allocation3_spill] sm:$0xff] }
 0x109   : > { %v861_v31 = vpop.f32.mrf.mxu1 }
 0x10a   : > { %v5497_v61 = vadd.f32 %v4018_v17, %v867_v44  ;;  %v862_v47 = vadd.f32 %v861_v31, %v5363_v11  ;;  %v4021_v29 = vpop.f32.mrf.mxu0  ;;  %4320 = vmatmul.mubr.msk.f32.gmra.mxu0 %vm401_vm1, %v6301_v48 }
 0x10b   : > { %v3971_v16 = vpop.f32.mrf.mxu1  ;;  %4270 = vmatmul.mubr.msk.f32.gmra.mxu1 %vm401_vm1, %v6325_v53  ;;  %4322 = vmatprep.mubr.msk.f32.mxu0 %vm401_vm1, %v4923_v45  ;;  %v6332_v53 = vld [vmem:[#allocation13_spill] sm:$0xff] }
 0x10c   : > { %v5506_v4 = vadd.f32 %v1233_v0, %v862_v47  ;;  %v877_v3 = vadd.f32 %v3971_v16, %v5371_v62  ;;  %v1243_v33 = vpop.f32.mrf.mxu0  ;;  %4272 = vmatprep.mubr.msk.f32.mxu1 %vm401_vm1, %v6326_v12  ;;  %v6330_v0 = vld [vmem:[#allocation9_spill] sm:$0xff] }
 0x10d   : > { %v871_v11 = vpop.f32.mrf.mxu1 }
 0x10e   : > { %v5511_v46 = vadd.f32 %v4021_v29, %v877_v3  ;;  %v872_v48 = vadd.f32 %v871_v11, %v5381_v51  ;;  %v4024_v14 = vpop.f32.mrf.mxu0  ;;  %4323 = vmatmul.mubr.msk.f32.gmra.mxu0 %vm401_vm1, %v6302_v55  ;;  %v6331_v29 = vld [vmem:[#allocation11_spill] sm:$0xff] }
 0x10f   : > { %v3974_v1 = vpop.f32.mrf.mxu1  ;;  %4273 = vmatmul.mubr.msk.f32.gmra.mxu1 %vm401_vm1, %v6327_v21  ;;  %4325 = vmatprep.mubr.msk.f32.mxu0 %vm401_vm1, %v4940_v26  ;;  %v6333_v11 = vld [vmem:[#allocation15_spill] sm:$0xff] }
 0x110   : > { %v5520_v62 = vadd.f32 %v1243_v33, %v872_v48  ;;  %v887_v45 = vadd.f32 %v3974_v1, %v5394_v23  ;;  %v1253_v10 = vpop.f32.mrf.mxu0  ;;  %4275 = vmatprep.mubr.msk.f32.mxu1 %vm401_vm1, %v6328_v2 }
 0x111   : > { %v881_v51 = vpop.f32.mrf.mxu1 }
 0x112   : > { %v5525_v34 = vadd.f32 %v4024_v14, %v887_v45  ;;  %v882_v55 = vadd.f32 %v881_v51, %v5407_v52  ;;  %v4027_v17 = vpop.f32.mrf.mxu0  ;;  %4326 = vmatmul.mubr.msk.f32.gmra.mxu0 %vm401_vm1, %v6303_v19  ;;  %v6334_v14 = vld [vmem:[#allocation17_spill] sm:$0xff]  ;;  %v6336_v51 = vld [vmem:[#allocation22_spill] sm:$0xff] }
 0x113   : > { %v3977_v5 = vpop.f32.mrf.mxu1  ;;  %4276 = vmatmul.mubr.msk.f32.gmra.mxu1 %vm401_vm1, %v6329_v60  ;;  %4328 = vmatprep.mubr.msk.f32.mxu0 %vm401_vm1, %v4957_v42  ;;  %v6337_v60 = vld [vmem:[#allocation25_spill] sm:$0xff] }
 0x114   : > { %v5534_v26 = vadd.f32 %v1253_v10, %v882_v55  ;;  %v897_v23 = vadd.f32 %v3977_v5, %v5416_v41  ;;  %v1263_v44 = vpop.f32.mrf.mxu0  ;;  %4278 = vmatprep.mubr.msk.f32.mxu1 %vm401_vm1, %v6330_v0  ;;  %v6335_v10 = vld [vmem:[#allocation20_spill] sm:$0xff] }
 0x115   : > { %v891_v52 = vpop.f32.mrf.mxu1 }
 0x116   : > { %v5539_v9 = vadd.f32 %v4027_v17, %v897_v23  ;;  %v892_v19 = vadd.f32 %v891_v52, %v5426_v15  ;;  %v4030_v31 = vpop.f32.mrf.mxu0  ;;  %4329 = vmatmul.mubr.msk.f32.gmra.mxu0 %vm401_vm1, %v6304_v25 }
 0x117   : > { %v3980_v47 = vpop.f32.mrf.mxu1  ;;  %4279 = vmatmul.mubr.msk.f32.gmra.mxu1 %vm401_vm1, %v6331_v29  ;;  %4331 = vmatprep.mubr.msk.f32.mxu0 %vm401_vm1, %v6305_v30  ;;  %v6340_v29 = vld [vmem:[#allocation6_spill] sm:$0xff] }
 0x118   : > { %v5548_v42 = vadd.f32 %v1263_v44, %v892_v19  ;;  %v907_v41 = vadd.f32 %v3980_v47, %v5293_v8  ;;  %v1273_v16 = vpop.f32.mrf.mxu0  ;;  %4281 = vmatprep.mubr.msk.f32.mxu1 %vm401_vm1, %v6332_v53  ;;  %v6338_v44 = vld [vmem:[#allocation27_spill] sm:$0xff]  ;;  %v2452_v53 = vrot.slane %v5386_v36, 1 }
 0x119   : > { %v901_v15 = vpop.f32.mrf.mxu1 }
 0x11a   : > { %v5553_v3 = vadd.f32 %v4030_v31, %v907_v41  ;;  %v902_v25 = vadd.f32 %v901_v15, %v5303_v35  ;;  %v4033_v33 = vpop.f32.mrf.mxu0  ;;  %4332 = vmatmul.mubr.msk.f32.gmra.mxu0 %vm401_vm1, %v6306_v24  ;;  %v2721_v31 = vrot.slane %v5405_v32, 2  ;;  %v2453_v15 = vrot.slane %v5405_v32, 1  ;;  %v6346_v32 = vld [vmem:[#allocation10_spill] sm:$0xff] }
 0x11b   : > { %v3983_v12 = vpop.f32.mrf.mxu1  ;;  %4282 = vmatmul.mubr.msk.f32.gmra.mxu1 %vm401_vm1, %v6333_v11  ;;  %4334 = vmatprep.mubr.msk.f32.mxu0 %vm401_vm1, %v6307_v40 }
 0x11c   : > { %v5562_v8 = vadd.f32 %v1273_v16, %v902_v25  ;;  %v917_v30 = vadd.f32 %v3983_v12, %v5309_v39  ;;  %v1283_v48 = vpop.f32.mrf.mxu0  ;;  %4284 = vmatprep.mubr.msk.f32.mxu1 %vm401_vm1, %v6334_v14  ;;  %v6341_v16 = vld [vmem:[#allocation31_spill] sm:$0xff]  ;;  %v6344_v14 = vld [vmem:[#allocation33_spill] sm:$0xff] }
 0x11d   : > { %v911_v35 = vpop.f32.mrf.mxu1 }
 0x11e   : > { %v5567_v1 = vadd.f32 %v4033_v33, %v917_v30  ;;  %v912_v24 = vadd.f32 %v911_v35, %v5319_v59  ;;  %v4036_v21 = vpop.f32.mrf.mxu0  ;;  %4335 = vmatmul.mubr.msk.f32.gmra.mxu0 %vm401_vm1, %v6308_v22  ;;  %v6343_v30 = vld [vmem:[#allocation18_spill] sm:$0xff] }
 0x11f   : > { %v3986_v45 = vpop.f32.mrf.mxu1  ;;  %4285 = vmatmul.mubr.msk.f32.gmra.mxu1 %vm401_vm1, %v6335_v10  ;;  %4337 = vmatprep.mubr.msk.f32.mxu0 %vm401_vm1, %v5008_v38  ;;  %v6345_v35 = vld [vmem:[#allocation14_spill] sm:$0xff]  ;;  %v6347_v10 = vld [vmem:[#allocation23_spill] sm:$0xff] }
 0x120   : > { %v5576_v39 = vadd.f32 %v1283_v48, %v912_v24  ;;  %v927_v40 = vadd.f32 %v3986_v45, %v5325_v54  ;;  %v1293_v2 = vpop.f32.mrf.mxu0  ;;  %4287 = vmatprep.mubr.msk.f32.mxu1 %vm401_vm1, %v6336_v51 }
 0x121   : > { %v921_v59 = vpop.f32.mrf.mxu1 }
 0x122   : > { %v5581_v55 = vadd.f32 %v4036_v21, %v927_v40  ;;  %v922_v22 = vadd.f32 %v921_v59, %v5335_v7  ;;  %v4039_v17 = vpop.f32.mrf.mxu0  ;;  %4338 = vmatmul.mubr.msk.f32.gmra.mxu0 %vm401_vm1, %v5019_v58  ;;  %v2454_v59 = vsel %vm318_vm0, %v2452_v53, %v2453_v15 }
 0x123   : > { %v3989_v5 = vpop.f32.mrf.mxu1  ;;  %4288 = vmatmul.mubr.msk.f32.gmra.mxu1 %vm401_vm1, %v6337_v60  ;;  %4340 = vmatprep.mubr.msk.f32.mxu0 %vm401_vm1, %v5025_v56  ;;  %v6339_v56 = vld [vmem:[#allocation29_spill] sm:$0xff] }
 0x124   : > { %v5590_v38 = vadd.f32 %v1293_v2, %v922_v22  ;;  %v937_v54 = vadd.f32 %v3989_v5, %v5341_v6  ;;  %v1303_v23 = vpop.f32.mrf.mxu0  ;;  %4290 = vmatprep.mubr.msk.f32.mxu1 %vm401_vm1, %v6338_v44  ;;  %v2720_v6 = vrot.slane %v5386_v36, 2  ;;  %v6350_v44 = vld [vmem:[#allocation4_spill] sm:$0xff] }
 0x125   : > { %v931_v7 = vpop.f32.mrf.mxu1 }
 0x126   : > { %v5595_v0 = vadd.f32 %v4039_v17, %v937_v54  ;;  %v932_v58 = vadd.f32 %v931_v7, %v5351_v18  ;;  %v4042_v52 = vpop.f32.mrf.mxu0  ;;  %4341 = vmatmul.mubr.msk.f32.gmra.mxu0 %vm401_vm1, %v5036_v63  ;;  %v268_v63 = vld [vmem:[%s4419_s26 + $0x1a8] sm:$0x3]  ;;  %v2722_v40 = vsel %vm980_vm2, %v2720_v6, %v2721_v31  ;;  %v6348_v17 = vld [vmem:[#allocation12_spill] sm:$0xff]  ;;  %v6349_v54 = vld [vmem:[#allocation34_spill] sm:$0xff] }
 0x127   : > { %v3992_v19 = vpop.f32.mrf.mxu1  ;;  %4291 = vmatmul.mubr.msk.f32.gmra.mxu1 %vm401_vm1, %v6339_v56  ;;  %4343 = vmatprep.mubr.msk.f32.mxu0 %vm401_vm1, %v5042_v13  ;;  %v6342_v13 = vld [vmem:[#allocation8_spill] sm:$0xff]  ;;  %v2723_v24 = vrot.slane %v268_v63, 2  ;;  %v2455_v2 = vrot.slane %v268_v63, 1 }
 0x128   : > { %v5606_v47 = vadd.f32 %v1303_v23, %v932_v58  ;;  %v947_v41 = vadd.f32 %v3992_v19, %v6340_v29  ;;  %v1313_v18 = vpop.f32.mrf.mxu0  ;;  %4293 = vmatprep.mubr.msk.f32.mxu1 %vm401_vm1, %v6341_v16 }
 0x129   : > { %v941_v25 = vpop.f32.mrf.mxu1  ;;  %v2724_v7 = vsel %vm980_vm2, %v2721_v31, %v2723_v24  ;;  %v2456_v6 = vsel %vm318_vm0, %v2453_v15, %v2455_v2  ;;  %v6354_v15 = vld [vmem:[#allocation37_spill] sm:$0xff] }
 0x12a   : > { %v5614_v33 = vadd.f32 %v4042_v52, %v947_v41  ;;  %v942_v12 = vadd.f32 %v941_v25, %v6342_v13  ;;  %v4045_v11 = vpop.f32.mrf.mxu0  ;;  %4344 = vmatmul.mubr.msk.f32.gmra.mxu0 %vm401_vm1, %v6343_v30  ;;  %v6351_v52 = vld [vmem:[#allocation19_spill] sm:$0xff]  ;;  %v6353_v25 = vld [vmem:[#allocation36_spill] sm:$0xff] }
 0x12b   : > { %v3995_v48 = vpop.f32.mrf.mxu1  ;;  %4294 = vmatmul.mubr.msk.f32.gmra.mxu1 %vm401_vm1, %v6344_v14  ;;  %4346 = vmatprep.mubr.msk.f32.mxu0 %vm401_vm1, %v6345_v35 }
 0x12c   : > { %v5623_v36 = vadd.f32 %v1313_v18, %v942_v12  ;;  %v957_v21 = vadd.f32 %v3995_v48, %v6346_v32  ;;  %v1323_v45 = vpop.f32.mrf.mxu0  ;;  %4296 = vmatprep.mubr.msk.f32.mxu1 %vm401_vm1, %v6347_v10  ;;  %v6352_v18 = vld [vmem:[#allocation35_spill] sm:$0xff] }
 0x12d   : > { %v951_v51 = vpop.f32.mrf.mxu1 }
 0x12e   : > { %v5630_v22 = vadd.f32 %v4045_v11, %v957_v21  ;;  %v952_v5 = vadd.f32 %v951_v51, %v6348_v17  ;;  %v4048_v60 = vpop.f32.mrf.mxu0  ;;  %4347 = vmatmul.mubr.msk.f32.gmra.mxu0 %vm401_vm1, %v6349_v54 }
 0x12f   : > { %v3998_v23 = vpop.f32.mrf.mxu1  ;;  %4297 = vmatmul.mubr.msk.f32.gmra.mxu1 %vm401_vm1, %v6350_v44  ;;  %4349 = vmatprep.mubr.msk.f32.mxu0 %vm401_vm1, %v2722_v40 }
 0x130   : > { %v5639_v58 = vadd.f32 %v1323_v45, %v952_v5  ;;  %v967_v19 = vadd.f32 %v3998_v23, %v6351_v52  ;;  %v1333_v56 = vpop.f32.mrf.mxu0  ;;  %4299 = vmatprep.mubr.msk.f32.mxu1 %vm401_vm1, %v2454_v59 }
 0x131   : > { %v961_v29 = vpop.f32.mrf.mxu1 }
 0x132   : > { %v5644_v41 = vadd.f32 %v4048_v60, %v967_v19  ;;  %v962_v16 = vadd.f32 %v961_v29, %v6352_v18  ;;  %v4051_v63 = vpop.f32.mrf.mxu0  ;;  %4350 = vmatmul.mubr.msk.f32.gmra.mxu0 %vm401_vm1, %v2724_v7 }
 0x133   : > { %v4001_v53 = vpop.f32.mrf.mxu1  ;;  %4300 = vmatmul.mubr.msk.f32.gmra.mxu1 %vm401_vm1, %v2456_v6 }
 0x134   : > { %v5649_v31 = vadd.f32 %v1333_v56, %v962_v16  ;;  %v977_v13 = vadd.f32 %v4001_v53, %v6353_v25  ;;  %v1343_v12 = vpop.f32.mrf.mxu0 }
 0x135   : > { %v971_v11 = vpop.f32.mrf.mxu1 }
 0x136   : > { %v5652_v30 = vadd.f32 %v4051_v63, %v977_v13  ;;  %v972_v48 = vadd.f32 %v971_v11, %v6354_v15  ;;  %v4106_v14 = vpop.f32.mrf.mxu0 }
 0x137   : > { %v4056_v35 = vpop.f32.mrf.mxu1 }
 0x138   : > { %v5655_v24 = vadd.f32 %v1343_v12, %v972_v48  ;;  %v1618_v32 = vadd.f32 %v4056_v35, %v5441_v57  ;;  %v1727_v21 = vpop.f32.mrf.mxu0 }
 0x139   : > { %v1458_v45 = vpop.f32.mrf.mxu1 }
 0x13a   : > { %v5658_v10 = vadd.f32 %v4106_v14, %v1618_v32  ;;  %v1617_v40 = vadd.f32 %v1458_v45, %v5450_v43  ;;  %v4109_v2 = vpop.f32.mrf.mxu0 }
 0x13b   : > { %v4059_v51 = vpop.f32.mrf.mxu1 }
 0x13c   : > { %v5661_v59 = vadd.f32 %v1727_v21, %v1617_v40  ;;  %v1620_v17 = vadd.f32 %v4059_v51, %v5455_v20  ;;  %v1737_v5 = vpop.f32.mrf.mxu0 }
 0x13d   : > { %v1468_v60 = vpop.f32.mrf.mxu1 }
 0x13e   : > { %v5664_v54 = vadd.f32 %v4109_v2, %v1620_v17  ;;  %v1619_v23 = vadd.f32 %v1468_v60, %v5464_v49  ;;  %v4112_v44 = vpop.f32.mrf.mxu0 }
 0x13f   : > { %v4062_v57 = vpop.f32.mrf.mxu1 }
 0x140   : > { %v5667_v7 = vadd.f32 %v1737_v5, %v1619_v23  ;;  %v1622_v52 = vadd.f32 %v4062_v57, %v5469_v27  ;;  %v1747_v19 = vpop.f32.mrf.mxu0 }
 0x141   : > { %v1478_v43 = vpop.f32.mrf.mxu1 }
 0x142   : > { %v5670_v56 = vadd.f32 %v4112_v44, %v1622_v52  ;;  %v1621_v6 = vadd.f32 %v1478_v43, %v5478_v28  ;;  %v4115_v29 = vpop.f32.mrf.mxu0 }
 0x143   : > { %v4065_v20 = vpop.f32.mrf.mxu1 }
 0x144   : > { %v5673_v18 = vadd.f32 %v1747_v19, %v1621_v6  ;;  %v1624_v16 = vadd.f32 %v4065_v20, %v5483_v50  ;;  %v1757_v63 = vpop.f32.mrf.mxu0 }
 0x145   : > { %v1488_v49 = vpop.f32.mrf.mxu1 }
 0x146   : > { %v5676_v53 = vadd.f32 %v4115_v29, %v1624_v16  ;;  %v1623_v25 = vadd.f32 %v1488_v49, %v5492_v37  ;;  %v4118_v13 = vpop.f32.mrf.mxu0 }
 0x147   : > { %v4068_v27 = vpop.f32.mrf.mxu1 }
 0x148   : > { %v5679_v12 = vadd.f32 %v1757_v63, %v1623_v25  ;;  %v1626_v11 = vadd.f32 %v4068_v27, %v5497_v61  ;;  %v1767_v15 = vpop.f32.mrf.mxu0 }
 0x149   : > { %v1498_v28 = vpop.f32.mrf.mxu1 }
 0x14a   : > { %v5682_v48 = vadd.f32 %v4118_v13, %v1626_v11  ;;  %v1625_v14 = vadd.f32 %v1498_v28, %v5506_v4  ;;  %v4121_v35 = vpop.f32.mrf.mxu0 }
 0x14b   : > { %v4071_v50 = vpop.f32.mrf.mxu1 }
 0x14c   : > { %v5685_v32 = vadd.f32 %v1767_v15, %v1625_v14  ;;  %v1628_v21 = vadd.f32 %v4071_v50, %v5511_v46  ;;  %v1777_v45 = vpop.f32.mrf.mxu0 }
 0x14d   : > { %v1508_v37 = vpop.f32.mrf.mxu1 }
 0x14e   : > { %v5688_v40 = vadd.f32 %v4121_v35, %v1628_v21  ;;  %v1627_v2 = vadd.f32 %v1508_v37, %v5520_v62  ;;  %v4124_v51 = vpop.f32.mrf.mxu0 }
 0x14f   : > { %v4074_v61 = vpop.f32.mrf.mxu1 }
 0x150   : > { %v5691_v17 = vadd.f32 %v1777_v45, %v1627_v2  ;;  %v1630_v5 = vadd.f32 %v4074_v61, %v5525_v34  ;;  %v1787_v60 = vpop.f32.mrf.mxu0 }
 0x151   : > { %v1518_v4 = vpop.f32.mrf.mxu1 }
 0x152   : > { %v5694_v23 = vadd.f32 %v4124_v51, %v1630_v5  ;;  %v1629_v44 = vadd.f32 %v1518_v4, %v5534_v26  ;;  %v4127_v57 = vpop.f32.mrf.mxu0 }
 0x153   : > { %v4077_v46 = vpop.f32.mrf.mxu1 }
 0x154   : > { %v5697_v52 = vadd.f32 %v1787_v60, %v1629_v44  ;;  %v1632_v19 = vadd.f32 %v4077_v46, %v5539_v9  ;;  %v1797_v43 = vpop.f32.mrf.mxu0 }
 0x155   : > { %v1528_v62 = vpop.f32.mrf.mxu1 }
 0x156   : > { %v5700_v6 = vadd.f32 %v4127_v57, %v1632_v19  ;;  %v1631_v29 = vadd.f32 %v1528_v62, %v5548_v42  ;;  %v4130_v20 = vpop.f32.mrf.mxu0 }
 0x157   : > { %v4080_v34 = vpop.f32.mrf.mxu1 }
 0x158   : > { %v5703_v16 = vadd.f32 %v1797_v43, %v1631_v29  ;;  %v1634_v63 = vadd.f32 %v4080_v34, %v5553_v3  ;;  %v1807_v49 = vpop.f32.mrf.mxu0 }
 0x159   : > { %v1538_v26 = vpop.f32.mrf.mxu1 }
 0x15a   : > { %v5706_v25 = vadd.f32 %v4130_v20, %v1634_v63  ;;  %v1633_v13 = vadd.f32 %v1538_v26, %v5562_v8  ;;  %v4133_v27 = vpop.f32.mrf.mxu0 }
 0x15b   : > { %v4083_v9 = vpop.f32.mrf.mxu1 }
 0x15c   : > { %v5709_v11 = vadd.f32 %v1807_v49, %v1633_v13  ;;  %v1636_v15 = vadd.f32 %v4083_v9, %v5567_v1  ;;  %v1817_v28 = vpop.f32.mrf.mxu0 }
 0x15d   : > { %v1548_v42 = vpop.f32.mrf.mxu1 }
 0x15e   : > { %v5712_v14 = vadd.f32 %v4133_v27, %v1636_v15  ;;  %v1635_v35 = vadd.f32 %v1548_v42, %v5576_v39  ;;  %v4136_v50 = vpop.f32.mrf.mxu0 }
 0x15f   : > { %v4086_v3 = vpop.f32.mrf.mxu1 }
 0x160   : > { %v5715_v21 = vadd.f32 %v1817_v28, %v1635_v35  ;;  %v1638_v45 = vadd.f32 %v4086_v3, %v5581_v55  ;;  %v1827_v37 = vpop.f32.mrf.mxu0 }
 0x161   : > { %v1558_v8 = vpop.f32.mrf.mxu1 }
 0x162   : > { %v5718_v2 = vadd.f32 %v4136_v50, %v1638_v45  ;;  %v1637_v51 = vadd.f32 %v1558_v8, %v5590_v38  ;;  %v4139_v61 = vpop.f32.mrf.mxu0 }
 0x163   : > { %v4089_v1 = vpop.f32.mrf.mxu1 }
 0x164   : > { %6355 = vst [vmem:[#allocation38_spill] sm:$0xff] %v5718_v2  ;;  %v5721_v5 = vadd.f32 %v1827_v37, %v1637_v51  ;;  %v1640_v60 = vadd.f32 %v4089_v1, %v5595_v0  ;;  %v1837_v4 = vpop.f32.mrf.mxu0 }
 0x165   : > { %v1568_v39 = vpop.f32.mrf.mxu1 }
 0x166   : > { %6356 = vst [vmem:[#allocation39_spill] sm:$0xff] %v5721_v5  ;;  %v5724_v44 = vadd.f32 %v4139_v61, %v1640_v60  ;;  %v1639_v57 = vadd.f32 %v1568_v39, %v5606_v47  ;;  %v4142_v46 = vpop.f32.mrf.mxu0 }
 0x167   : > { %v4092_v55 = vpop.f32.mrf.mxu1 }
 0x168   : > { %6357 = vst [vmem:[#allocation40_spill] sm:$0xff] %v5724_v44  ;;  %v5727_v19 = vadd.f32 %v1837_v4, %v1639_v57  ;;  %v1642_v43 = vadd.f32 %v4092_v55, %v5614_v33  ;;  %v1847_v62 = vpop.f32.mrf.mxu0 }
 0x169   : > { %v1578_v38 = vpop.f32.mrf.mxu1 }
 0x16a   : > { %6358 = vst [vmem:[#allocation41_spill] sm:$0xff] %v5727_v19  ;;  %v5730_v29 = vadd.f32 %v4142_v46, %v1642_v43  ;;  %v1641_v20 = vadd.f32 %v1578_v38, %v5623_v36  ;;  %v4145_v34 = vpop.f32.mrf.mxu0 }
 0x16b   : > { %v4095_v0 = vpop.f32.mrf.mxu1 }
 0x16c   : > { %6359 = vst [vmem:[#allocation42_spill] sm:$0xff] %v5730_v29  ;;  %v5733_v63 = vadd.f32 %v1847_v62, %v1641_v20  ;;  %v1644_v49 = vadd.f32 %v4095_v0, %v5630_v22  ;;  %v1857_v26 = vpop.f32.mrf.mxu0 }
 0x16d   : > { %v1588_v47 = vpop.f32.mrf.mxu1 }
 0x16e   : > { %6360 = vst [vmem:[#allocation43_spill] sm:$0xff] %v5733_v63  ;;  %v5736_v13 = vadd.f32 %v4145_v34, %v1644_v49  ;;  %v1643_v27 = vadd.f32 %v1588_v47, %v5639_v58  ;;  %v4148_v9 = vpop.f32.mrf.mxu0 }
 0x16f   : > { %v4098_v33 = vpop.f32.mrf.mxu1 }
 0x170   : > { %6361 = vst [vmem:[#allocation44_spill] sm:$0xff] %v5736_v13  ;;  %v5739_v15 = vadd.f32 %v1857_v26, %v1643_v27  ;;  %v1646_v28 = vadd.f32 %v4098_v33, %v5644_v41  ;;  %v1867_v42 = vpop.f32.mrf.mxu0 }
 0x171   : > { %v1598_v36 = vpop.f32.mrf.mxu1 }
 0x172   : > { %6362 = vst [vmem:[#allocation16_spill] sm:$0xff] %v5739_v15  ;;  %v5742_v35 = vadd.f32 %v4148_v9, %v1646_v28  ;;  %v1645_v50 = vadd.f32 %v1598_v36, %v5649_v31  ;;  %v4151_v3 = vpop.f32.mrf.mxu0 }
 0x173   : > { %v4101_v22 = vpop.f32.mrf.mxu1 }
 0x174   : > { %6363 = vst [vmem:[#allocation21_spill] sm:$0xff] %v5742_v35  ;;  %v5745_v45 = vadd.f32 %v1867_v42, %v1645_v50  ;;  %v1648_v37 = vadd.f32 %v4101_v22, %v5652_v30  ;;  %v1877_v8 = vpop.f32.mrf.mxu0 }
 0x175   : > { %v1608_v58 = vpop.f32.mrf.mxu1 }
 0x176   : > { %6364 = vst [vmem:[#allocation24_spill] sm:$0xff] %v5745_v45  ;;  %v5748_v51 = vadd.f32 %v4151_v3, %v1648_v37  ;;  %v1647_v61 = vadd.f32 %v1608_v58, %v5655_v24  ;;  %v5751_v1 = vpop.f32.mrf.mxu0 }
 0x177   : > { %v4156_v41 = vpop.f32.mrf.mxu1 }
 0x178   : > { %6365 = vst [vmem:[#allocation26_spill] sm:$0xff] %v5748_v51  ;;  %v5753_v60 = vadd.f32 %v1877_v8, %v1647_v61  ;;  %v5755_v4 = vpop.f32.mrf.mxu0 }
 0x179   : > { %v1995_v31 = vpop.f32.mrf.mxu1 }
 0x17a   : > { %6366 = vst [vmem:[#allocation28_spill] sm:$0xff] %v5753_v60  ;;  %v5757_v39 = vpop.f32.mrf.mxu0 }
 0x17b   : > { %v4159_v57 = vpop.f32.mrf.mxu1 }
 0x17c   : > { %v5759_v46 = vpop.f32.mrf.mxu0 }
 0x17d   : > { %v2005_v30 = vpop.f32.mrf.mxu1 }
 0x17e   : > { %v5761_v55 = vpop.f32.mrf.mxu0 }
 0x17f   : > { %v4162_v43 = vpop.f32.mrf.mxu1 }
 0x180   : > { %v5763_v62 = vpop.f32.mrf.mxu0 }
 0x181   : > { %v2015_v24 = vpop.f32.mrf.mxu1 }
 0x182   : > { %v5765_v38 = vpop.f32.mrf.mxu0 }
 0x183   : > { %v4165_v20 = vpop.f32.mrf.mxu1 }
 0x184   : > { %v5767_v34 = vpop.f32.mrf.mxu0 }
 0x185   : > { %v2025_v0 = vpop.f32.mrf.mxu1 }
 0x186   : > { %v5769_v49 = vpop.f32.mrf.mxu0 }
 0x187   : > { %v4168_v26 = vpop.f32.mrf.mxu1 }
 0x188   : > { %v5771_v47 = vpop.f32.mrf.mxu0 }
 0x189   : > { %v2035_v27 = vpop.f32.mrf.mxu1 }
 0x18a   : > { %v5773_v9 = vpop.f32.mrf.mxu0 }
 0x18b   : > { %v4171_v33 = vpop.f32.mrf.mxu1 }
 0x18c   : > { %v5775_v28 = vpop.f32.mrf.mxu0 }
 0x18d   : > { %v2045_v42 = vpop.f32.mrf.mxu1 }
 0x18e   : > { %v5777_v36 = vpop.f32.mrf.mxu0 }
 0x18f   : > { %v4174_v50 = vpop.f32.mrf.mxu1 }
 0x190   : > { %v5779_v3 = vpop.f32.mrf.mxu0 }
 0x191   : > { %6367 = vst [vmem:[#allocation30_spill] sm:$0xff] %v5779_v3  ;;  %v5781_v22 = vpop.f32.mrf.mxu1 }
 0x192   : > { %v5783_v37 = vpop.f32.mrf.mxu0 }
 0x193   : > { %6368 = vst [vmem:[#allocation32_spill] sm:$0xff] %v5783_v37  ;;  %v5785_v8 = vpop.f32.mrf.mxu1 }
 0x194   : > { %v5787_v58 = vpop.f32.mrf.mxu0 }
 0x195   : > { %6369 = vst [vmem:[#allocation2_spill] sm:$0xff] %v5787_v58  ;;  %v5789_v61 = vpop.f32.mrf.mxu1 }
 0x196   : > { %v5791_v60 = vpop.f32.mrf.mxu0 }
 0x197   : > { %6370 = vst [vmem:[#allocation3_spill] sm:$0xff] %v5791_v60  ;;  %v5793_v51 = vpop.f32.mrf.mxu1 }
 0x198   : > { %v5795_v45 = vpop.f32.mrf.mxu0 }
 0x199   : > { %6371 = vst [vmem:[#allocation5_spill] sm:$0xff] %v5795_v45  ;;  %v5797_v35 = vpop.f32.mrf.mxu1 }
 0x19a   : > { %v5799_v15 = vpop.f32.mrf.mxu0 }
 0x19b   : > { %6372 = vst [vmem:[#allocation7_spill] sm:$0xff] %v5799_v15  ;;  %v5801_v13 = vpop.f32.mrf.mxu1 }
 0x19c   : > { %v5803_v63 = vpop.f32.mrf.mxu0 }
 0x19d   : > { %6373 = vst [vmem:[#allocation9_spill] sm:$0xff] %v5803_v63  ;;  %v5805_v29 = vpop.f32.mrf.mxu1 }
 0x19e   : > { %v5807_v19 = vpop.f32.mrf.mxu0 }
 0x19f   : > { %6374 = vst [vmem:[#allocation11_spill] sm:$0xff] %v5807_v19  ;;  %v5809_v44 = vpop.f32.mrf.mxu1 }
 0x1a0   : > { %6375 = vst [vmem:[#allocation13_spill] sm:$0xff] %v5809_v44  ;;  %v5811_v5 = vpop.f32.mrf.mxu0 }
 0x1a1   : > { %6376 = vst [vmem:[#allocation15_spill] sm:$0xff] %v5811_v5  ;;  %v5813_v2 = vpop.f32.mrf.mxu1 }
 0x1a2   : > { %6377 = vst [vmem:[#allocation17_spill] sm:$0xff] %v5813_v2  ;;  %v5815_v60 = vpop.f32.mrf.mxu0 }
 0x1a3   : > { %6378 = vst [vmem:[#allocation20_spill] sm:$0xff] %v5815_v60  ;;  %v5817_v45 = vpop.f32.mrf.mxu1 }
 0x1a4   : > { %6379 = vst [vmem:[#allocation22_spill] sm:$0xff] %v5817_v45  ;;  %v5819_v58 = vpop.f32.mrf.mxu0 }
 0x1a5   : > { %6380 = vst [vmem:[#allocation25_spill] sm:$0xff] %v5819_v58  ;;  %v5821_v15 = vpop.f32.mrf.mxu1 }
 0x1a6   : > { %6381 = vst [vmem:[#allocation27_spill] sm:$0xff] %v5821_v15  ;;  %v5823_v37 = vpop.f32.mrf.mxu0 }
 0x1a7   : > { %6382 = vst [vmem:[#allocation29_spill] sm:$0xff] %v5823_v37  ;;  %v5825_v63 = vpop.f32.mrf.mxu1 }
 0x1a8   : > { %6383 = vst [vmem:[#allocation6_spill] sm:$0xff] %v5825_v63  ;;  %v5827_v3 = vpop.f32.mrf.mxu0 }
 0x1a9   : > { %6384 = vst [vmem:[#allocation31_spill] sm:$0xff] %v5827_v3  ;;  %v5829_v19 = vpop.f32.mrf.mxu1  ;;  %v2155_v3 = vadd.f32 %v4156_v41, %v5658_v10  ;;  %v2161_v41 = vadd.f32 %v4165_v20, %v5676_v53 }
 0x1aa   : > { %6385 = vst [vmem:[#allocation8_spill] sm:$0xff] %v5829_v19  ;;  %v5831_v44 = vpop.f32.mrf.mxu0 }
 0x1ab   : > { %6386 = vst [vmem:[#allocation18_spill] sm:$0xff] %v5831_v44  ;;  %v5833_v5 = vpop.f32.mrf.mxu1  ;;  %v2420_v10 = vadd.f32 %v5751_v1, %v2155_v3 }
 0x1ac   : > { %6387 = vst [vmem:[#allocation33_spill] sm:$0xff] %v5833_v5  ;;  %v5835_v2 = vpop.f32.mrf.mxu0  ;;  %v2154_v5 = vadd.f32 %v1995_v31, %v5661_v59  ;;  %v2163_v31 = vadd.f32 %v4168_v26, %v5682_v48  ;;  %v2168_v26 = vadd.f32 %v5789_v61, %v5703_v16  ;;  %v2173_v16 = vadd.f32 %v5801_v13, %v5712_v14 }
 0x1ad   : > { %6388 = vst [vmem:[#allocation14_spill] sm:$0xff] %v5835_v2  ;;  %v5837_v60 = vpop.f32.mrf.mxu1 }
 0x1ae   : > { %6389 = vst [vmem:[#allocation10_spill] sm:$0xff] %v5837_v60  ;;  %v5839_v45 = vpop.f32.mrf.mxu0  ;;  %v2157_v60 = vadd.f32 %v4159_v57, %v5664_v54  ;;  %v2162_v54 = vadd.f32 %v2035_v27, %v5685_v32 }
 0x1af   : > { %6390 = vst [vmem:[#allocation23_spill] sm:$0xff] %v5839_v45  ;;  %v5841_v58 = vpop.f32.mrf.mxu1  ;;  %v2156_v45 = vadd.f32 %v2005_v30, %v5667_v7  ;;  %v2165_v7 = vadd.f32 %v4171_v33, %v5688_v40  ;;  %v2167_v30 = vadd.f32 %v4174_v50, %v5694_v23  ;;  %v5881_v40 = vadd.f32 %v5765_v38, %v2161_v41 }
 0x1b0   : > { %6391 = vst [vmem:[#allocation12_spill] sm:$0xff] %v5841_v58  ;;  %v5843_v37 = vpop.f32.mrf.mxu0  ;;  %v2159_v58 = vadd.f32 %v4162_v43, %v5670_v56  ;;  %v2164_v56 = vadd.f32 %v2045_v42, %v5691_v17  ;;  %v2422_v53 = vadd.f32 %v5757_v39, %v2157_v60  ;;  %v5887_v60 = vadd.f32 %v5769_v49, %v2163_v31 }
 0x1b1   : > { %6392 = vst [vmem:[#allocation34_spill] sm:$0xff] %v5843_v37  ;;  %v5845_v63 = vpop.f32.mrf.mxu1  ;;  %v2158_v37 = vadd.f32 %v2015_v24, %v5673_v18  ;;  %v2419_v18 = vadd.f32 %v5755_v4, %v2154_v5  ;;  %v5890_v4 = vadd.f32 %v5771_v47, %v2162_v54  ;;  %v5893_v39 = vadd.f32 %v5773_v9, %v2165_v7  ;;  %v6397_v7 = vld [vmem:[#allocation3_spill] sm:$0xff] }
 0x1b2   : > { %v5848_v19 = vpop.f32.mrf.mxu0  ;;  %v2424_v24 = vadd.f32 %v5761_v55, %v2159_v58  ;;  %v2169_v49 = vadd.f32 %v5785_v8, %v5700_v6  ;;  %v2171_v47 = vadd.f32 %v5793_v51, %v5706_v25  ;;  %v2170_v6 = vadd.f32 %v5797_v35, %v5709_v11  ;;  %v6394_v58 = vld [vmem:[#allocation30_spill] sm:$0xff]  ;;  %v6395_v35 = vld [vmem:[#allocation32_spill] sm:$0xff] }
 0x1b3   : > { %6393 = vst [vmem:[#allocation4_spill] sm:$0xff] %v5848_v19  ;;  %v5850_v44 = vpop.f32.mrf.mxu1  ;;  %v2160_v19 = vadd.f32 %v2025_v0, %v5679_v12  ;;  %v2421_v12 = vadd.f32 %v5759_v46, %v2156_v45  ;;  %v2423_v48 = vadd.f32 %v5763_v62, %v2158_v37  ;;  %v5896_v46 = vadd.f32 %v5775_v28, %v2164_v56 }
 0x1b4   : > { %v5853_v2 = vpop.f32.mrf.mxu0  ;;  %v2166_v0 = vadd.f32 %v5781_v22, %v5697_v52  ;;  %v2172_v51 = vadd.f32 %v5805_v29, %v5715_v21  ;;  %v5929_v14 = vadd.f32 %v6395_v35, %v2169_v49  ;;  %v6396_v21 = vld [vmem:[#allocation2_spill] sm:$0xff]  ;;  %v5935_v56 = vadd.f32 %v6397_v7, %v2171_v47 }
 0x1b5   : > { %v5859_v15 = vpop.f32.mrf.mxu1  ;;  %v5884_v17 = vadd.f32 %v5767_v34, %v2160_v19  ;;  %v5899_v19 = vadd.f32 %v5777_v36, %v2167_v30  ;;  %v5932_v29 = vadd.f32 %v6396_v21, %v2168_v26 }
 0x1b6   : > { %v4306_v59 = vpop.f32.mrf.mxu0  ;;  %v5926_v11 = vadd.f32 %v6394_v58, %v2166_v0 }
 0x1b7   : > { %v4256_v57 = vpop.f32.mrf.mxu1 }
 0x1b8   : > { %v2689_v1 = vadd.f32 %v4256_v57, %v2420_v10  ;;  %v2797_v43 = vpop.f32.mrf.mxu0  ;;  %v6398_v57 = vld [vmem:[#allocation5_spill] sm:$0xff] }
 0x1b9   : > { %v2529_v32 = vpop.f32.mrf.mxu1 }
 0x1ba   : > { %v2957_v23 = vadd.f32 %v4306_v59, %v2689_v1  ;;  %v2688_v5 = vadd.f32 %v2529_v32, %v2419_v18  ;;  %v4309_v45 = vpop.f32.mrf.mxu0  ;;  %v5938_v18 = vadd.f32 %v6398_v57, %v2170_v6  ;;  %v6406_v57 = vld [vmem:[#allocation15_spill] sm:$0xff] }
 0x1bb   : > { %v4259_v55 = vpop.f32.mrf.mxu1 }
 0x1bc   : > { %2989 = vst.msk [vmem:[%s5878_s18 + $0x8] sm:$0xff] %vm401_vm1, %v2957_v23  ;;  %v3092_v62 = vmul.f32 %v2957_v23, %v2957_v23  ;;  %v2956_v38 = vadd.f32 %v2797_v43, %v2688_v5  ;;  %v2691_v20 = vadd.f32 %v4259_v55, %v2422_v53  ;;  %v2807_v34 = vpop.f32.mrf.mxu0  ;;  %v3021_v9 = vsel %vm401_vm1, %v2957_v23, 0.0  ;;  %v6399_v53 = vld [vmem:[#allocation7_spill] sm:$0xff]  ;;  %v6402_v55 = vld [vmem:[#allocation13_spill] sm:$0xff] }
 0x1bd   : > { %v2539_v27 = vpop.f32.mrf.mxu1 }
 0x1be   : > { %2988 = vst.msk [vmem:[%s5878_s18] sm:$0xff] %vm401_vm1, %v2956_v38  ;;  %v3020_v33 = vsel %vm401_vm1, %v2956_v38, 0.0  ;;  %v3091_v28 = vmul.f32 %v2956_v38, %v2956_v38  ;;  %v2959_v42 = vadd.f32 %v4309_v45, %v2691_v20  ;;  %v4312_v52 = vpop.f32.mrf.mxu0  ;;  %v2690_v50 = vadd.f32 %v2539_v27, %v2421_v12  ;;  %v6401_v45 = vld [vmem:[#allocation38_spill] sm:$0xff] }
 0x1bf   : > { %v3022_v36 = vadd.f32 %v3021_v9, %v3020_v33  ;;  %v4262_v25 = vpop.f32.mrf.mxu1  ;;  %v3124_v3 = vsel %vm401_vm1, %v3092_v62, 0.0  ;;  %v5944_v12 = vadd.f32 %v6399_v53, %v2173_v16  ;;  %v2175_v62 = vadd.f32 %v6402_v55, %v6401_v45  ;;  %v6403_v16 = vld [vmem:[#allocation39_spill] sm:$0xff] }
 0x1c0   : > { %v3123_v22 = vsel %vm401_vm1, %v3091_v28, 0.0  ;;  %2991 = vst.msk [vmem:[%s5878_s18 + $0x18] sm:$0xff] %vm401_vm1, %v2959_v42  ;;  %v2693_v37 = vadd.f32 %v4262_v25, %v2424_v24  ;;  %v2817_v8 = vpop.f32.mrf.mxu0  ;;  %v2958_v61 = vadd.f32 %v2807_v34, %v2690_v50  ;;  %v3094_v41 = vmul.f32 %v2959_v42, %v2959_v42  ;;  %v6400_v24 = vld [vmem:[#allocation9_spill] sm:$0xff] }
 0x1c1   : > { %v3125_v13 = vadd.f32 %v3124_v3, %v3123_v22  ;;  %v2549_v10 = vpop.f32.mrf.mxu1  ;;  %v5947_v32 = vadd.f32 %v6400_v24, %v2172_v51  ;;  %v3025_v38 = vsel %vm401_vm1, %v2959_v42, 0.0 }
 0x1c2   : > { %v2961_v59 = vadd.f32 %v4312_v52, %v2693_v37  ;;  %v2692_v31 = vadd.f32 %v2549_v10, %v2423_v48  ;;  %v4315_v54 = vpop.f32.mrf.mxu0  ;;  %2990 = vst.msk [vmem:[%s5878_s18 + $0x10] sm:$0xff] %vm401_vm1, %v2958_v61  ;;  %v3023_v30 = vsel %vm401_vm1, %v2958_v61, 0.0  ;;  %v3093_v1 = vmul.f32 %v2958_v61, %v2958_v61 }
 0x1c3   : > { %v4265_v43 = vpop.f32.mrf.mxu1  ;;  %v3024_v48 = vadd.f32 %v3023_v30, %v3022_v36  ;;  %v3128_v49 = vsel %vm401_vm1, %v3094_v41, 0.0  ;;  %v6404_v36 = vld [vmem:[#allocation17_spill] sm:$0xff]  ;;  %v6405_v41 = vld [vmem:[#allocation11_spill] sm:$0xff] }
 0x1c4   : > { %2993 = vst.msk [vmem:[%s5878_s18 + $0x28] sm:$0xff] %vm401_vm1, %v2961_v59  ;;  %v2960_v23 = vadd.f32 %v2817_v8, %v2692_v31  ;;  %v2827_v5 = vpop.f32.mrf.mxu0  ;;  %v3126_v20 = vsel %vm401_vm1, %v3093_v1, 0.0  ;;  %v2695_v34 = vadd.f32 %v4265_v43, %v5881_v40  ;;  %v3096_v33 = vmul.f32 %v2961_v59, %v2961_v59  ;;  %v6407_v1 = vld [vmem:[#allocation40_spill] sm:$0xff]  ;;  %v6408_v43 = vld [vmem:[#allocation22_spill] sm:$0xff] }
 0x1c5   : > { %v2559_v0 = vpop.f32.mrf.mxu1  ;;  %v3127_v26 = vadd.f32 %v3126_v20, %v3125_v13  ;;  %v3026_v47 = vadd.f32 %v3025_v38, %v3024_v48  ;;  %v2174_v40 = vadd.f32 %v6404_v36, %v6403_v16  ;;  %v3029_v22 = vsel %vm401_vm1, %v2961_v59, 0.0  ;;  %v6409_v16 = vld [vmem:[#allocation41_spill] sm:$0xff]  ;;  %v6410_v36 = vld [vmem:[#allocation27_spill] sm:$0xff] }
 0x1c6   : > { %2992 = vst.msk [vmem:[%s5878_s18 + $0x20] sm:$0xff] %vm401_vm1, %v2960_v23  ;;  %v3027_v27 = vsel %vm401_vm1, %v2960_v23, 0.0  ;;  %v4318_v9 = vpop.f32.mrf.mxu0  ;;  %v3095_v28 = vmul.f32 %v2960_v23, %v2960_v23  ;;  %v2963_v52 = vadd.f32 %v4315_v54, %v2695_v34  ;;  %v2694_v42 = vadd.f32 %v2559_v0, %v5884_v17 }
 0x1c7   : > { %v4268_v6 = vpop.f32.mrf.mxu1  ;;  %v3028_v50 = vadd.f32 %v3027_v27, %v3026_v47  ;;  %v3129_v25 = vadd.f32 %v3128_v49, %v3127_v26  ;;  %v5970_v31 = vadd.f32 %v6405_v41, %v2175_v62  ;;  %v5977_v30 = vadd.f32 %v6406_v57, %v2174_v40  ;;  %v6411_v40 = vld [vmem:[#allocation42_spill] sm:$0xff]  ;;  %v6413_v57 = vld [vmem:[#allocation20_spill] sm:$0xff] }
 0x1c8   : > { %v2697_v51 = vadd.f32 %v4268_v6, %v5887_v60  ;;  %v2837_v3 = vpop.f32.mrf.mxu0  ;;  %v3130_v37 = vsel %vm401_vm1, %v3095_v28, 0.0  ;;  %2995 = vst.msk [vmem:[%s5878_s18 + $0x38] sm:$0xff] %vm401_vm1, %v2963_v52  ;;  %v3098_v8 = vmul.f32 %v2963_v52, %v2963_v52  ;;  %v2962_v58 = vadd.f32 %v2827_v5, %v2694_v42 }
 0x1c9   : > { %v2569_v35 = vpop.f32.mrf.mxu1  ;;  %v3131_v17 = vadd.f32 %v3130_v37, %v3129_v25  ;;  %v3030_v13 = vadd.f32 %v3029_v22, %v3028_v50  ;;  %v3132_v60 = vsel %vm401_vm1, %v3096_v33, 0.0  ;;  %v2177_v53 = vadd.f32 %v6408_v43, %v6407_v1  ;;  %v6412_v50 = vld [vmem:[#allocation6_spill] sm:$0xff] }
 0x1ca   : > { %v2965_v61 = vadd.f32 %v4318_v9, %v2697_v51  ;;  %v2696_v10 = vadd.f32 %v2569_v35, %v5890_v4  ;;  %v4321_v21 = vpop.f32.mrf.mxu0  ;;  %2994 = vst.msk [vmem:[%s5878_s18 + $0x30] sm:$0xff] %vm401_vm1, %v2962_v58  ;;  %v3031_v59 = vsel %vm401_vm1, %v2962_v58, 0.0  ;;  %v3097_v54 = vmul.f32 %v2962_v58, %v2962_v58 }
 0x1cb   : > { %v4271_v7 = vpop.f32.mrf.mxu1  ;;  %v3032_v4 = vadd.f32 %v3031_v59, %v3030_v13  ;;  %v3133_v24 = vadd.f32 %v3132_v60, %v3131_v17  ;;  %v3033_v23 = vsel %vm401_vm1, %v2963_v52, 0.0  ;;  %v3136_v38 = vsel %vm401_vm1, %v3098_v8, 0.0 }
 0x1cc   : > { %2997 = vst.msk [vmem:[%s5878_s18 + $0x48] sm:$0xff] %vm401_vm1, %v2965_v61  ;;  %v2847_v48 = vpop.f32.mrf.mxu0  ;;  %v3134_v5 = vsel %vm401_vm1, %v3097_v54, 0.0  ;;  %v2964_v45 = vadd.f32 %v2837_v3, %v2696_v10  ;;  %v2699_v55 = vadd.f32 %v4271_v7, %v5893_v39  ;;  %v3100_v26 = vmul.f32 %v2965_v61, %v2965_v61 }
 0x1cd   : > { %v2579_v62 = vpop.f32.mrf.mxu1  ;;  %v3135_v20 = vadd.f32 %v3134_v5, %v3133_v24  ;;  %v3034_v34 = vadd.f32 %v3033_v23, %v3032_v4  ;;  %v2179_v25 = vadd.f32 %v6412_v50, %v6411_v40  ;;  %v3037_v51 = vsel %vm401_vm1, %v2965_v61, 0.0 }
 0x1ce   : > { %v2698_v0 = vadd.f32 %v2579_v62, %v5896_v46  ;;  %v4324_v49 = vpop.f32.mrf.mxu0  ;;  %2996 = vst.msk [vmem:[%s5878_s18 + $0x40] sm:$0xff] %vm401_vm1, %v2964_v45  ;;  %v3035_v47 = vsel %vm401_vm1, %v2964_v45, 0.0  ;;  %v3099_v27 = vmul.f32 %v2964_v45, %v2964_v45  ;;  %v2967_v9 = vadd.f32 %v4321_v21, %v2699_v55  ;;  %v6414_v62 = vld [vmem:[#allocation25_spill] sm:$0xff] }
 0x1cf   : > { %v4274_v33 = vpop.f32.mrf.mxu1  ;;  %v3036_v28 = vadd.f32 %v3035_v47, %v3034_v34  ;;  %v3137_v39 = vadd.f32 %v3136_v38, %v3135_v20  ;;  %v2176_v46 = vadd.f32 %v6410_v36, %v6409_v16  ;;  %v3140_v17 = vsel %vm401_vm1, %v3100_v26, 0.0  ;;  %v6416_v26 = vld [vmem:[#allocation43_spill] sm:$0xff]  ;;  %v6417_v47 = vld [vmem:[#allocation8_spill] sm:$0xff] }
 0x1d0   : > { %v2966_v52 = vadd.f32 %v2847_v48, %v2698_v0  ;;  %v2701_v42 = vadd.f32 %v4274_v33, %v5899_v19  ;;  %v2857_v6 = vpop.f32.mrf.mxu0  ;;  %v3138_v3 = vsel %vm401_vm1, %v3099_v27, 0.0  ;;  %2999 = vst.msk [vmem:[%s5878_s18 + $0x58] sm:$0xff] %vm401_vm1, %v2967_v9  ;;  %v3102_v13 = vmul.f32 %v2967_v9, %v2967_v9  ;;  %v6415_v0 = vld [vmem:[#allocation29_spill] sm:$0xff] }
 0x1d1   : > { %v2589_v22 = vpop.f32.mrf.mxu1  ;;  %v3139_v37 = vadd.f32 %v3138_v3, %v3137_v39  ;;  %v3038_v8 = vadd.f32 %v3037_v51, %v3036_v28  ;;  %v6008_v1 = vadd.f32 %v6413_v57, %v2177_v53  ;;  %v3041_v43 = vsel %vm401_vm1, %v2967_v9, 0.0 }
 0x1d2   : > { %2998 = vst.msk [vmem:[%s5878_s18 + $0x50] sm:$0xff] %vm401_vm1, %v2966_v52  ;;  %v3039_v19 = vsel %vm401_vm1, %v2966_v52, 0.0  ;;  %v3101_v58 = vmul.f32 %v2966_v52, %v2966_v52  ;;  %v4327_v35 = vpop.f32.mrf.mxu0  ;;  %v2969_v10 = vadd.f32 %v4324_v49, %v2701_v42  ;;  %v2700_v61 = vadd.f32 %v2589_v22, %v5926_v11 }
 0x1d3   : > { %v4277_v21 = vpop.f32.mrf.mxu1  ;;  %v3040_v41 = vadd.f32 %v3039_v19, %v3038_v8  ;;  %v3141_v60 = vadd.f32 %v3140_v17, %v3139_v37  ;;  %v3144_v53 = vsel %vm401_vm1, %v3102_v13, 0.0  ;;  %v6022_v49 = vadd.f32 %v6415_v0, %v2179_v25  ;;  %v6418_v17 = vld [vmem:[#allocation44_spill] sm:$0xff]  ;;  %v6419_v13 = vld [vmem:[#allocation33_spill] sm:$0xff] }
 0x1d4   : > { %v3142_v59 = vsel %vm401_vm1, %v3101_v58, 0.0  ;;  %v2703_v54 = vadd.f32 %v4277_v21, %v5929_v14  ;;  %v2867_v7 = vpop.f32.mrf.mxu0  ;;  %3001 = vst.msk [vmem:[%s5878_s18 + $0x68] sm:$0xff] %vm401_vm1, %v2969_v10  ;;  %v3104_v4 = vmul.f32 %v2969_v10, %v2969_v10  ;;  %v2968_v24 = vadd.f32 %v2857_v6, %v2700_v61  ;;  %v6421_v61 = vld [vmem:[#allocation10_spill] sm:$0xff] }
 0x1d5   : > { %v2599_v48 = vpop.f32.mrf.mxu1  ;;  %v3143_v11 = vadd.f32 %v3142_v59, %v3141_v60  ;;  %v3042_v23 = vadd.f32 %v3041_v43, %v3040_v41  ;;  %v6015_v14 = vadd.f32 %v6414_v62, %v2176_v46  ;;  %v2178_v27 = vadd.f32 %v6417_v47, %v6416_v26 }
 0x1d6   : > { %v2971_v5 = vadd.f32 %v4327_v35, %v2703_v54  ;;  %v2702_v45 = vadd.f32 %v2599_v48, %v5932_v29  ;;  %v4330_v55 = vpop.f32.mrf.mxu0  ;;  %3000 = vst.msk [vmem:[%s5878_s18 + $0x60] sm:$0xff] %vm401_vm1, %v2968_v24  ;;  %v3043_v38 = vsel %vm401_vm1, %v2968_v24, 0.0  ;;  %v3103_v20 = vmul.f32 %v2968_v24, %v2968_v24 }
 0x1d7   : > { %v4280_v34 = vpop.f32.mrf.mxu1  ;;  %v3044_v29 = vadd.f32 %v3043_v38, %v3042_v23  ;;  %v3145_v9 = vadd.f32 %v3144_v53, %v3143_v11  ;;  %v3045_v28 = vsel %vm401_vm1, %v2969_v10, 0.0  ;;  %v3148_v16 = vsel %vm401_vm1, %v3104_v4, 0.0  ;;  %v6420_v10 = vld [vmem:[#allocation16_spill] sm:$0xff]  ;;  %v6422_v38 = vld [vmem:[#allocation31_spill] sm:$0xff] }
 0x1d8   : > { %3003 = vst.msk [vmem:[%s5878_s18 + $0x78] sm:$0xff] %vm401_vm1, %v2971_v5  ;;  %v2877_v33 = vpop.f32.mrf.mxu0  ;;  %v3146_v39 = vsel %vm401_vm1, %v3103_v20, 0.0  ;;  %v2970_v52 = vadd.f32 %v2867_v7, %v2702_v45  ;;  %v2705_v42 = vadd.f32 %v4280_v34, %v5935_v56  ;;  %v3106_v25 = vmul.f32 %v2971_v5, %v2971_v5 }
 0x1d9   : > { %v2609_v6 = vpop.f32.mrf.mxu1  ;;  %v3147_v36 = vadd.f32 %v3146_v39, %v3145_v9  ;;  %v3046_v46 = vadd.f32 %v3045_v28, %v3044_v29  ;;  %v2180_v21 = vadd.f32 %v6421_v61, %v6420_v10  ;;  %v3049_v41 = vsel %vm401_vm1, %v2971_v5, 0.0  ;;  %v6423_v39 = vld [vmem:[#allocation18_spill] sm:$0xff] }
 0x1da   : > { %v2704_v40 = vadd.f32 %v2609_v6, %v5938_v18  ;;  %v4333_v50 = vpop.f32.mrf.mxu0  ;;  %3002 = vst.msk [vmem:[%s5878_s18 + $0x70] sm:$0xff] %vm401_vm1, %v2970_v52  ;;  %v3047_v51 = vsel %vm401_vm1, %v2970_v52, 0.0  ;;  %v3105_v3 = vmul.f32 %v2970_v52, %v2970_v52  ;;  %v2973_v22 = vadd.f32 %v4330_v55, %v2705_v42 }
 0x1db   : > { %v4283_v37 = vpop.f32.mrf.mxu1  ;;  %v3048_v8 = vadd.f32 %v3047_v51, %v3046_v46  ;;  %v3149_v56 = vadd.f32 %v3148_v16, %v3147_v36  ;;  %v2181_v18 = vadd.f32 %v6419_v13, %v6418_v17  ;;  %v3152_v4 = vsel %vm401_vm1, %v3106_v25, 0.0  ;;  %v6424_v16 = vld [vmem:[#allocation14_spill] sm:$0xff]  ;;  %v6425_v46 = vld [vmem:[#allocation21_spill] sm:$0xff] }
 0x1dc   : > { %v2972_v19 = vadd.f32 %v2877_v33, %v2704_v40  ;;  %v2707_v58 = vadd.f32 %v4283_v37, %v5944_v12  ;;  %v2887_v35 = vpop.f32.mrf.mxu0  ;;  %v3150_v60 = vsel %vm401_vm1, %v3105_v3, 0.0  ;;  %3005 = vst.msk [vmem:[%s5878_s18 + $0x88] sm:$0xff] %vm401_vm1, %v2973_v22  ;;  %v3108_v24 = vmul.f32 %v2973_v22, %v2973_v22  ;;  %v6426_v40 = vld [vmem:[#allocation12_spill] sm:$0xff] }
 0x1dd   : > { %v2619_v59 = vpop.f32.mrf.mxu1  ;;  %v3151_v54 = vadd.f32 %v3150_v60, %v3149_v56  ;;  %v3050_v7 = vadd.f32 %v3049_v41, %v3048_v8  ;;  %v2443_v20 = vadd.f32 %v6422_v38, %v2178_v27  ;;  %v3053_v34 = vsel %vm401_vm1, %v2973_v22, 0.0 }
 0x1de   : > { %3004 = vst.msk [vmem:[%s5878_s18 + $0x80] sm:$0xff] %vm401_vm1, %v2972_v19  ;;  %v3051_v12 = vsel %vm401_vm1, %v2972_v19, 0.0  ;;  %v3107_v57 = vmul.f32 %v2972_v19, %v2972_v19  ;;  %v4336_v43 = vpop.f32.mrf.mxu0  ;;  %v2975_v48 = vadd.f32 %v4333_v50, %v2707_v58  ;;  %v2706_v11 = vadd.f32 %v2619_v59, %v5947_v32 }
 0x1df   : > { %v4286_v23 = vpop.f32.mrf.mxu1  ;;  %v3052_v5 = vadd.f32 %v3051_v12, %v3050_v7  ;;  %v3153_v45 = vadd.f32 %v3152_v4, %v3151_v54  ;;  %v2446_v52 = vadd.f32 %v6423_v39, %v2181_v18  ;;  %v2445_v36 = vadd.f32 %v6424_v16, %v2180_v21  ;;  %v6427_v12 = vld [vmem:[#allocation24_spill] sm:$0xff]  ;;  %v6430_v16 = vld [vmem:[#allocation34_spill] sm:$0xff] }
 0x1e0   : > { %v3154_v55 = vsel %vm401_vm1, %v3107_v57, 0.0  ;;  %v2709_v62 = vadd.f32 %v4286_v23, %v5970_v31  ;;  %v2897_v53 = vpop.f32.mrf.mxu0  ;;  %3007 = vst.msk [vmem:[%s5878_s18 + $0x98] sm:$0xff] %vm401_vm1, %v2975_v48  ;;  %v3110_v0 = vmul.f32 %v2975_v48, %v2975_v48  ;;  %v2974_v26 = vadd.f32 %v2887_v35, %v2706_v11  ;;  %v6428_v57 = vld [vmem:[#allocation26_spill] sm:$0xff] }
 0x1e1   : > { %v2629_v47 = vpop.f32.mrf.mxu1  ;;  %v3155_v32 = vadd.f32 %v3154_v55, %v3153_v45  ;;  %v3054_v29 = vadd.f32 %v3053_v34, %v3052_v5  ;;  %v3156_v31 = vsel %vm401_vm1, %v3108_v24, 0.0  ;;  %v2183_v50 = vadd.f32 %v6426_v40, %v6425_v46 }
 0x1e2   : > { %v2977_v9 = vadd.f32 %v4336_v43, %v2709_v62  ;;  %v2708_v33 = vadd.f32 %v2629_v47, %v5977_v30  ;;  %v4339_v28 = vpop.f32.mrf.mxu0  ;;  %3006 = vst.msk [vmem:[%s5878_s18 + $0x90] sm:$0xff] %vm401_vm1, %v2974_v26  ;;  %v3055_v27 = vsel %vm401_vm1, %v2974_v26, 0.0  ;;  %v3109_v42 = vmul.f32 %v2974_v26, %v2974_v26 }
 0x1e3   : > { %v4289_v6 = vpop.f32.mrf.mxu1  ;;  %v3056_v25 = vadd.f32 %v3055_v27, %v3054_v29  ;;  %v3157_v51 = vadd.f32 %v3156_v31, %v3155_v32  ;;  %v3057_v3 = vsel %vm401_vm1, %v2975_v48, 0.0  ;;  %v3160_v19 = vsel %vm401_vm1, %v3110_v0, 0.0  ;;  %v6429_v32 = vld [vmem:[#allocation23_spill] sm:$0xff] }
 0x1e4   : > { %3009 = vst.msk [vmem:[%s5878_s18 + $0xa8] sm:$0xff] %vm401_vm1, %v2977_v9  ;;  %v2907_v30 = vpop.f32.mrf.mxu0  ;;  %v3158_v22 = vsel %vm401_vm1, %v3109_v42, 0.0  ;;  %v2976_v37 = vadd.f32 %v2897_v53, %v2708_v33  ;;  %v2711_v8 = vadd.f32 %v4289_v6, %v6008_v1  ;;  %v3112_v18 = vmul.f32 %v2977_v9, %v2977_v9 }
 0x1e5   : > { %v2639_v56 = vpop.f32.mrf.mxu1  ;;  %v3159_v58 = vadd.f32 %v3158_v22, %v3157_v51  ;;  %v3058_v35 = vadd.f32 %v3057_v3, %v3056_v25  ;;  %v2185_v43 = vadd.f32 %v5850_v44, %v6428_v57  ;;  %v3061_v4 = vsel %vm401_vm1, %v2977_v9, 0.0  ;;  %v6431_v51 = vld [vmem:[#allocation4_spill] sm:$0xff] }
 0x1e6   : > { %v2710_v17 = vadd.f32 %v2639_v56, %v6015_v14  ;;  %v4342_v13 = vpop.f32.mrf.mxu0  ;;  %3008 = vst.msk [vmem:[%s5878_s18 + $0xa0] sm:$0xff] %vm401_vm1, %v2976_v37  ;;  %v3059_v10 = vsel %vm401_vm1, %v2976_v37, 0.0  ;;  %v3111_v61 = vmul.f32 %v2976_v37, %v2976_v37  ;;  %v2979_v21 = vadd.f32 %v4339_v28, %v2711_v8  ;;  %v6432_v3 = vld [vmem:[#allocation28_spill] sm:$0xff] }
 0x1e7   : > { %v4292_v41 = vpop.f32.mrf.mxu1  ;;  %v3060_v60 = vadd.f32 %v3059_v10, %v3058_v35  ;;  %v3161_v1 = vadd.f32 %v3160_v19, %v3159_v58  ;;  %v2182_v14 = vadd.f32 %v5845_v63, %v6427_v12  ;;  %v3164_v63 = vsel %vm401_vm1, %v3112_v18, 0.0 }
 0x1e8   : > { %v2978_v59 = vadd.f32 %v2907_v30, %v2710_v17  ;;  %v2713_v54 = vadd.f32 %v4292_v41, %v6022_v49  ;;  %v2917_v7 = vpop.f32.mrf.mxu0  ;;  %v3162_v24 = vsel %vm401_vm1, %v3111_v61, 0.0  ;;  %3011 = vst.msk [vmem:[%s5878_s18 + $0xb8] sm:$0xff] %vm401_vm1, %v2979_v21  ;;  %v3114_v55 = vmul.f32 %v2979_v21, %v2979_v21 }
 0x1e9   : > { %v2649_v48 = vpop.f32.mrf.mxu1  ;;  %v3163_v11 = vadd.f32 %v3162_v24, %v3161_v1  ;;  %v3062_v23 = vadd.f32 %v3061_v4, %v3060_v60  ;;  %v2448_v29 = vadd.f32 %v6429_v32, %v2183_v50  ;;  %v3065_v9 = vsel %vm401_vm1, %v2979_v21, 0.0 }
 0x1ea   : > { %3010 = vst.msk [vmem:[%s5878_s18 + $0xb0] sm:$0xff] %vm401_vm1, %v2978_v59  ;;  %v3063_v49 = vsel %vm401_vm1, %v2978_v59, 0.0  ;;  %v3113_v5 = vmul.f32 %v2978_v59, %v2978_v59  ;;  %v4345_v45 = vpop.f32.mrf.mxu0  ;;  %v2981_v44 = vadd.f32 %v4342_v13, %v2713_v54  ;;  %v2712_v62 = vadd.f32 %v2649_v48, %v2443_v20 }
 0x1eb   : > { %v4295_v53 = vpop.f32.mrf.mxu1  ;;  %v3064_v38 = vadd.f32 %v3063_v49, %v3062_v23  ;;  %v3165_v34 = vadd.f32 %v3164_v63, %v3163_v11  ;;  %v2447_v46 = vadd.f32 %v6430_v16, %v2182_v14  ;;  %v2450_v30 = vadd.f32 %v6431_v51, %v2185_v43 }
 0x1ec   : > { %v3166_v0 = vsel %vm401_vm1, %v3113_v5, 0.0  ;;  %v2715_v26 = vadd.f32 %v4295_v53, %v2446_v52  ;;  %v2927_v47 = vpop.f32.mrf.mxu0  ;;  %3013 = vst.msk [vmem:[%s5878_s18 + $0xc8] sm:$0xff] %vm401_vm1, %v2981_v44  ;;  %v3116_v33 = vmul.f32 %v2981_v44, %v2981_v44  ;;  %v2980_v28 = vadd.f32 %v2917_v7, %v2712_v62 }
 0x1ed   : > { %v2659_v39 = vpop.f32.mrf.mxu1  ;;  %v3167_v31 = vadd.f32 %v3166_v0, %v3165_v34  ;;  %v3066_v20 = vadd.f32 %v3065_v9, %v3064_v38  ;;  %v3168_v52 = vsel %vm401_vm1, %v3114_v55, 0.0  ;;  %v2184_v22 = vadd.f32 %v5859_v15, %v6432_v3 }
 0x1ee   : > { %v2983_v27 = vadd.f32 %v4345_v45, %v2715_v26  ;;  %v2714_v42 = vadd.f32 %v2659_v39, %v2445_v36  ;;  %v4348_v6 = vpop.f32.mrf.mxu0  ;;  %3012 = vst.msk [vmem:[%s5878_s18 + $0xc0] sm:$0xff] %vm401_vm1, %v2980_v28  ;;  %v3067_v40 = vsel %vm401_vm1, %v2980_v28, 0.0  ;;  %v3115_v50 = vmul.f32 %v2980_v28, %v2980_v28 }
 0x1ef   : > { %v4298_v25 = vpop.f32.mrf.mxu1  ;;  %v3068_v37 = vadd.f32 %v3067_v40, %v3066_v20  ;;  %v3169_v8 = vadd.f32 %v3168_v52, %v3167_v31  ;;  %v3069_v56 = vsel %vm401_vm1, %v2981_v44, 0.0  ;;  %v3172_v13 = vsel %vm401_vm1, %v3116_v33, 0.0 }
 0x1f0   : > { %3015 = vst.msk [vmem:[%s5878_s18 + $0xd8] sm:$0xff] %vm401_vm1, %v2983_v27  ;;  %v2937_v36 = vpop.f32.mrf.mxu0  ;;  %v3170_v19 = vsel %vm401_vm1, %v3115_v50, 0.0  ;;  %v2982_v58 = vadd.f32 %v2927_v47, %v2714_v42  ;;  %v2717_v35 = vadd.f32 %v4298_v25, %v2448_v29  ;;  %v3118_v21 = vmul.f32 %v2983_v27, %v2983_v27 }
 0x1f1   : > { %v2669_v17 = vpop.f32.mrf.mxu1  ;;  %v3171_v18 = vadd.f32 %v3170_v19, %v3169_v8  ;;  %v3070_v10 = vadd.f32 %v3069_v56, %v3068_v37  ;;  %v2449_v57 = vadd.f32 %v5853_v2, %v2184_v22  ;;  %v3073_v43 = vsel %vm401_vm1, %v2983_v27, 0.0 }
 0x1f2   : > { %v2716_v61 = vadd.f32 %v2669_v17, %v2447_v46  ;;  %3014 = vst.msk [vmem:[%s5878_s18 + $0xd0] sm:$0xff] %vm401_vm1, %v2982_v58  ;;  %v3071_v15 = vsel %vm401_vm1, %v2982_v58, 0.0  ;;  %v3117_v41 = vmul.f32 %v2982_v58, %v2982_v58  ;;  %v2985_v60 = vadd.f32 %v4348_v6, %v2717_v35  ;;  %v4351_v14 = vpop.f32.mrf.mxu0 }
 0x1f3   : > { %v4301_v1 = vpop.f32.mrf.mxu1  ;;  %v3072_v59 = vadd.f32 %v3071_v15, %v3070_v10  ;;  %v3173_v54 = vadd.f32 %v3172_v13, %v3171_v18  ;;  %v3176_v5 = vsel %vm401_vm1, %v3118_v21, 0.0 }
 0x1f4   : > { %v2984_v7 = vadd.f32 %v2937_v36, %v2716_v61  ;;  %v2719_v12 = vadd.f32 %v4301_v1, %v2450_v30  ;;  %v3174_v4 = vsel %vm401_vm1, %v3117_v41, 0.0  ;;  %3017 = vst.msk [vmem:[%s5878_s18 + $0xe8] sm:$0xff] %vm401_vm1, %v2985_v60  ;;  %v3120_v45 = vmul.f32 %v2985_v60, %v2985_v60  ;;  %v2947_v53 = vpop.f32.mrf.mxu0 }
 0x1f5   : > { %v2679_v24 = vpop.f32.mrf.mxu1  ;;  %v3175_v48 = vadd.f32 %v3174_v4, %v3173_v54  ;;  %v3074_v11 = vadd.f32 %v3073_v43, %v3072_v59  ;;  %v3077_v38 = vsel %vm401_vm1, %v2985_v60, 0.0 }
 0x1f6   : > { %3016 = vst.msk [vmem:[%s5878_s18 + $0xe0] sm:$0xff] %vm401_vm1, %v2984_v7  ;;  %v3075_v23 = vsel %vm401_vm1, %v2984_v7, 0.0  ;;  %v3119_v49 = vmul.f32 %v2984_v7, %v2984_v7  ;;  %v2987_v2 = vadd.f32 %v4351_v14, %v2719_v12  ;;  %v2718_v63 = vadd.f32 %v2679_v24, %v2449_v57 }
 0x1f7   : > { %v3076_v55 = vadd.f32 %v3075_v23, %v3074_v11  ;;  %v3177_v44 = vadd.f32 %v3176_v5, %v3175_v48  ;;  %v3180_v47 = vsel %vm401_vm1, %v3120_v45, 0.0 }
 0x1f8   : > { %v3178_v62 = vsel %vm401_vm1, %v3119_v49, 0.0  ;;  %3019 = vst.msk [vmem:[%s5878_s18 + $0xf8] sm:$0xff] %vm401_vm1, %v2987_v2  ;;  %v2986_v34 = vadd.f32 %v2947_v53, %v2718_v63  ;;  %v3122_v32 = vmul.f32 %v2987_v2, %v2987_v2  ;;  %v3081_v39 = vsel %vm401_vm1, %v2987_v2, 0.0 }
 0x1f9   : > { %v3179_v0 = vadd.f32 %v3178_v62, %v3177_v44  ;;  %v3078_v26 = vadd.f32 %v3077_v38, %v3076_v55 }
 0x1fa   : > { %3018 = vst.msk [vmem:[%s5878_s18 + $0xf0] sm:$0xff] %vm401_vm1, %v2986_v34  ;;  %v3079_v29 = vsel %vm401_vm1, %v2986_v34, 0.0  ;;  %v3121_v9 = vmul.f32 %v2986_v34, %v2986_v34  ;;  %v3184_v42 = vsel %vm401_vm1, %v3122_v32, 0.0 }
 0x1fb   : > { %v3080_v33 = vadd.f32 %v3079_v29, %v3078_v26  ;;  %v3181_v28 = vadd.f32 %v3180_v47, %v3179_v0 }
 0x1fc   : > { %v3182_v31 = vsel %vm401_vm1, %v3121_v9, 0.0 }
 0x1fd   : > { %v3082_v20 = vadd.f32 %v3081_v39, %v3080_v33  ;;  %v3183_v27 = vadd.f32 %v3182_v31, %v3181_v28 }
 0x1ff   : > { %v3083_v6 = vrot.slane %v3082_v20, 4  ;;  %v3185_v16 = vadd.f32 %v3184_v42, %v3183_v27 }
 0x201   : > { %v3084_v46 = vadd.f32 %v3083_v6, %v3082_v20  ;;  %v3186_v52 = vrot.slane %v3185_v16, 4 }
 0x203   : > { %v3085_v40 = vrot.slane %v3084_v46, 2  ;;  %v3187_v50 = vadd.f32 %v3186_v52, %v3185_v16 }
 0x205   : > { %v3086_v25 = vadd.f32 %v3085_v40, %v3084_v46  ;;  %v3188_v51 = vrot.slane %v3187_v50, 2 }
 0x207   : > { %v3087_v30 = vrot.slane %v3086_v25, 1  ;;  %v3189_v3 = vadd.f32 %v3188_v51, %v3187_v50 }
 0x209   : > { %v3088_v22 = vadd.f32 %v3087_v30, %v3086_v25  ;;  %v3190_v37 = vrot.slane %v3189_v3, 1 }
 0x20b   : > { %3090 = vst.msk [vmem:[%s211_s21] sm:$0x1] %vm3089_vm3, %v3088_v22  ;;  %v3191_v8 = vadd.f32 %v3190_v37, %v3189_v3 }
 0x20d   : > { %3192 = vst.msk [vmem:[%s214_s24] sm:$0x1] %vm3089_vm3, %v3191_v8 }
 0x20e PF: > { %s15_s15 = sadd.s32 1, %s4369_s15  }
 0x20f   : > { %p12_p4 = scmp.ge.s32.totalorder %s15_s15, 4  }
 0x211   :  { %14 = sbr.rel (!%p12_p4) target bundleno = 1 (0x1), region = 90 }

// kernel: basic_block_forward.4
= control target key start
LH: loop header
LB: loop body
LE: loop exit
PB: predicated region body
PF: predicated region fallthrough
CT: control target
= control target key end

     0   :  { %s5342_s21 = smov 0   ;;  %s6981_s0 = inlined_call_operand.vmem [shape: f32[2,256,8], index: 0, kind: input, shape index: {}]   ;;  %s6982_s1 = inlined_call_operand.vmem [shape: f32[1,8], index: 1, kind: input, shape index: {}]   ;;  %s6983_s2 = inlined_call_operand.vmem [shape: f32[1,8], index: 2, kind: input, shape index: {}]   ;;  %s6984_s3 = inlined_call_operand.vmem [shape: f32[9,8,8], index: 3, kind: input, shape index: {}]   ;;  %s6985_s4 = inlined_call_operand.vmem [shape: f32[2,256,8], index: 4, kind: output, shape index: {0}]   ;;  %s6986_s5 = inlined_call_operand.vmem [shape: f32[2,1,8], index: 5, kind: output, shape index: {1}]   ;;  %s6987_s6 = inlined_call_operand.vmem [shape: f32[2,1,8], index: 6, kind: output, shape index: {2}]  }
   0x1 LB: > { %s4229_s22 = sadd.s32 4294967295, %s5304_s21   ;;  %p4233_p0 = scmp.ge.s32.totalorder %s5304_s21, 1  ;;  %s5304_s21 = sphi %s5342_s21, %s17_s21  }
   0x2   : > { %p217_p1 = scmp.lt.s32.totalorder %s5304_s21, 3 }
   0x4   : > { %p218_p2 = pnand %p4233_p0, %p217_p1 }
   0x6   : > { %221 = sbr.rel (%p218_p2) target bundleno = 551 (0x227), region = 36 }
   0xb   : > { %v4240_v0 = vld [vmem:[%s6984_s3 + $0x8] sm:$0xff]  ;;  %vm411_vm0 = vcmask 64512   ;;  %p5355_p3 = scmp.lt.s32.totalorder %s4229_s22, 1  ;;  %v5306_v1 = vmov 0.0   ;;  %v5398_v2 = vld [vmem:[%s6984_s3] sm:$0xff]  ;;  %vm414_vm1 = vcmask 58368  }
   0xc   : > { %5287 = vmatprep.subr.mxu1 %v4240_v0  ;;  %4837 = vmatprep.subr.mxu0 %v4240_v0  ;;  %412 = vst.msk [vmem:[#allocation2] sm:$0xff] %vm411_vm0, %v5306_v1  ;;  %413 = vst.msk [vmem:[#allocation2 + $0x8] sm:$0xff] %vm411_vm0, %v5306_v1  ;;  %v4305_v3 = vld [vmem:[%s6984_s3 + $0x10] sm:$0xff]  ;;  %v5432_v4 = vld [vmem:[%s6982_s1] ss:$0 sm:$0xff]  ;;  %vm4020_vm2 = vcmask 57344  }
   0xd   : > { %416 = vst.msk [vmem:[#allocation2 + $0x18] sm:$0xff] %vm411_vm0, %v5306_v1  ;;  %417 = vst.msk [vmem:[#allocation2 + $0x20] sm:$0xff] %vm411_vm0, %v5306_v1  ;;  %5288 = vmatpush3.msra.mxu1 %v4240_v0  ;;  %4838 = vmatpush3.msra.mxu0 %v4240_v0  ;;  %s7193_s22 = smov (!%p5355_p3, %s4229_s22), 1  ;;  %v5444_v5 = vld [vmem:[%s6983_s2] ss:$0 sm:$0xff] }
   0xe   : > { %419 = vst.msk [vmem:[#allocation2 + $0x30] sm:$0xff] %vm411_vm0, %v5306_v1  ;;  %420 = vst.msk [vmem:[#allocation2 + $0x38] sm:$0xff] %vm411_vm0, %v5306_v1  ;;  %4887 = vmatprep.subr.mxu1 %v5398_v2  ;;  %4937 = vmatprep.subr.mxu0 %v4305_v3  ;;  %s4538_s30 = sshll.u32 %s7193_s22, 8  ;;  %v5468_v26 = vld [vmem:[%s6984_s3 + $0x20] sm:$0xff]  ;;  %s265_s9 = scalar_lea.vmem %s6986_s5, %s7193_s22 }
   0xf   : > { %422 = vst.msk [vmem:[#allocation2 + $0x48] sm:$0xff] %vm411_vm0, %v5306_v1  ;;  %423 = vst.msk [vmem:[#allocation2 + $0x50] sm:$0xff] %vm411_vm0, %v5306_v1  ;;  %s5439_s11 = scalar_lea.vmem %s6981_s0, %s4538_s30  ;;  %s6722_s7 = scalar_lea.vmem %s6985_s4, %s4538_s30 }
  0x10   : > { %425 = vst.msk [vmem:[#allocation2 + $0x60] sm:$0xff] %vm411_vm0, %v5306_v1  ;;  %426 = vst.msk [vmem:[#allocation2 + $0x68] sm:$0xff] %vm411_vm0, %v5306_v1  ;;  %v283_v6 = vld [vmem:[%s5439_s11 + $0x70] sm:$0xff]  ;;  %v284_v7 = vld [vmem:[%s5439_s11 + $0x78] sm:$0xff]  ;;  %s268_s12 = scalar_lea.vmem %s6987_s6, %s7193_s22 }
  0x11   : > { %428 = vst.msk [vmem:[#allocation2 + $0x78] sm:$0xff] %vm411_vm0, %v5306_v1  ;;  %429 = vst.msk [vmem:[#allocation2 + $0x80] sm:$0xff] %vm411_vm0, %v5306_v1  ;;  %v269_v8 = vld [vmem:[%s5439_s11] sm:$0xff]  ;;  %v322_v9 = vmul.f32 %v5432_v4, %v283_v6  ;;  %v323_v10 = vmul.f32 %v5432_v4, %v284_v7  ;;  %v270_v13 = vld [vmem:[%s5439_s11 + $0x8] sm:$0xff] }
  0x12   : > { %431 = vst.msk [vmem:[#allocation2 + $0x90] sm:$0xff] %vm411_vm0, %v5306_v1  ;;  %432 = vst.msk [vmem:[#allocation2 + $0x98] sm:$0xff] %vm411_vm0, %v5306_v1  ;;  %v308_v11 = vmul.f32 %v5432_v4, %v269_v8  ;;  %v285_v12 = vld [vmem:[%s5439_s11 + $0x80] sm:$0xff]  ;;  %v286_v14 = vld [vmem:[%s5439_s11 + $0x88] sm:$0xff]  ;;  %v309_v17 = vmul.f32 %v5432_v4, %v270_v13 }
  0x13   : > { %434 = vst.msk [vmem:[#allocation2 + $0xa8] sm:$0xff] %vm411_vm0, %v5306_v1  ;;  %435 = vst.msk [vmem:[#allocation2 + $0xb0] sm:$0xff] %vm411_vm0, %v5306_v1  ;;  %v533_v15 = vld [vmem:[#allocation2 + $0x1] sm:$0xff]  ;;  %v324_v16 = vmul.f32 %v5432_v4, %v285_v12  ;;  %v325_v18 = vmul.f32 %v5432_v4, %v286_v14  ;;  %v271_v19 = vld [vmem:[%s5439_s11 + $0x10] sm:$0xff]  ;;  %v361_v21 = vadd.f32 %v5444_v5, %v322_v9 }
  0x14   : > { %437 = vst.msk [vmem:[#allocation2 + $0xc0] sm:$0xff] %vm411_vm0, %v5306_v1  ;;  %438 = vst.msk [vmem:[#allocation2 + $0xc8] sm:$0xff] %vm411_vm0, %v5306_v1  ;;  %v287_v20 = vld [vmem:[%s5439_s11 + $0x90] sm:$0xff]  ;;  %4839 = vmatprep.mubr.msk.f32.mxu0 %vm411_vm0, %v533_v15  ;;  %v362_v23 = vadd.f32 %v5444_v5, %v323_v10  ;;  %v347_v24 = vadd.f32 %v5444_v5, %v308_v11  ;;  %v310_v25 = vmul.f32 %v5432_v4, %v271_v19  ;;  %v272_v31 = vld [vmem:[%s5439_s11 + $0x18] sm:$0xff] }
  0x15   : > { %440 = vst.msk [vmem:[#allocation2 + $0xd8] sm:$0xff] %vm411_vm0, %v5306_v1  ;;  %441 = vst.msk [vmem:[#allocation2 + $0xe0] sm:$0xff] %vm411_vm0, %v5306_v1  ;;  %v363_v27 = vadd.f32 %v5444_v5, %v324_v16  ;;  %v348_v28 = vadd.f32 %v5444_v5, %v309_v17  ;;  %v364_v29 = vadd.f32 %v5444_v5, %v325_v18  ;;  %v288_v32 = vld [vmem:[%s5439_s11 + $0x98] sm:$0xff]  ;;  %v273_v33 = vld [vmem:[%s5439_s11 + $0x20] sm:$0xff]  ;;  %v393_v34 = vmax.f32 %v361_v21, 0.0 }
  0x16   : > { %443 = vst.msk [vmem:[#allocation2 + $0xf0] sm:$0xff] %vm411_vm0, %v5306_v1  ;;  %444 = vst.msk [vmem:[#allocation2 + $0xf8] sm:$0xff] %vm411_vm0, %v5306_v1  ;;  %v326_v30 = vmul.f32 %v5432_v4, %v287_v20  ;;  %v394_v35 = vmax.f32 %v362_v23, 0.0  ;;  %v379_v36 = vmax.f32 %v347_v24, 0.0  ;;  %v349_v37 = vadd.f32 %v5444_v5, %v310_v25  ;;  %v289_v38 = vld [vmem:[%s5439_s11 + $0xa0] sm:$0xff]  ;;  %v274_v39 = vld [vmem:[%s5439_s11 + $0x28] sm:$0xff] }
  0x17   : > { %446 = vst.msk [vmem:[#allocation2 + $0x108] sm:$0xff] %vm411_vm0, %v5306_v1  ;;  %447 = vst.msk [vmem:[#allocation2 + $0x110] sm:$0xff] %vm411_vm0, %v5306_v1  ;;  %v290_v40 = vld [vmem:[%s5439_s11 + $0xa8] sm:$0xff]  ;;  %v395_v41 = vmax.f32 %v363_v27, 0.0  ;;  %v380_v42 = vmax.f32 %v348_v28, 0.0  ;;  %v396_v43 = vmax.f32 %v364_v29, 0.0  ;;  %v311_v47 = vmul.f32 %v5432_v4, %v272_v31 }
  0x18   : > { %449 = vst.msk [vmem:[#allocation2 + $0x120] sm:$0xff] %vm411_vm0, %v5306_v1  ;;  %450 = vst.msk [vmem:[#allocation2 + $0x128] sm:$0xff] %vm411_vm0, %v5306_v1  ;;  %v365_v44 = vadd.f32 %v5444_v5, %v326_v30  ;;  %v275_v45 = vld [vmem:[%s5439_s11 + $0x30] sm:$0xff]  ;;  %v381_v46 = vmax.f32 %v349_v37, 0.0  ;;  %v327_v48 = vmul.f32 %v5432_v4, %v288_v32  ;;  %v312_v49 = vmul.f32 %v5432_v4, %v273_v33  ;;  %v276_v63 = vld [vmem:[%s5439_s11 + $0x38] sm:$0xff] }
  0x19   : > { %452 = vst.msk [vmem:[#allocation2 + $0x138] sm:$0xff] %vm411_vm0, %v5306_v1  ;;  %453 = vst.msk [vmem:[#allocation2 + $0x140] sm:$0xff] %vm411_vm0, %v5306_v1  ;;  %v291_v50 = vld [vmem:[%s5439_s11 + $0xb0] sm:$0xff]  ;;  %v328_v52 = vmul.f32 %v5432_v4, %v289_v38  ;;  %v313_v53 = vmul.f32 %v5432_v4, %v274_v39  ;;  %v329_v54 = vmul.f32 %v5432_v4, %v290_v40  ;;  %v292_v0 = vld [vmem:[%s5439_s11 + $0xb8] sm:$0xff] }
  0x1a   : > { %455 = vst.msk [vmem:[#allocation2 + $0x150] sm:$0xff] %vm411_vm0, %v5306_v1  ;;  %456 = vst.msk [vmem:[#allocation2 + $0x158] sm:$0xff] %vm411_vm0, %v5306_v1  ;;  %v397_v51 = vmax.f32 %v365_v44, 0.0  ;;  %v350_v55 = vadd.f32 %v5444_v5, %v311_v47  ;;  %v366_v56 = vadd.f32 %v5444_v5, %v327_v48  ;;  %v351_v57 = vadd.f32 %v5444_v5, %v312_v49  ;;  %v293_v9 = vld [vmem:[%s5439_s11 + $0xc0] sm:$0xff]  ;;  %v278_v10 = vld [vmem:[%s5439_s11 + $0x48] sm:$0xff] }
  0x1b   : > { %458 = vst.msk [vmem:[#allocation2 + $0x168] sm:$0xff] %vm411_vm0, %v5306_v1  ;;  %459 = vst.msk [vmem:[#allocation2 + $0x170] sm:$0xff] %vm411_vm0, %v5306_v1  ;;  %v314_v58 = vmul.f32 %v5432_v4, %v275_v45  ;;  %v367_v59 = vadd.f32 %v5444_v5, %v328_v52  ;;  %v352_v60 = vadd.f32 %v5444_v5, %v313_v53  ;;  %v294_v11 = vld [vmem:[%s5439_s11 + $0xc8] sm:$0xff]  ;;  %v279_v20 = vld [vmem:[%s5439_s11 + $0x50] sm:$0xff] }
  0x1c   : > { %461 = vst.msk [vmem:[#allocation2 + $0x180] sm:$0xff] %vm411_vm0, %v5306_v1  ;;  %462 = vst.msk [vmem:[#allocation2 + $0x188] sm:$0xff] %vm411_vm0, %v5306_v1  ;;  %v368_v61 = vadd.f32 %v5444_v5, %v329_v54  ;;  %v330_v62 = vmul.f32 %v5432_v4, %v291_v50  ;;  %v398_v6 = vmax.f32 %v366_v56, 0.0  ;;  %v383_v7 = vmax.f32 %v351_v57, 0.0  ;;  %v295_v21 = vld [vmem:[%s5439_s11 + $0xd0] sm:$0xff]  ;;  %v280_v31 = vld [vmem:[%s5439_s11 + $0x58] sm:$0xff] }
  0x1d   : > { %464 = vst.msk [vmem:[#allocation2 + $0x198] sm:$0xff] %vm411_vm0, %v5306_v1  ;;  %465 = vst.msk [vmem:[#allocation2 + $0x1a0] sm:$0xff] %vm411_vm0, %v5306_v1  ;;  %v353_v8 = vadd.f32 %v5444_v5, %v314_v58  ;;  %v399_v12 = vmax.f32 %v367_v59, 0.0  ;;  %v384_v13 = vmax.f32 %v352_v60, 0.0  ;;  %v315_v17 = vmul.f32 %v5432_v4, %v276_v63  ;;  %v296_v37 = vld [vmem:[%s5439_s11 + $0xd8] sm:$0xff]  ;;  %v282_v49 = vld [vmem:[%s5439_s11 + $0x68] sm:$0xff] }
  0x1e   : > { %415 = vst.msk [vmem:[#allocation2 + $0x10] sm:$0x3] %vm414_vm1, %v5306_v1  ;;  %418 = vst.msk [vmem:[#allocation2 + $0x28] sm:$0x3] %vm414_vm1, %v5306_v1  ;;  %v400_v14 = vmax.f32 %v368_v61, 0.0  ;;  %v369_v15 = vadd.f32 %v5444_v5, %v330_v62  ;;  %v331_v18 = vmul.f32 %v5432_v4, %v292_v0  ;;  %v332_v28 = vmul.f32 %v5432_v4, %v293_v9  ;;  %v298_v50 = vld [vmem:[%s5439_s11 + $0xe8] sm:$0xff] }
  0x1f   : > { %421 = vst.msk [vmem:[#allocation2 + $0x40] sm:$0x3] %vm414_vm1, %v5306_v1  ;;  %424 = vst.msk [vmem:[#allocation2 + $0x58] sm:$0x3] %vm414_vm1, %v5306_v1  ;;  %v385_v16 = vmax.f32 %v353_v8, 0.0  ;;  %v317_v29 = vmul.f32 %v5432_v4, %v278_v10  ;;  %v333_v30 = vmul.f32 %v5432_v4, %v294_v11  ;;  %v318_v48 = vmul.f32 %v5432_v4, %v279_v20 }
  0x20   : > { %427 = vst.msk [vmem:[#allocation2 + $0x70] sm:$0x3] %vm414_vm1, %v5306_v1  ;;  %430 = vst.msk [vmem:[#allocation2 + $0x88] sm:$0x3] %vm414_vm1, %v5306_v1  ;;  %v401_v27 = vmax.f32 %v369_v15, 0.0  ;;  %v371_v39 = vadd.f32 %v5444_v5, %v332_v28  ;;  %v334_v54 = vmul.f32 %v5432_v4, %v295_v21  ;;  %v319_v56 = vmul.f32 %v5432_v4, %v280_v31 }
  0x21   : > { %433 = vst.msk [vmem:[#allocation2 + $0xa0] sm:$0x3] %vm414_vm1, %v5306_v1  ;;  %436 = vst.msk [vmem:[#allocation2 + $0xb8] sm:$0x3] %vm414_vm1, %v5306_v1  ;;  %v356_v40 = vadd.f32 %v5444_v5, %v317_v29  ;;  %v335_v57 = vmul.f32 %v5432_v4, %v296_v37  ;;  %v321_v63 = vmul.f32 %v5432_v4, %v282_v49 }
  0x22   : > { %439 = vst.msk [vmem:[#allocation2 + $0xd0] sm:$0x3] %vm414_vm1, %v5306_v1  ;;  %442 = vst.msk [vmem:[#allocation2 + $0xe8] sm:$0x3] %vm414_vm1, %v5306_v1  ;;  %v403_v52 = vmax.f32 %v371_v39, 0.0  ;;  %v373_v61 = vadd.f32 %v5444_v5, %v334_v54  ;;  %v337_v0 = vmul.f32 %v5432_v4, %v298_v50  ;;  %v501_v54 = vld [vmem:[#allocation2 + $0x8] sm:$0xff] }
  0x23   : > { %445 = vst.msk [vmem:[#allocation2 + $0x100] sm:$0x3] %vm414_vm1, %v5306_v1  ;;  %448 = vst.msk [vmem:[#allocation2 + $0x118] sm:$0x3] %vm414_vm1, %v5306_v1  ;;  %v388_v53 = vmax.f32 %v356_v40, 0.0 }
  0x24   : > { %451 = vst.msk [vmem:[#allocation2 + $0x130] sm:$0x3] %vm414_vm1, %v5306_v1  ;;  %454 = vst.msk [vmem:[#allocation2 + $0x148] sm:$0x3] %vm414_vm1, %v5306_v1  ;;  %v405_v11 = vmax.f32 %v373_v61, 0.0  ;;  %v5725_v61 = vld [vmem:[%s6984_s3 + $0x28] sm:$0xff] }
  0x25   : > { %457 = vst.msk [vmem:[#allocation2 + $0x160] sm:$0x3] %vm414_vm1, %v5306_v1  ;;  %460 = vst.msk [vmem:[#allocation2 + $0x178] sm:$0x3] %vm414_vm1, %v5306_v1  ;;  %v534_v22 = vld [vmem:[#allocation2 + $0x9] sm:$0xff] }
  0x26   : > { %463 = vst.msk [vmem:[#allocation2 + $0x190] sm:$0x3] %vm414_vm1, %v5306_v1  ;;  %466 = vst.msk [vmem:[#allocation2 + $0x1a8] sm:$0x3] %vm414_vm1, %v5306_v1  ;;  %4840 = vmatmul.mubr.msk.f32.vlgmr.msra.gmra.mxu0 %vm411_vm0, %v534_v22  ;;  %v277_v1 = vld [vmem:[%s5439_s11 + $0x40] sm:$0xff]  ;;  %v5527_v22 = vld [vmem:[%s6984_s3 + $0x18] sm:$0xff] }
  0x27   : > { %4938 = vmatpush3.msra.mxu0 %v4305_v3  ;;  %482 = vst.msk [vmem:[#allocation2 + $0xc1] sm:$0xff] %vm411_vm0, %v393_v34  ;;  %483 = vst.msk [vmem:[#allocation2 + $0xc9] sm:$0xff] %vm411_vm0, %v394_v35  ;;  %v382_v3 = vmax.f32 %v350_v55, 0.0  ;;  %v316_v19 = vmul.f32 %v5432_v4, %v277_v1  ;;  %v354_v34 = vadd.f32 %v5444_v5, %v315_v17  ;;  %v1210_v49 = vld [vmem:[#allocation2 + $0xa] sm:$0xff] }
  0x28   : > { %5037 = vmatprep.subr.mxu0 %v5468_v26  ;;  %468 = vst.msk [vmem:[#allocation2 + $0x19] sm:$0xff] %vm411_vm0, %v379_v36  ;;  %484 = vst.msk [vmem:[#allocation2 + $0xd9] sm:$0xff] %vm411_vm0, %v395_v41  ;;  %v370_v35 = vadd.f32 %v5444_v5, %v331_v18  ;;  %v372_v41 = vadd.f32 %v5444_v5, %v333_v30  ;;  %v357_v55 = vadd.f32 %v5444_v5, %v318_v48  ;;  %v500_v48 = vld [vmem:[#allocation2] sm:$0xff] }
  0x29   : > { %469 = vst.msk [vmem:[#allocation2 + $0x21] sm:$0xff] %vm411_vm0, %v380_v42  ;;  %485 = vst.msk [vmem:[#allocation2 + $0xe1] sm:$0xff] %vm411_vm0, %v396_v43  ;;  %v355_v36 = vadd.f32 %v5444_v5, %v316_v19  ;;  %v281_v42 = vld [vmem:[%s5439_s11 + $0x60] sm:$0xff]  ;;  %v386_v45 = vmax.f32 %v354_v34, 0.0 }
  0x2a   : > { %470 = vst.msk [vmem:[#allocation2 + $0x31] sm:$0xff] %vm411_vm0, %v381_v46  ;;  %486 = vst.msk [vmem:[#allocation2 + $0xf1] sm:$0xff] %vm411_vm0, %v397_v51  ;;  %v297_v43 = vld [vmem:[%s5439_s11 + $0xe0] sm:$0xff]  ;;  %v402_v46 = vmax.f32 %v370_v35, 0.0  ;;  %v320_v58 = vmul.f32 %v5432_v4, %v281_v42 }
  0x2b   : > { %471 = vst.msk [vmem:[#allocation2 + $0x39] sm:$0xff] %vm411_vm0, %v382_v3  ;;  %487 = vst.msk [vmem:[#allocation2 + $0xf9] sm:$0xff] %vm411_vm0, %v398_v6  ;;  %v387_v47 = vmax.f32 %v355_v36, 0.0  ;;  %v336_v62 = vmul.f32 %v5432_v4, %v297_v43  ;;  %v389_v3 = vmax.f32 %v357_v55, 0.0  ;;  %v358_v6 = vadd.f32 %v5444_v5, %v319_v56 }
  0x2c   : > { %472 = vst.msk [vmem:[#allocation2 + $0x49] sm:$0xff] %vm411_vm0, %v383_v7  ;;  %488 = vst.msk [vmem:[#allocation2 + $0x109] sm:$0xff] %vm411_vm0, %v399_v12  ;;  %v374_v7 = vadd.f32 %v5444_v5, %v335_v57  ;;  %v359_v8 = vadd.f32 %v5444_v5, %v320_v58 }
  0x2d   : > { %473 = vst.msk [vmem:[#allocation2 + $0x51] sm:$0xff] %vm411_vm0, %v384_v13  ;;  %489 = vst.msk [vmem:[#allocation2 + $0x111] sm:$0xff] %vm411_vm0, %v400_v14  ;;  %v375_v12 = vadd.f32 %v5444_v5, %v336_v62  ;;  %v360_v13 = vadd.f32 %v5444_v5, %v321_v63  ;;  %v376_v14 = vadd.f32 %v5444_v5, %v337_v0 }
  0x2e   : > { %v5529_v23 = vld [vmem:[#allocation2 + $0xc1] sm:$0xff]  ;;  %v5531_v24 = vld [vmem:[#allocation2 + $0xc9] sm:$0xff]  ;;  %474 = vst.msk [vmem:[#allocation2 + $0x61] sm:$0xff] %vm411_vm0, %v385_v16  ;;  %490 = vst.msk [vmem:[#allocation2 + $0x121] sm:$0xff] %vm411_vm0, %v401_v27  ;;  %v390_v16 = vmax.f32 %v358_v6, 0.0  ;;  %v406_v17 = vmax.f32 %v374_v7, 0.0 }
  0x2f   : > { %v5533_v25 = vld [vmem:[#allocation2 + $0x19] sm:$0xff]  ;;  %4863 = vmatprep.mubr.msk.f32.mxu1 %vm411_vm0, %v5529_v23  ;;  %475 = vst.msk [vmem:[#allocation2 + $0x69] sm:$0xff] %vm411_vm0, %v386_v45  ;;  %491 = vst.msk [vmem:[#allocation2 + $0x129] sm:$0xff] %vm411_vm0, %v402_v46  ;;  %v391_v18 = vmax.f32 %v359_v8, 0.0  ;;  %v407_v19 = vmax.f32 %v375_v12, 0.0  ;;  %v392_v20 = vmax.f32 %v360_v13, 0.0 }
  0x30   : > { %4842 = vmatprep.mubr.msk.f32.mxu0 %vm411_vm0, %v5533_v25  ;;  %v5546_v32 = vld [vmem:[#allocation2 + $0xd9] sm:$0xff]  ;;  %v5548_v33 = vld [vmem:[#allocation2 + $0x21] sm:$0xff]  ;;  %4864 = vmatmul.mubr.msk.f32.vlgmr.msra.gmra.mxu1 %vm411_vm0, %v5531_v24  ;;  %476 = vst.msk [vmem:[#allocation2 + $0x79] sm:$0xff] %vm411_vm0, %v387_v47  ;;  %492 = vst.msk [vmem:[#allocation2 + $0x139] sm:$0xff] %vm411_vm0, %v403_v52  ;;  %v408_v21 = vmax.f32 %v376_v14, 0.0 }
  0x31   : > { %4843 = vmatmul.mubr.msk.f32.gmra.mxu0 %vm411_vm0, %v5548_v33  ;;  %v5559_v38 = vld [vmem:[#allocation2 + $0x31] sm:$0xff]  ;;  %4888 = vmatpush3.msra.mxu1 %v5398_v2  ;;  %v5570_v44 = vld [vmem:[#allocation2 + $0xe1] sm:$0xff]  ;;  %v404_v2 = vmax.f32 %v372_v41, 0.0  ;;  %477 = vst.msk [vmem:[#allocation2 + $0x81] sm:$0xff] %vm411_vm0, %v388_v53  ;;  %478 = vst.msk [vmem:[#allocation2 + $0x91] sm:$0xff] %vm411_vm0, %v389_v3 }
  0x32   : > { %4866 = vmatprep.mubr.msk.f32.mxu1 %vm411_vm0, %v5546_v32  ;;  %4845 = vmatprep.mubr.msk.f32.mxu0 %vm411_vm0, %v5559_v38  ;;  %v5577_v51 = vld [vmem:[#allocation2 + $0xf1] sm:$0xff]  ;;  %v5590_v59 = vld [vmem:[#allocation2 + $0x39] sm:$0xff]  ;;  %494 = vst.msk [vmem:[#allocation2 + $0x151] sm:$0xff] %vm411_vm0, %v405_v11  ;;  %479 = vst.msk [vmem:[#allocation2 + $0x99] sm:$0xff] %vm411_vm0, %v390_v16 }
  0x33   : > { %4987 = vmatprep.subr.mxu1 %v5527_v22  ;;  %v5592_v60 = vld [vmem:[#allocation2 + $0x49] sm:$0xff]  ;;  %493 = vst.msk [vmem:[#allocation2 + $0x141] sm:$0xff] %vm411_vm0, %v404_v2  ;;  %v5605_v1 = vld [vmem:[#allocation2 + $0xf9] sm:$0xff]  ;;  %495 = vst.msk [vmem:[#allocation2 + $0x159] sm:$0xff] %vm411_vm0, %v406_v17 }
  0x34   : > { %4867 = vmatmul.mubr.msk.f32.gmra.mxu1 %vm411_vm0, %v5570_v44  ;;  %v5612_v9 = vld [vmem:[#allocation2 + $0x109] sm:$0xff]  ;;  %v5614_v10 = vld [vmem:[#allocation2 + $0x51] sm:$0xff]  ;;  %480 = vst.msk [vmem:[#allocation2 + $0xa9] sm:$0xff] %vm411_vm0, %v391_v18  ;;  %496 = vst.msk [vmem:[#allocation2 + $0x169] sm:$0xff] %vm411_vm0, %v407_v19 }
  0x35   : > { %4869 = vmatprep.mubr.msk.f32.mxu1 %vm411_vm0, %v5577_v51  ;;  %4846 = vmatmul.mubr.msk.f32.gmra.mxu0 %vm411_vm0, %v5590_v59  ;;  %v5619_v15 = vld [vmem:[#allocation2 + $0x61] sm:$0xff]  ;;  %v5629_v27 = vld [vmem:[#allocation2 + $0x111] sm:$0xff]  ;;  %481 = vst.msk [vmem:[#allocation2 + $0xb1] sm:$0xff] %vm411_vm0, %v392_v20  ;;  %497 = vst.msk [vmem:[#allocation2 + $0x171] sm:$0xff] %vm411_vm0, %v408_v21 }
  0x36   : > { %4848 = vmatprep.mubr.msk.f32.mxu0 %vm411_vm0, %v5592_v60  ;;  %v5636_v28 = vld [vmem:[#allocation2 + $0x121] sm:$0xff]  ;;  %v5638_v29 = vld [vmem:[#allocation2 + $0x69] sm:$0xff]  ;;  %v300_v2 = vld [vmem:[%s5439_s11 + $0xf8] sm:$0xff] }
  0x37   : > { %v5643_v30 = vld [vmem:[#allocation2 + $0x79] sm:$0xff]  ;;  %v5651_v31 = vld [vmem:[#allocation2 + $0x129] sm:$0xff]  ;;  %v339_v56 = vmul.f32 %v5432_v4, %v300_v2 }
  0x38   : > { %4870 = vmatmul.mubr.msk.f32.gmra.mxu1 %vm411_vm0, %v5605_v1  ;;  %v5655_v34 = vld [vmem:[#allocation2 + $0x139] sm:$0xff]  ;;  %v5657_v35 = vld [vmem:[#allocation2 + $0x81] sm:$0xff]  ;;  %v5659_v36 = vld [vmem:[#allocation2 + $0x91] sm:$0xff] }
  0x39   : > { %4872 = vmatprep.mubr.msk.f32.mxu1 %vm411_vm0, %v5612_v9  ;;  %4849 = vmatmul.mubr.msk.f32.gmra.mxu0 %vm411_vm0, %v5614_v10  ;;  %v5671_v39 = vld [vmem:[#allocation2 + $0x151] sm:$0xff]  ;;  %v5673_v40 = vld [vmem:[#allocation2 + $0x99] sm:$0xff]  ;;  %v1209_v46 = vld [vmem:[#allocation2 + $0x2] sm:$0xff] }
  0x3a   : > { %4851 = vmatprep.mubr.msk.f32.mxu0 %vm411_vm0, %v5619_v15  ;;  %v5667_v37 = vld [vmem:[#allocation2 + $0x141] sm:$0xff]  ;;  %v5683_v42 = vld [vmem:[#allocation2 + $0x159] sm:$0xff]  ;;  %v5707_v52 = vld [vmem:[%s6984_s3 + $0x30] sm:$0xff] }
  0x3b   : > { %v5675_v41 = vld [vmem:[#allocation2 + $0xa9] sm:$0xff]  ;;  %v5700_v50 = vld [vmem:[#allocation2 + $0x1a] sm:$0xff]  ;;  %v5763_v11 = vld [vmem:[#allocation2 + $0x52] sm:$0xff] }
  0x3c   : > { %4873 = vmatmul.mubr.msk.f32.gmra.mxu1 %vm411_vm0, %v5629_v27  ;;  %v5687_v43 = vld [vmem:[#allocation2 + $0x169] sm:$0xff]  ;;  %v5689_v45 = vld [vmem:[#allocation2 + $0xb1] sm:$0xff]  ;;  %7043 = vst [vmem:[#allocation4_spill] sm:$0xff] %v5700_v50  ;;  %v5736_v63 = vld [vmem:[#allocation2 + $0x20] sm:$0xff] }
  0x3d   : > { %4875 = vmatprep.mubr.msk.f32.mxu1 %vm411_vm0, %v5636_v28  ;;  %4852 = vmatmul.mubr.msk.f32.gmra.mxu0 %vm411_vm0, %v5638_v29  ;;  %v5697_v47 = vld [vmem:[#allocation2 + $0x171] sm:$0xff]  ;;  %v5720_v58 = vld [vmem:[#allocation2 + $0x22] sm:$0xff]  ;;  %7048 = vst [vmem:[#allocation9_spill] sm:$0xff] %v5763_v11  ;;  %v5783_v17 = vld [vmem:[#allocation2 + $0x7a] sm:$0xff] }
  0x3e   : > { %4854 = vmatprep.mubr.msk.f32.mxu0 %vm411_vm0, %v5643_v30  ;;  %7042 = vst [vmem:[#allocation3_spill] sm:$0xff] %v5697_v47  ;;  %v299_v53 = vld [vmem:[%s5439_s11 + $0xf0] sm:$0xff]  ;;  %v5716_v57 = vld [vmem:[#allocation2 + $0x18] sm:$0xff]  ;;  %7044 = vst [vmem:[#allocation5_spill] sm:$0xff] %v5720_v58 }
  0x3f   : > { %v338_v55 = vmul.f32 %v5432_v4, %v299_v53  ;;  %v378_v4 = vadd.f32 %v5444_v5, %v339_v56  ;;  %v5740_v6 = vld [vmem:[#allocation2 + $0x30] sm:$0xff]  ;;  %v5755_v7 = vld [vmem:[#allocation2 + $0x38] sm:$0xff]  ;;  %v5759_v8 = vld [vmem:[#allocation2 + $0x48] sm:$0xff]  ;;  %7051 = vst [vmem:[#allocation12_spill] sm:$0xff] %v5783_v17 }
  0x40   : > { %4876 = vmatmul.mubr.msk.f32.gmra.mxu1 %vm411_vm0, %v5651_v31  ;;  %v5767_v12 = vld [vmem:[#allocation2 + $0x62] sm:$0xff]  ;;  %v5771_v13 = vld [vmem:[#allocation2 + $0x50] sm:$0xff]  ;;  %v5791_v19 = vld [vmem:[#allocation2 + $0x78] sm:$0xff] }
  0x41   : > { %4878 = vmatprep.mubr.msk.f32.mxu1 %vm411_vm0, %v5655_v34  ;;  %4855 = vmatmul.mubr.msk.f32.gmra.mxu0 %vm411_vm0, %v5657_v35  ;;  %v377_v62 = vadd.f32 %v5444_v5, %v338_v55  ;;  %v410_v3 = vmax.f32 %v378_v4, 0.0  ;;  %v5745_v5 = vld [vmem:[#allocation2 + $0x3a] sm:$0xff]  ;;  %7049 = vst [vmem:[#allocation10_spill] sm:$0xff] %v5767_v12  ;;  %v5779_v16 = vld [vmem:[#allocation2 + $0x6a] sm:$0xff]  ;;  %v5795_v20 = vld [vmem:[#allocation2 + $0x82] sm:$0xff] }
  0x42   : > { %4857 = vmatprep.mubr.msk.f32.mxu0 %vm411_vm0, %v5659_v36  ;;  %7046 = vst [vmem:[#allocation7_spill] sm:$0xff] %v5745_v5  ;;  %v5775_v14 = vld [vmem:[#allocation2 + $0x60] sm:$0xff]  ;;  %7050 = vst [vmem:[#allocation11_spill] sm:$0xff] %v5779_v16  ;;  %v5787_v18 = vld [vmem:[#allocation2 + $0x68] sm:$0xff] }
  0x43   : > { %v409_v0 = vmax.f32 %v377_v62, 0.0  ;;  %499 = vst.msk [vmem:[#allocation2 + $0x189] sm:$0xff] %vm411_vm0, %v410_v3  ;;  %7052 = vst [vmem:[#allocation13_spill] sm:$0xff] %v5795_v20  ;;  %v5799_v21 = vld [vmem:[#allocation2 + $0x92] sm:$0xff]  ;;  %v5815_v53 = vld [vmem:[#allocation2 + $0xaa] sm:$0xff] }
  0x44   : > { %4879 = vmatmul.mubr.msk.f32.gmra.mxu1 %vm411_vm0, %v5667_v37  ;;  %7053 = vst [vmem:[#allocation14_spill] sm:$0xff] %v5799_v21  ;;  %7055 = vst [vmem:[#allocation16_spill] sm:$0xff] %v5815_v53  ;;  %v5819_v2 = vld [vmem:[#allocation2 + $0x98] sm:$0xff]  ;;  %v5831_v56 = vld [vmem:[#allocation2 + $0xc2] sm:$0xff] }
  0x45   : > { %4881 = vmatprep.mubr.msk.f32.mxu1 %vm411_vm0, %v5671_v39  ;;  %4858 = vmatmul.mubr.msk.f32.gmra.mxu0 %vm411_vm0, %v5673_v40  ;;  %498 = vst.msk [vmem:[#allocation2 + $0x181] sm:$0xff] %vm411_vm0, %v409_v0  ;;  %v5827_v55 = vld [vmem:[#allocation2 + $0xb2] sm:$0xff]  ;;  %7057 = vst [vmem:[#allocation18_spill] sm:$0xff] %v5831_v56  ;;  %v5839_v4 = vld [vmem:[#allocation2 + $0xc0] sm:$0xff] }
  0x46   : > { %4860 = vmatprep.mubr.msk.f32.mxu0 %vm411_vm0, %v5675_v41  ;;  %7056 = vst [vmem:[#allocation17_spill] sm:$0xff] %v5827_v55  ;;  %v5835_v62 = vld [vmem:[#allocation2 + $0xb0] sm:$0xff]  ;;  %v5847_v3 = vld [vmem:[#allocation2 + $0xda] sm:$0xff] }
  0x47   : > { %v5843_v0 = vld [vmem:[#allocation2 + $0xca] sm:$0xff]  ;;  %7059 = vst [vmem:[#allocation20_spill] sm:$0xff] %v5847_v3 }
  0x48   : > { %4882 = vmatmul.mubr.msk.f32.gmra.mxu1 %vm411_vm0, %v5683_v42  ;;  %7058 = vst [vmem:[#allocation19_spill] sm:$0xff] %v5843_v0 }
  0x49   : > { %4884 = vmatprep.mubr.msk.f32.mxu1 %vm411_vm0, %v5687_v43  ;;  %4861 = vmatmul.mubr.msk.f32.gmra.mxu0 %vm411_vm0, %v5689_v45 }
  0x4a   : > { %4939 = vmatprep.mubr.msk.f32.mxu0 %vm411_vm0, %v1209_v46  ;;  %v5803_v46 = vld [vmem:[#allocation2 + $0x80] sm:$0xff] }
  0x4c   : > { %4885 = vmatmul.mubr.msk.f32.gmra.mxu1 %vm411_vm0, %v5697_v47  ;;  %v5961_v47 = vld [vmem:[#allocation2 + $0x170] sm:$0xff] }
  0x4d   : > { %4889 = vmatprep.mubr.msk.f32.mxu1 %vm411_vm0, %v500_v48  ;;  %4940 = vmatmul.mubr.msk.f32.vlgmr.msra.gmra.mxu0 %vm411_vm0, %v1210_v49  ;;  %v5807_v48 = vld [vmem:[#allocation2 + $0x90] sm:$0xff]  ;;  %v5811_v49 = vld [vmem:[#allocation2 + $0x9a] sm:$0xff] }
  0x4e   : > { %5038 = vmatpush3.msra.mxu0 %v5468_v26  ;;  %4942 = vmatprep.mubr.msk.f32.mxu0 %vm411_vm0, %v5700_v50  ;;  %v5731_v26 = vld [vmem:[#allocation2 + $0x32] sm:$0xff]  ;;  %7054 = vst [vmem:[#allocation15_spill] sm:$0xff] %v5811_v49 }
  0x4f   : > { %5137 = vmatprep.subr.mxu0 %v5707_v52  ;;  %7045 = vst [vmem:[#allocation6_spill] sm:$0xff] %v5731_v26  ;;  %v5947_v50 = vld [vmem:[#allocation2 + $0x158] sm:$0xff] }
  0x50   : > { %4890 = vmatmul.mubr.msk.f32.vlgmr.msra.gmra.mxu1 %vm411_vm0, %v501_v54  ;;  %v5823_v54 = vld [vmem:[#allocation2 + $0xa8] sm:$0xff] }
  0x51   : > { %4988 = vmatpush3.msra.mxu1 %v5527_v22  ;;  %4892 = vmatprep.mubr.msk.f32.mxu1 %vm411_vm0, %v5716_v57  ;;  %v5751_v22 = vld [vmem:[#allocation2 + $0x4a] sm:$0xff] }
  0x52   : > { %4943 = vmatmul.mubr.msk.f32.gmra.mxu0 %vm411_vm0, %v5720_v58  ;;  %5087 = vmatprep.subr.mxu1 %v5725_v61  ;;  %7047 = vst [vmem:[#allocation8_spill] sm:$0xff] %v5751_v22  ;;  %v5943_v58 = vld [vmem:[#allocation2 + $0x16a] sm:$0xff] }
  0x53   : > { %4945 = vmatprep.mubr.msk.f32.mxu0 %vm411_vm0, %v5731_v26  ;;  %v5931_v26 = vld [vmem:[#allocation2 + $0x140] sm:$0xff]  ;;  %7070 = vst [vmem:[#allocation31_spill] sm:$0xff] %v5943_v58 }
  0x54   : > { %4893 = vmatmul.mubr.msk.f32.gmra.mxu1 %vm411_vm0, %v5736_v63 }
  0x55   : > { %4895 = vmatprep.mubr.msk.f32.mxu1 %vm411_vm0, %v5740_v6 }
  0x56   : > { %4946 = vmatmul.mubr.msk.f32.gmra.mxu0 %vm411_vm0, %v5745_v5  ;;  %v5927_v5 = vld [vmem:[#allocation2 + $0x152] sm:$0xff] }
  0x57   : > { %4948 = vmatprep.mubr.msk.f32.mxu0 %vm411_vm0, %v5751_v22  ;;  %v5915_v22 = vld [vmem:[#allocation2 + $0x128] sm:$0xff]  ;;  %7069 = vst [vmem:[#allocation30_spill] sm:$0xff] %v5927_v5 }
  0x58   : > { %4896 = vmatmul.mubr.msk.f32.gmra.mxu1 %vm411_vm0, %v5755_v7 }
  0x59   : > { %4898 = vmatprep.mubr.msk.f32.mxu1 %vm411_vm0, %v5759_v8 }
  0x5a   : > { %4949 = vmatmul.mubr.msk.f32.gmra.mxu0 %vm411_vm0, %v5763_v11  ;;  %v5911_v11 = vld [vmem:[#allocation2 + $0x13a] sm:$0xff] }
  0x5b   : > { %4951 = vmatprep.mubr.msk.f32.mxu0 %vm411_vm0, %v5767_v12  ;;  %v5899_v12 = vld [vmem:[#allocation2 + $0x110] sm:$0xff]  ;;  %7067 = vst [vmem:[#allocation28_spill] sm:$0xff] %v5911_v11 }
  0x5c   : > { %4899 = vmatmul.mubr.msk.f32.gmra.mxu1 %vm411_vm0, %v5771_v13 }
  0x5d   : > { %4901 = vmatprep.mubr.msk.f32.mxu1 %vm411_vm0, %v5775_v14 }
  0x5e   : > { %4952 = vmatmul.mubr.msk.f32.gmra.mxu0 %vm411_vm0, %v5779_v16  ;;  %v5895_v16 = vld [vmem:[#allocation2 + $0x122] sm:$0xff] }
  0x5f   : > { %4954 = vmatprep.mubr.msk.f32.mxu0 %vm411_vm0, %v5783_v17  ;;  %v5883_v17 = vld [vmem:[#allocation2 + $0xf8] sm:$0xff]  ;;  %7065 = vst [vmem:[#allocation26_spill] sm:$0xff] %v5895_v16 }
  0x60   : > { %4902 = vmatmul.mubr.msk.f32.gmra.mxu1 %vm411_vm0, %v5787_v18 }
  0x61   : > { %4904 = vmatprep.mubr.msk.f32.mxu1 %vm411_vm0, %v5791_v19 }
  0x62   : > { %4955 = vmatmul.mubr.msk.f32.gmra.mxu0 %vm411_vm0, %v5795_v20  ;;  %v5879_v20 = vld [vmem:[#allocation2 + $0x10a] sm:$0xff] }
  0x63   : > { %4957 = vmatprep.mubr.msk.f32.mxu0 %vm411_vm0, %v5799_v21  ;;  %v5867_v21 = vld [vmem:[#allocation2 + $0xe0] sm:$0xff]  ;;  %7063 = vst [vmem:[#allocation24_spill] sm:$0xff] %v5879_v20 }
  0x64   : > { %4905 = vmatmul.mubr.msk.f32.gmra.mxu1 %vm411_vm0, %v5803_v46 }
  0x65   : > { %4907 = vmatprep.mubr.msk.f32.mxu1 %vm411_vm0, %v5807_v48 }
  0x66   : > { %4958 = vmatmul.mubr.msk.f32.gmra.mxu0 %vm411_vm0, %v5811_v49  ;;  %v5863_v49 = vld [vmem:[#allocation2 + $0xf2] sm:$0xff] }
  0x67   : > { %4960 = vmatprep.mubr.msk.f32.mxu0 %vm411_vm0, %v5815_v53  ;;  %v5851_v53 = vld [vmem:[#allocation2 + $0xc8] sm:$0xff]  ;;  %7061 = vst [vmem:[#allocation22_spill] sm:$0xff] %v5863_v49 }
  0x68   : > { %4908 = vmatmul.mubr.msk.f32.gmra.mxu1 %vm411_vm0, %v5819_v2 }
  0x69   : > { %4910 = vmatprep.mubr.msk.f32.mxu1 %vm411_vm0, %v5823_v54 }
  0x6a   : > { %4961 = vmatmul.mubr.msk.f32.gmra.mxu0 %vm411_vm0, %v5827_v55  ;;  %v5855_v55 = vld [vmem:[#allocation2 + $0xd8] sm:$0xff] }
  0x6b   : > { %4963 = vmatprep.mubr.msk.f32.mxu0 %vm411_vm0, %v5831_v56  ;;  %v5859_v56 = vld [vmem:[#allocation2 + $0xe2] sm:$0xff] }
  0x6c   : > { %4911 = vmatmul.mubr.msk.f32.gmra.mxu1 %vm411_vm0, %v5835_v62  ;;  %7060 = vst [vmem:[#allocation21_spill] sm:$0xff] %v5859_v56 }
  0x6d   : > { %4913 = vmatprep.mubr.msk.f32.mxu1 %vm411_vm0, %v5839_v4 }
  0x6e   : > { %4964 = vmatmul.mubr.msk.f32.gmra.mxu0 %vm411_vm0, %v5843_v0  ;;  %v5871_v0 = vld [vmem:[#allocation2 + $0xf0] sm:$0xff] }
  0x6f   : > { %4966 = vmatprep.mubr.msk.f32.mxu0 %vm411_vm0, %v5847_v3  ;;  %v5875_v3 = vld [vmem:[#allocation2 + $0xfa] sm:$0xff] }
  0x70   : > { %4914 = vmatmul.mubr.msk.f32.gmra.mxu1 %vm411_vm0, %v5851_v53  ;;  %7062 = vst [vmem:[#allocation23_spill] sm:$0xff] %v5875_v3 }
  0x71   : > { %4916 = vmatprep.mubr.msk.f32.mxu1 %vm411_vm0, %v5855_v55 }
  0x72   : > { %4967 = vmatmul.mubr.msk.f32.gmra.mxu0 %vm411_vm0, %v5859_v56  ;;  %v5887_v56 = vld [vmem:[#allocation2 + $0x108] sm:$0xff] }
  0x73   : > { %4969 = vmatprep.mubr.msk.f32.mxu0 %vm411_vm0, %v5863_v49  ;;  %v5891_v49 = vld [vmem:[#allocation2 + $0x112] sm:$0xff] }
  0x74   : > { %4917 = vmatmul.mubr.msk.f32.gmra.mxu1 %vm411_vm0, %v5867_v21  ;;  %7064 = vst [vmem:[#allocation25_spill] sm:$0xff] %v5891_v49 }
  0x75   : > { %4919 = vmatprep.mubr.msk.f32.mxu1 %vm411_vm0, %v5871_v0 }
  0x76   : > { %4970 = vmatmul.mubr.msk.f32.gmra.mxu0 %vm411_vm0, %v5875_v3  ;;  %v5903_v3 = vld [vmem:[#allocation2 + $0x120] sm:$0xff] }
  0x77   : > { %4972 = vmatprep.mubr.msk.f32.mxu0 %vm411_vm0, %v5879_v20  ;;  %v5907_v20 = vld [vmem:[#allocation2 + $0x12a] sm:$0xff] }
  0x78   : > { %4920 = vmatmul.mubr.msk.f32.gmra.mxu1 %vm411_vm0, %v5883_v17  ;;  %7066 = vst [vmem:[#allocation27_spill] sm:$0xff] %v5907_v20 }
  0x79   : > { %4922 = vmatprep.mubr.msk.f32.mxu1 %vm411_vm0, %v5887_v56 }
  0x7a   : > { %4973 = vmatmul.mubr.msk.f32.gmra.mxu0 %vm411_vm0, %v5891_v49  ;;  %v5919_v49 = vld [vmem:[#allocation2 + $0x138] sm:$0xff] }
  0x7b   : > { %4975 = vmatprep.mubr.msk.f32.mxu0 %vm411_vm0, %v5895_v16  ;;  %v5923_v16 = vld [vmem:[#allocation2 + $0x142] sm:$0xff] }
  0x7c   : > { %4923 = vmatmul.mubr.msk.f32.gmra.mxu1 %vm411_vm0, %v5899_v12  ;;  %7068 = vst [vmem:[#allocation29_spill] sm:$0xff] %v5923_v16 }
  0x7d   : > { %4925 = vmatprep.mubr.msk.f32.mxu1 %vm411_vm0, %v5903_v3 }
  0x7e   : > { %4976 = vmatmul.mubr.msk.f32.gmra.mxu0 %vm411_vm0, %v5907_v20  ;;  %v5935_v20 = vld [vmem:[#allocation2 + $0x150] sm:$0xff] }
  0x7f   : > { %4978 = vmatprep.mubr.msk.f32.mxu0 %vm411_vm0, %v5911_v11  ;;  %v5939_v11 = vld [vmem:[#allocation2 + $0x15a] sm:$0xff] }
  0x80   : > { %4926 = vmatmul.mubr.msk.f32.gmra.mxu1 %vm411_vm0, %v5915_v22 }
  0x81   : > { %4928 = vmatprep.mubr.msk.f32.mxu1 %vm411_vm0, %v5919_v49 }
  0x82   : > { %4979 = vmatmul.mubr.msk.f32.gmra.mxu0 %vm411_vm0, %v5923_v16  ;;  %v5951_v16 = vld [vmem:[#allocation2 + $0x168] sm:$0xff] }
  0x83   : > { %4981 = vmatprep.mubr.msk.f32.mxu0 %vm411_vm0, %v5927_v5  ;;  %v5955_v5 = vld [vmem:[#allocation2 + $0x172] sm:$0xff] }
  0x84   : > { %4929 = vmatmul.mubr.msk.f32.gmra.mxu1 %vm411_vm0, %v5931_v26 }
  0x85   : > { %4931 = vmatprep.mubr.msk.f32.mxu1 %vm411_vm0, %v5935_v20 }
  0x86   : > { %4982 = vmatmul.mubr.msk.f32.gmra.mxu0 %vm411_vm0, %v5939_v11 }
  0x87   : > { %4984 = vmatprep.mubr.msk.f32.mxu0 %vm411_vm0, %v5943_v58  ;;  %v5974_v58 = vld [vmem:[%s6984_s3 + $0x40] sm:$0xff] }
  0x88   : > { %4932 = vmatmul.mubr.msk.f32.gmra.mxu1 %vm411_vm0, %v5947_v50 }
  0x89   : > { %4934 = vmatprep.mubr.msk.f32.mxu1 %vm411_vm0, %v5951_v16 }
  0x8a   : > { %4985 = vmatmul.mubr.msk.f32.gmra.mxu0 %vm411_vm0, %v5955_v5 }
  0x8b   : > { %5039 = vmatprep.mubr.msk.f32.mxu0 %vm411_vm0, %v5533_v25  ;;  %v5984_v25 = vld [vmem:[%s6984_s3 + $0x38] sm:$0xff] }
  0x8c   : > { %4935 = vmatmul.mubr.msk.f32.gmra.mxu1 %vm411_vm0, %v5961_v47 }
  0x8d   : > { %4989 = vmatprep.mubr.msk.f32.mxu1 %vm411_vm0, %v5716_v57 }
  0x8e   : > { %5040 = vmatmul.mubr.msk.f32.vlgmr.msra.gmra.mxu0 %vm411_vm0, %v5548_v33  ;;  %v6105_v33 = vld [vmem:[#allocation2 + $0x189] sm:$0xff] }
  0x8f   : > { %5138 = vmatpush3.msra.mxu0 %v5707_v52  ;;  %5042 = vmatprep.mubr.msk.f32.mxu0 %vm411_vm0, %v5559_v38  ;;  %v6111_v38 = vld [vmem:[#allocation2 + $0x188] sm:$0xff] }
  0x90   : > { %4990 = vmatmul.mubr.msk.f32.vlgmr.msra.gmra.mxu1 %vm411_vm0, %v5736_v63  ;;  %5237 = vmatprep.subr.mxu0 %v5974_v58  ;;  %v7093_v63 = vld [vmem:[#allocation24_spill] sm:$0xff] }
  0x91   : > { %5088 = vmatpush3.msra.mxu1 %v5725_v61  ;;  %4992 = vmatprep.mubr.msk.f32.mxu1 %vm411_vm0, %v5740_v6  ;;  %v7092_v61 = vld [vmem:[#allocation23_spill] sm:$0xff] }
  0x92   : > { %5043 = vmatmul.mubr.msk.f32.gmra.mxu0 %vm411_vm0, %v5590_v59  ;;  %5187 = vmatprep.subr.mxu1 %v5984_v25  ;;  %v7075_v59 = vld [vmem:[#allocation6_spill] sm:$0xff] }
  0x93   : > { %5045 = vmatprep.mubr.msk.f32.mxu0 %vm411_vm0, %v5592_v60  ;;  %v7076_v60 = vld [vmem:[#allocation7_spill] sm:$0xff] }
  0x94   : > { %4993 = vmatmul.mubr.msk.f32.gmra.mxu1 %vm411_vm0, %v5755_v7 }
  0x95   : > { %4995 = vmatprep.mubr.msk.f32.mxu1 %vm411_vm0, %v5759_v8 }
  0x96   : > { %5046 = vmatmul.mubr.msk.f32.gmra.mxu0 %vm411_vm0, %v5614_v10  ;;  %v7079_v10 = vld [vmem:[#allocation10_spill] sm:$0xff] }
  0x97   : > { %5048 = vmatprep.mubr.msk.f32.mxu0 %vm411_vm0, %v5619_v15  ;;  %v7080_v15 = vld [vmem:[#allocation11_spill] sm:$0xff] }
  0x98   : > { %4996 = vmatmul.mubr.msk.f32.gmra.mxu1 %vm411_vm0, %v5771_v13 }
  0x99   : > { %4998 = vmatprep.mubr.msk.f32.mxu1 %vm411_vm0, %v5775_v14 }
  0x9a   : > { %5049 = vmatmul.mubr.msk.f32.gmra.mxu0 %vm411_vm0, %v5638_v29  ;;  %v7083_v29 = vld [vmem:[#allocation14_spill] sm:$0xff] }
  0x9b   : > { %5051 = vmatprep.mubr.msk.f32.mxu0 %vm411_vm0, %v5643_v30  ;;  %v7084_v30 = vld [vmem:[#allocation15_spill] sm:$0xff] }
  0x9c   : > { %4999 = vmatmul.mubr.msk.f32.gmra.mxu1 %vm411_vm0, %v5787_v18 }
  0x9d   : > { %5001 = vmatprep.mubr.msk.f32.mxu1 %vm411_vm0, %v5791_v19 }
  0x9e   : > { %5052 = vmatmul.mubr.msk.f32.gmra.mxu0 %vm411_vm0, %v5657_v35 }
  0x9f   : > { %5054 = vmatprep.mubr.msk.f32.mxu0 %vm411_vm0, %v5659_v36  ;;  %v7087_v36 = vld [vmem:[#allocation18_spill] sm:$0xff] }
  0xa0   : > { %5002 = vmatmul.mubr.msk.f32.gmra.mxu1 %vm411_vm0, %v5803_v46 }
  0xa1   : > { %5004 = vmatprep.mubr.msk.f32.mxu1 %vm411_vm0, %v5807_v48 }
  0xa2   : > { %5055 = vmatmul.mubr.msk.f32.gmra.mxu0 %vm411_vm0, %v5673_v40  ;;  %v7089_v40 = vld [vmem:[#allocation20_spill] sm:$0xff] }
  0xa3   : > { %5057 = vmatprep.mubr.msk.f32.mxu0 %vm411_vm0, %v5675_v41 }
  0xa4   : > { %5005 = vmatmul.mubr.msk.f32.gmra.mxu1 %vm411_vm0, %v5819_v2 }
  0xa5   : > { %5007 = vmatprep.mubr.msk.f32.mxu1 %vm411_vm0, %v5823_v54 }
  0xa6   : > { %5058 = vmatmul.mubr.msk.f32.gmra.mxu0 %vm411_vm0, %v5689_v45  ;;  %v7091_v45 = vld [vmem:[#allocation22_spill] sm:$0xff] }
  0xa7   : > { %5060 = vmatprep.mubr.msk.f32.mxu0 %vm411_vm0, %v5529_v23  ;;  %v6095_v23 = vld [vmem:[#allocation2 + $0x181] sm:$0xff] }
  0xa8   : > { %5008 = vmatmul.mubr.msk.f32.gmra.mxu1 %vm411_vm0, %v5835_v62 }
  0xa9   : > { %5010 = vmatprep.mubr.msk.f32.mxu1 %vm411_vm0, %v5839_v4 }
  0xaa   : > { %5061 = vmatmul.mubr.msk.f32.gmra.mxu0 %vm411_vm0, %v5531_v24  ;;  %v7071_v24 = vld [vmem:[#allocation3_spill] sm:$0xff] }
  0xab   : > { %5063 = vmatprep.mubr.msk.f32.mxu0 %vm411_vm0, %v5546_v32  ;;  %v6101_v32 = vld [vmem:[#allocation2 + $0x180] sm:$0xff]  ;;  %7072 = vst [vmem:[#allocation3_spill] sm:$0xff] %v6105_v33 }
  0xac   : > { %5011 = vmatmul.mubr.msk.f32.gmra.mxu1 %vm411_vm0, %v5851_v53 }
  0xad   : > { %5013 = vmatprep.mubr.msk.f32.mxu1 %vm411_vm0, %v5855_v55 }
  0xae   : > { %5064 = vmatmul.mubr.msk.f32.gmra.mxu0 %vm411_vm0, %v5570_v44  ;;  %v7073_v44 = vld [vmem:[#allocation4_spill] sm:$0xff] }
  0xaf   : > { %5066 = vmatprep.mubr.msk.f32.mxu0 %vm411_vm0, %v5577_v51  ;;  %v7074_v51 = vld [vmem:[#allocation5_spill] sm:$0xff] }
  0xb0   : > { %5014 = vmatmul.mubr.msk.f32.gmra.mxu1 %vm411_vm0, %v5867_v21 }
  0xb1   : > { %5016 = vmatprep.mubr.msk.f32.mxu1 %vm411_vm0, %v5871_v0 }
  0xb2   : > { %5067 = vmatmul.mubr.msk.f32.gmra.mxu0 %vm411_vm0, %v5605_v1  ;;  %v7077_v1 = vld [vmem:[#allocation8_spill] sm:$0xff] }
  0xb3   : > { %5069 = vmatprep.mubr.msk.f32.mxu0 %vm411_vm0, %v5612_v9  ;;  %v7078_v9 = vld [vmem:[#allocation9_spill] sm:$0xff] }
  0xb4   : > { %5017 = vmatmul.mubr.msk.f32.gmra.mxu1 %vm411_vm0, %v5883_v17 }
  0xb5   : > { %5019 = vmatprep.mubr.msk.f32.mxu1 %vm411_vm0, %v5887_v56 }
  0xb6   : > { %5070 = vmatmul.mubr.msk.f32.gmra.mxu0 %vm411_vm0, %v5629_v27  ;;  %v7081_v27 = vld [vmem:[#allocation12_spill] sm:$0xff] }
  0xb7   : > { %5072 = vmatprep.mubr.msk.f32.mxu0 %vm411_vm0, %v5636_v28  ;;  %v7082_v28 = vld [vmem:[#allocation13_spill] sm:$0xff] }
  0xb8   : > { %5020 = vmatmul.mubr.msk.f32.gmra.mxu1 %vm411_vm0, %v5899_v12 }
  0xb9   : > { %5022 = vmatprep.mubr.msk.f32.mxu1 %vm411_vm0, %v5903_v3 }
  0xba   : > { %5073 = vmatmul.mubr.msk.f32.gmra.mxu0 %vm411_vm0, %v5651_v31  ;;  %v7085_v31 = vld [vmem:[#allocation16_spill] sm:$0xff] }
  0xbb   : > { %5075 = vmatprep.mubr.msk.f32.mxu0 %vm411_vm0, %v5655_v34  ;;  %v7086_v34 = vld [vmem:[#allocation17_spill] sm:$0xff] }
  0xbc   : > { %5023 = vmatmul.mubr.msk.f32.gmra.mxu1 %vm411_vm0, %v5915_v22 }
  0xbd   : > { %5025 = vmatprep.mubr.msk.f32.mxu1 %vm411_vm0, %v5919_v49 }
  0xbe   : > { %5076 = vmatmul.mubr.msk.f32.gmra.mxu0 %vm411_vm0, %v5667_v37  ;;  %v7088_v37 = vld [vmem:[#allocation19_spill] sm:$0xff] }
  0xbf   : > { %5078 = vmatprep.mubr.msk.f32.mxu0 %vm411_vm0, %v5671_v39 }
  0xc0   : > { %5026 = vmatmul.mubr.msk.f32.gmra.mxu1 %vm411_vm0, %v5931_v26 }
  0xc1   : > { %5028 = vmatprep.mubr.msk.f32.mxu1 %vm411_vm0, %v5935_v20 }
  0xc2   : > { %5079 = vmatmul.mubr.msk.f32.gmra.mxu0 %vm411_vm0, %v5683_v42  ;;  %v7090_v42 = vld [vmem:[#allocation21_spill] sm:$0xff] }
  0xc3   : > { %5081 = vmatprep.mubr.msk.f32.mxu0 %vm411_vm0, %v5687_v43 }
  0xc4   : > { %5029 = vmatmul.mubr.msk.f32.gmra.mxu1 %vm411_vm0, %v5947_v50 }
  0xc5   : > { %5031 = vmatprep.mubr.msk.f32.mxu1 %vm411_vm0, %v5951_v16 }
  0xc6   : > { %5082 = vmatmul.mubr.msk.f32.gmra.mxu0 %vm411_vm0, %v7071_v24 }
  0xc7   : > { %5084 = vmatprep.mubr.msk.f32.mxu0 %vm411_vm0, %v6095_v23 }
  0xc8   : > { %5032 = vmatmul.mubr.msk.f32.gmra.mxu1 %vm411_vm0, %v5961_v47 }
  0xc9   : > { %5034 = vmatprep.mubr.msk.f32.mxu1 %vm411_vm0, %v6101_v32 }
  0xca   : > { %5085 = vmatmul.mubr.msk.f32.gmra.mxu0 %vm411_vm0, %v6105_v33 }
  0xcb   : > { %5139 = vmatprep.mubr.msk.f32.mxu0 %vm411_vm0, %v5740_v6 }
  0xcc   : > { %5035 = vmatmul.mubr.msk.f32.gmra.mxu1 %vm411_vm0, %v6111_v38 }
  0xcd   : > { %5089 = vmatprep.mubr.msk.f32.mxu1 %vm411_vm0, %v7073_v44  ;;  %v3145_v44 = vld [vmem:[#allocation2 + $0x31] sm:$0xff] }
  0xce   : > { %5140 = vmatmul.mubr.msk.f32.vlgmr.msra.gmra.mxu0 %vm411_vm0, %v5755_v7 }
  0xcf   : > { %5238 = vmatpush3.msra.mxu0 %v5974_v58  ;;  %5142 = vmatprep.mubr.msk.f32.mxu0 %vm411_vm0, %v5759_v8 }
  0xd0   : > { %5090 = vmatmul.mubr.msk.f32.vlgmr.msra.gmra.mxu1 %vm411_vm0, %v7074_v51 }
  0xd1   : > { %5188 = vmatpush3.msra.mxu1 %v5984_v25  ;;  %5092 = vmatprep.mubr.msk.f32.mxu1 %vm411_vm0, %v7075_v59  ;;  %v2789_v25 = vld [vmem:[#allocation2 + $0x1a0] sm:$0xff] }
  0xd2   : > { %5143 = vmatmul.mubr.msk.f32.gmra.mxu0 %vm411_vm0, %v5771_v13  ;;  %v7094_v13 = vld [vmem:[#allocation25_spill] sm:$0xff] }
  0xd3   : > { %5145 = vmatprep.mubr.msk.f32.mxu0 %vm411_vm0, %v5775_v14  ;;  %v7095_v14 = vld [vmem:[#allocation26_spill] sm:$0xff] }
  0xd4   : > { %5093 = vmatmul.mubr.msk.f32.gmra.mxu1 %vm411_vm0, %v7076_v60 }
  0xd5   : > { %5095 = vmatprep.mubr.msk.f32.mxu1 %vm411_vm0, %v7077_v1 }
  0xd6   : > { %5146 = vmatmul.mubr.msk.f32.gmra.mxu0 %vm411_vm0, %v5787_v18 }
  0xd7   : > { %5148 = vmatprep.mubr.msk.f32.mxu0 %vm411_vm0, %v5791_v19 }
  0xd8   : > { %5096 = vmatmul.mubr.msk.f32.gmra.mxu1 %vm411_vm0, %v7078_v9 }
  0xd9   : > { %5098 = vmatprep.mubr.msk.f32.mxu1 %vm411_vm0, %v7079_v10 }
  0xda   : > { %5149 = vmatmul.mubr.msk.f32.gmra.mxu0 %vm411_vm0, %v5803_v46  ;;  %v7097_v46 = vld [vmem:[#allocation28_spill] sm:$0xff] }
  0xdb   : > { %5151 = vmatprep.mubr.msk.f32.mxu0 %vm411_vm0, %v5807_v48 }
  0xdc   : > { %5099 = vmatmul.mubr.msk.f32.gmra.mxu1 %vm411_vm0, %v7080_v15 }
  0xdd   : > { %5101 = vmatprep.mubr.msk.f32.mxu1 %vm411_vm0, %v7081_v27 }
  0xde   : > { %5152 = vmatmul.mubr.msk.f32.gmra.mxu0 %vm411_vm0, %v5819_v2  ;;  %v7099_v2 = vld [vmem:[#allocation30_spill] sm:$0xff] }
  0xdf   : > { %5154 = vmatprep.mubr.msk.f32.mxu0 %vm411_vm0, %v5823_v54 }
  0xe0   : > { %5102 = vmatmul.mubr.msk.f32.gmra.mxu1 %vm411_vm0, %v7082_v28 }
  0xe1   : > { %5104 = vmatprep.mubr.msk.f32.mxu1 %vm411_vm0, %v7083_v29 }
  0xe2   : > { %5155 = vmatmul.mubr.msk.f32.gmra.mxu0 %vm411_vm0, %v5835_v62  ;;  %v7100_v62 = vld [vmem:[#allocation31_spill] sm:$0xff] }
  0xe3   : > { %5157 = vmatprep.mubr.msk.f32.mxu0 %vm411_vm0, %v5839_v4 }
  0xe4   : > { %5105 = vmatmul.mubr.msk.f32.gmra.mxu1 %vm411_vm0, %v7084_v30 }
  0xe5   : > { %5107 = vmatprep.mubr.msk.f32.mxu1 %vm411_vm0, %v7085_v31 }
  0xe6   : > { %5158 = vmatmul.mubr.msk.f32.gmra.mxu0 %vm411_vm0, %v5851_v53  ;;  %v6177_v35 = vpop.f32.mrf.mxu0  ;;  %v7098_v53 = vld [vmem:[#allocation29_spill] sm:$0xff] }
  0xe7   : > { %5160 = vmatprep.mubr.msk.f32.mxu0 %vm411_vm0, %v5855_v55 }
  0xe8   : > { %5108 = vmatmul.mubr.msk.f32.gmra.mxu1 %vm411_vm0, %v7086_v34  ;;  %v6187_v39 = vpop.f32.mrf.mxu0 }
  0xe9   : > { %5110 = vmatprep.mubr.msk.f32.mxu1 %vm411_vm0, %v7087_v36 }
  0xea   : > { %5161 = vmatmul.mubr.msk.f32.gmra.mxu0 %vm411_vm0, %v5867_v21  ;;  %v7096_v21 = vld [vmem:[#allocation27_spill] sm:$0xff] }
  0xeb   : > { %5163 = vmatprep.mubr.msk.f32.mxu0 %vm411_vm0, %v5871_v0 }
  0xec   : > { %5111 = vmatmul.mubr.msk.f32.gmra.mxu1 %vm411_vm0, %v7088_v37 }
  0xed   : > { %5113 = vmatprep.mubr.msk.f32.mxu1 %vm411_vm0, %v7089_v40 }
  0xee   : > { %5164 = vmatmul.mubr.msk.f32.gmra.mxu0 %vm411_vm0, %v5883_v17 }
  0xef   : > { %5166 = vmatprep.mubr.msk.f32.mxu0 %vm411_vm0, %v5887_v56  ;;  %v2788_v56 = vld [vmem:[#allocation2 + $0x198] sm:$0xff] }
  0xf0   : > { %v6195_v41 = vpop.f32.mrf.mxu1  ;;  %5114 = vmatmul.mubr.msk.f32.gmra.mxu1 %vm411_vm0, %v7090_v42 }
  0xf1   : > { %v6199_v43 = vpop.f32.mrf.mxu0  ;;  %5116 = vmatprep.mubr.msk.f32.mxu1 %vm411_vm0, %v7091_v45 }
  0xf2   : > { %v6203_v52 = vpop.f32.mrf.mxu1  ;;  %5167 = vmatmul.mubr.msk.f32.gmra.mxu0 %vm411_vm0, %v5899_v12 }
  0xf3   : > { %v6207_v57 = vpop.f32.mrf.mxu0  ;;  %5169 = vmatprep.mubr.msk.f32.mxu0 %vm411_vm0, %v5903_v3 }
  0xf4   : > { %v6211_v58 = vpop.f32.mrf.mxu1  ;;  %5117 = vmatmul.mubr.msk.f32.gmra.mxu1 %vm411_vm0, %v7092_v61 }
  0xf5   : > { %5119 = vmatprep.mubr.msk.f32.mxu1 %vm411_vm0, %v7093_v63  ;;  %v6217_v6 = vpop.f32.mrf.mxu0 }
  0xf6   : > { %v6219_v7 = vpop.f32.mrf.mxu1  ;;  %5170 = vmatmul.mubr.msk.f32.gmra.mxu0 %vm411_vm0, %v5915_v22 }
  0xf7   : > { %v6223_v8 = vpop.f32.mrf.mxu0  ;;  %5172 = vmatprep.mubr.msk.f32.mxu0 %vm411_vm0, %v5919_v49 }
  0xf8   : > { %v6227_v12 = vpop.f32.mrf.mxu1  ;;  %5120 = vmatmul.mubr.msk.f32.gmra.mxu1 %vm411_vm0, %v7094_v13 }
  0xf9   : > { %5122 = vmatprep.mubr.msk.f32.mxu1 %vm411_vm0, %v7095_v14  ;;  %v6233_v17 = vpop.f32.mrf.mxu0 }
  0xfa   : > { %v6235_v18 = vpop.f32.mrf.mxu1  ;;  %5173 = vmatmul.mubr.msk.f32.gmra.mxu0 %vm411_vm0, %v5931_v26 }
  0xfb   : > { %v6239_v22 = vpop.f32.mrf.mxu0  ;;  %5175 = vmatprep.mubr.msk.f32.mxu0 %vm411_vm0, %v5935_v20 }
  0xfc   : > { %v6243_v19 = vpop.f32.mrf.mxu1  ;;  %5123 = vmatmul.mubr.msk.f32.gmra.mxu1 %vm411_vm0, %v7096_v21 }
  0xfd   : > { %5125 = vmatprep.mubr.msk.f32.mxu1 %vm411_vm0, %v7097_v46  ;;  %v6249_v48 = vpop.f32.mrf.mxu0 }
  0xfe   : > { %v6251_v49 = vpop.f32.mrf.mxu1  ;;  %5176 = vmatmul.mubr.msk.f32.gmra.mxu0 %vm411_vm0, %v5947_v50 }
  0xff   : > { %v6255_v26 = vpop.f32.mrf.mxu0  ;;  %5178 = vmatprep.mubr.msk.f32.mxu0 %vm411_vm0, %v5951_v16 }
 0x100   : > { %v6259_v20 = vpop.f32.mrf.mxu1  ;;  %5126 = vmatmul.mubr.msk.f32.gmra.mxu1 %vm411_vm0, %v7098_v53 }
 0x101   : > { %5128 = vmatprep.mubr.msk.f32.mxu1 %vm411_vm0, %v7099_v2  ;;  %v6265_v54 = vpop.f32.mrf.mxu0  ;;  %v3146_v2 = vld [vmem:[#allocation2 + $0x39] sm:$0xff] }
 0x102   : > { %v6267_v55 = vpop.f32.mrf.mxu1  ;;  %5179 = vmatmul.mubr.msk.f32.gmra.mxu0 %vm411_vm0, %v5961_v47  ;;  %v6287_v47 = vld [vmem:[#allocation2 + $0x182] sm:$0xff] }
 0x103   : > { %v6271_v50 = vpop.f32.mrf.mxu0  ;;  %5181 = vmatprep.mubr.msk.f32.mxu0 %vm411_vm0, %v6101_v32  ;;  %v6300_v32 = vld [vmem:[#allocation2 + $0x18a] sm:$0xff] }
 0x104   : > { %v6275_v16 = vpop.f32.mrf.mxu1  ;;  %5129 = vmatmul.mubr.msk.f32.gmra.mxu1 %vm411_vm0, %v5939_v11 }
 0x105   : > { %5131 = vmatprep.mubr.msk.f32.mxu1 %vm411_vm0, %v7100_v62  ;;  %v6281_v4 = vpop.f32.mrf.mxu0  ;;  %v3147_v62 = vld [vmem:[#allocation2 + $0x49] sm:$0xff] }
 0x106   : > { %v6283_v0 = vpop.f32.mrf.mxu1  ;;  %5182 = vmatmul.mubr.msk.f32.gmra.mxu0 %vm411_vm0, %v6111_v38 }
 0x107   : > { %7101 = vst [vmem:[#allocation4_spill] sm:$0xff] %v6283_v0  ;;  %v6289_v3 = vpop.f32.mrf.mxu0  ;;  %5184 = vmatprep.mubr.msk.f32.mxu0 %vm411_vm0, %v2788_v56 }
 0x108   : > { %v6292_v24 = vpop.f32.mrf.mxu1  ;;  %5132 = vmatmul.mubr.msk.f32.gmra.mxu1 %vm411_vm0, %v5955_v5 }
 0x109   : > { %7102 = vst [vmem:[#allocation5_spill] sm:$0xff] %v6292_v24  ;;  %5134 = vmatprep.mubr.msk.f32.mxu1 %vm411_vm0, %v6287_v47  ;;  %v6298_v11 = vpop.f32.mrf.mxu0 }
 0x10a   : > { %v6302_v38 = vpop.f32.mrf.mxu1  ;;  %5185 = vmatmul.mubr.msk.f32.gmra.mxu0 %vm411_vm0, %v2789_v25 }
 0x10b   : > { %7103 = vst [vmem:[#allocation6_spill] sm:$0xff] %v6302_v38  ;;  %v6305_v51 = vpop.f32.mrf.mxu0  ;;  %5239 = vmatprep.mubr.msk.f32.mxu0 %vm411_vm0, %v7075_v59 }
 0x10c   : > { %v6309_v53 = vpop.f32.mrf.mxu1  ;;  %5135 = vmatmul.mubr.msk.f32.gmra.mxu1 %vm411_vm0, %v6300_v32 }
 0x10d   : > { %7104 = vst [vmem:[#allocation7_spill] sm:$0xff] %v6309_v53  ;;  %5189 = vmatprep.mubr.msk.f32.mxu1 %vm411_vm0, %v3145_v44  ;;  %v4941_v5 = vpop.f32.mrf.mxu0  ;;  %v3148_v44 = vld [vmem:[#allocation2 + $0x51] sm:$0xff] }
 0x10e   : > { %v6314_v56 = vpop.f32.mrf.mxu1  ;;  %5240 = vmatmul.mubr.msk.f32.vlgmr.msra.gmra.mxu0 %vm411_vm0, %v7076_v60 }
 0x10f   : > { %7105 = vst [vmem:[#allocation8_spill] sm:$0xff] %v6314_v56  ;;  %v1405_v25 = vpop.f32.mrf.mxu0  ;;  %5242 = vmatprep.mubr.msk.f32.mxu0 %vm411_vm0, %v7077_v1  ;;  %v3149_v56 = vld [vmem:[#allocation2 + $0x61] sm:$0xff] }
 0x110   : > { %v4891_v59 = vpop.f32.mrf.mxu1  ;;  %5190 = vmatmul.mubr.msk.f32.vlgmr.msra.gmra.mxu1 %vm411_vm0, %v3146_v2 }
 0x111   : > { %v1056_v53 = vadd.f32 %v4891_v59, %v6177_v35  ;;  %5192 = vmatprep.mubr.msk.f32.mxu1 %vm411_vm0, %v3147_v62  ;;  %v3150_v59 = vld [vmem:[#allocation2 + $0x69] sm:$0xff] }
 0x112   : > { %v1050_v38 = vpop.f32.mrf.mxu1  ;;  %v4944_v24 = vpop.f32.mrf.mxu0  ;;  %5243 = vmatmul.mubr.msk.f32.gmra.mxu0 %vm411_vm0, %v7078_v9 }
 0x113   : > { %v6325_v60 = vadd.f32 %v4941_v5, %v1056_v53  ;;  %v1051_v33 = vadd.f32 %v1050_v38, %v6187_v39  ;;  %5245 = vmatprep.mubr.msk.f32.mxu0 %vm411_vm0, %v7079_v10  ;;  %v3151_v39 = vld [vmem:[#allocation2 + $0x79] sm:$0xff] }
 0x114   : > { %v4894_v1 = vpop.f32.mrf.mxu1  ;;  %5193 = vmatmul.mubr.msk.f32.gmra.mxu1 %vm411_vm0, %v3148_v44  ;;  %v1415_v35 = vpop.f32.mrf.mxu0 }
 0x115   : > { %v6331_v2 = vadd.f32 %v1405_v25, %v1051_v33  ;;  %v1066_v62 = vadd.f32 %v4894_v1, %v6199_v43  ;;  %5195 = vmatprep.mubr.msk.f32.mxu1 %vm411_vm0, %v3149_v56  ;;  %v3152_v56 = vld [vmem:[#allocation2 + $0x81] sm:$0xff] }
 0x116   : > { %v1060_v9 = vpop.f32.mrf.mxu1  ;;  %v4947_v0 = vpop.f32.mrf.mxu0  ;;  %5246 = vmatmul.mubr.msk.f32.gmra.mxu0 %vm411_vm0, %v7080_v15 }
 0x117   : > { %v6337_v38 = vadd.f32 %v4944_v24, %v1066_v62  ;;  %v1061_v10 = vadd.f32 %v1060_v9, %v6207_v57  ;;  %5248 = vmatprep.mubr.msk.f32.mxu0 %vm411_vm0, %v7081_v27  ;;  %v3153_v57 = vld [vmem:[#allocation2 + $0x91] sm:$0xff]  ;;  %v3154_v62 = vld [vmem:[#allocation2 + $0x99] sm:$0xff] }
 0x118   : > { %v4897_v33 = vpop.f32.mrf.mxu1  ;;  %5196 = vmatmul.mubr.msk.f32.gmra.mxu1 %vm411_vm0, %v3150_v59  ;;  %v1425_v43 = vpop.f32.mrf.mxu0 }
 0x119   : > { %v6343_v53 = vadd.f32 %v1415_v35, %v1061_v10  ;;  %v1076_v5 = vadd.f32 %v4897_v33, %v6217_v6  ;;  %5198 = vmatprep.mubr.msk.f32.mxu1 %vm411_vm0, %v3151_v39  ;;  %v3156_v33 = vld [vmem:[#allocation2 + $0xb1] sm:$0xff] }
 0x11a   : > { %v1070_v15 = vpop.f32.mrf.mxu1  ;;  %v4950_v25 = vpop.f32.mrf.mxu0  ;;  %5249 = vmatmul.mubr.msk.f32.gmra.mxu0 %vm411_vm0, %v7082_v28 }
 0x11b   : > { %v6349_v24 = vadd.f32 %v4947_v0, %v1076_v5  ;;  %v1071_v27 = vadd.f32 %v1070_v15, %v6223_v8  ;;  %5251 = vmatprep.mubr.msk.f32.mxu0 %vm411_vm0, %v7083_v29  ;;  %v3155_v8 = vld [vmem:[#allocation2 + $0xa9] sm:$0xff] }
 0x11c   : > { %v4900_v44 = vpop.f32.mrf.mxu1  ;;  %5199 = vmatmul.mubr.msk.f32.gmra.mxu1 %vm411_vm0, %v3152_v56  ;;  %v1435_v6 = vpop.f32.mrf.mxu0 }
 0x11d   : > { %v6355_v1 = vadd.f32 %v1425_v43, %v1071_v27  ;;  %v1086_v35 = vadd.f32 %v4900_v44, %v6233_v17  ;;  %5201 = vmatprep.mubr.msk.f32.mxu1 %vm411_vm0, %v3153_v57  ;;  %v3158_v57 = vld [vmem:[#allocation2 + $0xc9] sm:$0xff] }
 0x11e   : > { %v1080_v28 = vpop.f32.mrf.mxu1  ;;  %v4953_v59 = vpop.f32.mrf.mxu0  ;;  %5252 = vmatmul.mubr.msk.f32.gmra.mxu0 %vm411_vm0, %v7084_v30 }
 0x11f   : > { %v6361_v0 = vadd.f32 %v4950_v25, %v1086_v35  ;;  %v1081_v29 = vadd.f32 %v1080_v28, %v6239_v22  ;;  %5254 = vmatprep.mubr.msk.f32.mxu0 %vm411_vm0, %v7085_v31  ;;  %v3157_v22 = vld [vmem:[#allocation2 + $0xc1] sm:$0xff] }
 0x120   : > { %v4903_v9 = vpop.f32.mrf.mxu1  ;;  %5202 = vmatmul.mubr.msk.f32.gmra.mxu1 %vm411_vm0, %v3154_v62  ;;  %v1445_v17 = vpop.f32.mrf.mxu0  ;;  %v3160_v28 = vld [vmem:[#allocation2 + $0xe1] sm:$0xff] }
 0x121   : > { %v6367_v39 = vadd.f32 %v1435_v6, %v1081_v29  ;;  %v1096_v10 = vadd.f32 %v4903_v9, %v6249_v48  ;;  %5204 = vmatprep.mubr.msk.f32.mxu1 %vm411_vm0, %v3155_v8 }
 0x122   : > { %v1090_v30 = vpop.f32.mrf.mxu1  ;;  %v4956_v43 = vpop.f32.mrf.mxu0  ;;  %5255 = vmatmul.mubr.msk.f32.gmra.mxu0 %vm411_vm0, %v7086_v34 }
 0x123   : > { %v6373_v5 = vadd.f32 %v4953_v59, %v1096_v10  ;;  %v1091_v31 = vadd.f32 %v1090_v30, %v6255_v26  ;;  %5257 = vmatprep.mubr.msk.f32.mxu0 %vm411_vm0, %v7087_v36  ;;  %v3159_v26 = vld [vmem:[#allocation2 + $0xd9] sm:$0xff] }
 0x124   : > { %v4906_v56 = vpop.f32.mrf.mxu1  ;;  %5205 = vmatmul.mubr.msk.f32.gmra.mxu1 %vm411_vm0, %v3156_v33  ;;  %v1455_v48 = vpop.f32.mrf.mxu0  ;;  %v3162_v10 = vld [vmem:[#allocation2 + $0xf9] sm:$0xff] }
 0x125   : > { %v6379_v15 = vadd.f32 %v1445_v17, %v1091_v31  ;;  %v1106_v25 = vadd.f32 %v4906_v56, %v6265_v54  ;;  %5207 = vmatprep.mubr.msk.f32.mxu1 %vm411_vm0, %v3157_v22  ;;  %v3164_v56 = vld [vmem:[#allocation2 + $0x111] sm:$0xff] }
 0x126   : > { %v1100_v34 = vpop.f32.mrf.mxu1  ;;  %v4959_v27 = vpop.f32.mrf.mxu0  ;;  %5258 = vmatmul.mubr.msk.f32.gmra.mxu0 %vm411_vm0, %v7088_v37 }
 0x127   : > { %v6385_v44 = vadd.f32 %v4956_v43, %v1106_v25  ;;  %v1101_v36 = vadd.f32 %v1100_v34, %v6271_v50  ;;  %5260 = vmatprep.mubr.msk.f32.mxu0 %vm411_vm0, %v7089_v40  ;;  %v3161_v50 = vld [vmem:[#allocation2 + $0xf1] sm:$0xff] }
 0x128   : > { %v4909_v6 = vpop.f32.mrf.mxu1  ;;  %5208 = vmatmul.mubr.msk.f32.gmra.mxu1 %vm411_vm0, %v3158_v57  ;;  %v1465_v54 = vpop.f32.mrf.mxu0 }
 0x129   : > { %v6391_v35 = vadd.f32 %v1455_v48, %v1101_v36  ;;  %v1116_v62 = vadd.f32 %v4909_v6, %v6281_v4  ;;  %5210 = vmatprep.mubr.msk.f32.mxu1 %vm411_vm0, %v3159_v26  ;;  %v3166_v26 = vld [vmem:[#allocation2 + $0x129] sm:$0xff] }
 0x12a   : > { %v1110_v37 = vpop.f32.mrf.mxu1  ;;  %v4962_v59 = vpop.f32.mrf.mxu0  ;;  %5261 = vmatmul.mubr.msk.f32.gmra.mxu0 %vm411_vm0, %v7090_v42 }
 0x12b   : > { %v6397_v8 = vadd.f32 %v4959_v27, %v1116_v62  ;;  %v1111_v40 = vadd.f32 %v1110_v37, %v6289_v3  ;;  %5263 = vmatprep.mubr.msk.f32.mxu0 %vm411_vm0, %v7091_v45  ;;  %v3163_v3 = vld [vmem:[#allocation2 + $0x109] sm:$0xff] }
 0x12c   : > { %v4912_v29 = vpop.f32.mrf.mxu1  ;;  %5211 = vmatmul.mubr.msk.f32.gmra.mxu1 %vm411_vm0, %v3160_v28  ;;  %v1475_v4 = vpop.f32.mrf.mxu0  ;;  %v3556_v28 = vld [vmem:[#allocation2 + $0x152] sm:$0xff] }
 0x12d   : > { %v6403_v9 = vadd.f32 %v1465_v54, %v1111_v40  ;;  %v1126_v17 = vadd.f32 %v4912_v29, %v6298_v11  ;;  %5213 = vmatprep.mubr.msk.f32.mxu1 %vm411_vm0, %v3161_v50  ;;  %v3555_v54 = vld [vmem:[#allocation2 + $0x142] sm:$0xff] }
 0x12e   : > { %v1120_v42 = vpop.f32.mrf.mxu1  ;;  %v4965_v33 = vpop.f32.mrf.mxu0  ;;  %5264 = vmatmul.mubr.msk.f32.gmra.mxu0 %vm411_vm0, %v7092_v61 }
 0x12f   : > { %v6409_v30 = vadd.f32 %v4962_v59, %v1126_v17  ;;  %v1121_v45 = vadd.f32 %v1120_v42, %v6305_v51  ;;  %5266 = vmatprep.mubr.msk.f32.mxu0 %vm411_vm0, %v7093_v63  ;;  %v3165_v51 = vld [vmem:[#allocation2 + $0x121] sm:$0xff] }
 0x130   : > { %v4915_v43 = vpop.f32.mrf.mxu1  ;;  %5214 = vmatmul.mubr.msk.f32.gmra.mxu1 %vm411_vm0, %v3162_v10  ;;  %v1485_v11 = vpop.f32.mrf.mxu0 }
 0x131   : > { %v6415_v22 = vadd.f32 %v1475_v4, %v1121_v45  ;;  %v1136_v31 = vadd.f32 %v4915_v43, %v6195_v41  ;;  %5216 = vmatprep.mubr.msk.f32.mxu1 %vm411_vm0, %v3163_v3  ;;  %v3557_v4 = vld [vmem:[#allocation2 + $0x15a] sm:$0xff] }
 0x132   : > { %v1130_v61 = vpop.f32.mrf.mxu1  ;;  %v4968_v48 = vpop.f32.mrf.mxu0  ;;  %5267 = vmatmul.mubr.msk.f32.gmra.mxu0 %vm411_vm0, %v7094_v13  ;;  %v3170_v3 = vld [vmem:[#allocation2 + $0x159] sm:$0xff] }
 0x133   : > { %v6421_v25 = vadd.f32 %v4965_v33, %v1136_v31  ;;  %v1131_v63 = vadd.f32 %v1130_v61, %v6203_v52  ;;  %5269 = vmatprep.mubr.msk.f32.mxu0 %vm411_vm0, %v7095_v14  ;;  %v3167_v52 = vld [vmem:[#allocation2 + $0x139] sm:$0xff] }
 0x134   : > { %v4918_v57 = vpop.f32.mrf.mxu1  ;;  %5217 = vmatmul.mubr.msk.f32.gmra.mxu1 %vm411_vm0, %v3164_v56  ;;  %v1495_v41 = vpop.f32.mrf.mxu0  ;;  %v3559_v56 = vld [vmem:[#allocation2 + $0x172] sm:$0xff] }
 0x135   : > { %v6427_v34 = vadd.f32 %v1485_v11, %v1131_v63  ;;  %v1146_v27 = vadd.f32 %v4918_v57, %v6211_v58  ;;  %5219 = vmatprep.mubr.msk.f32.mxu1 %vm411_vm0, %v3165_v51  ;;  %v3172_v63 = vld [vmem:[#allocation2 + $0x171] sm:$0xff] }
 0x136   : > { %v1140_v13 = vpop.f32.mrf.mxu1  ;;  %v4971_v36 = vpop.f32.mrf.mxu0  ;;  %5270 = vmatmul.mubr.msk.f32.gmra.mxu0 %vm411_vm0, %v7096_v21  ;;  %v3168_v21 = vld [vmem:[#allocation2 + $0x141] sm:$0xff] }
 0x137   : > { %v6433_v6 = vadd.f32 %v4968_v48, %v1146_v27  ;;  %v1141_v14 = vadd.f32 %v1140_v13, %v6219_v7  ;;  %5272 = vmatprep.mubr.msk.f32.mxu0 %vm411_vm0, %v7097_v46  ;;  %v3169_v7 = vld [vmem:[#allocation2 + $0x151] sm:$0xff] }
 0x138   : > { %v4921_v62 = vpop.f32.mrf.mxu1  ;;  %5220 = vmatmul.mubr.msk.f32.gmra.mxu1 %vm411_vm0, %v3166_v26  ;;  %v1505_v58 = vpop.f32.mrf.mxu0 }
 0x139   : > { %v6439_v37 = vadd.f32 %v1495_v41, %v1141_v14  ;;  %v1156_v59 = vadd.f32 %v4921_v62, %v6227_v12  ;;  %5222 = vmatprep.mubr.msk.f32.mxu1 %vm411_vm0, %v3167_v52  ;;  %v3558_v12 = vld [vmem:[#allocation2 + $0x16a] sm:$0xff] }
 0x13a   : > { %v1150_v50 = vpop.f32.mrf.mxu1  ;;  %v4974_v40 = vpop.f32.mrf.mxu0  ;;  %5273 = vmatmul.mubr.msk.f32.gmra.mxu0 %vm411_vm0, %v3555_v54 }
 0x13b   : > { %v6444_v29 = vadd.f32 %v4971_v36, %v1156_v59  ;;  %v1151_v46 = vadd.f32 %v1150_v50, %v6235_v18  ;;  %5275 = vmatprep.mubr.msk.f32.mxu0 %vm411_vm0, %v3556_v28  ;;  %v3171_v18 = vld [vmem:[#allocation2 + $0x169] sm:$0xff]  ;;  %v3562_v36 = vld [vmem:[#allocation2 + $0x19a] sm:$0xff] }
 0x13c   : > { %v4924_v17 = vpop.f32.mrf.mxu1  ;;  %5223 = vmatmul.mubr.msk.f32.gmra.mxu1 %vm411_vm0, %v3168_v21  ;;  %v1515_v10 = vpop.f32.mrf.mxu0  ;;  %v3563_v28 = vld [vmem:[#allocation2 + $0x1a2] sm:$0xff]  ;;  %v7107_v21 = vld [vmem:[#allocation3_spill] sm:$0xff] }
 0x13d   : > { %v6449_v42 = vadd.f32 %v1505_v58, %v1151_v46  ;;  %v1166_v33 = vadd.f32 %v4924_v17, %v6243_v19  ;;  %5225 = vmatprep.mubr.msk.f32.mxu1 %vm411_vm0, %v3169_v7  ;;  %v7109_v17 = vld [vmem:[#allocation6_spill] sm:$0xff] }
 0x13e   : > { %v1160_v45 = vpop.f32.mrf.mxu1  ;;  %v4977_v43 = vpop.f32.mrf.mxu0  ;;  %5276 = vmatmul.mubr.msk.f32.gmra.mxu0 %vm411_vm0, %v3557_v4 }
 0x13f   : > { %v6454_v11 = vadd.f32 %v4974_v40, %v1166_v33  ;;  %v1161_v31 = vadd.f32 %v1160_v45, %v6251_v49  ;;  %5278 = vmatprep.mubr.msk.f32.mxu0 %vm411_vm0, %v3558_v12  ;;  %v7110_v45 = vld [vmem:[#allocation7_spill] sm:$0xff] }
 0x140   : > { %v4927_v61 = vpop.f32.mrf.mxu1  ;;  %5226 = vmatmul.mubr.msk.f32.gmra.mxu1 %vm411_vm0, %v3170_v3  ;;  %v1525_v48 = vpop.f32.mrf.mxu0 }
 0x141   : > { %v6459_v19 = vadd.f32 %v1515_v10, %v1161_v31  ;;  %v1176_v51 = vadd.f32 %v4927_v61, %v6259_v20  ;;  %5228 = vmatprep.mubr.msk.f32.mxu1 %vm411_vm0, %v3171_v18  ;;  %v7111_v61 = vld [vmem:[#allocation8_spill] sm:$0xff] }
 0x142   : > { %v1170_v57 = vpop.f32.mrf.mxu1  ;;  %v4980_v41 = vpop.f32.mrf.mxu0  ;;  %5279 = vmatmul.mubr.msk.f32.gmra.mxu0 %vm411_vm0, %v3559_v56 }
 0x143   : > { %v6464_v27 = vadd.f32 %v4977_v43, %v1176_v51  ;;  %v1171_v49 = vadd.f32 %v1170_v57, %v6267_v55  ;;  %5281 = vmatprep.mubr.msk.f32.mxu0 %vm411_vm0, %v6287_v47  ;;  %v3175_v55 = vld [vmem:[#allocation2 + $0x199] sm:$0xff] }
 0x144   : > { %v4930_v26 = vpop.f32.mrf.mxu1  ;;  %5229 = vmatmul.mubr.msk.f32.gmra.mxu1 %vm411_vm0, %v3172_v63  ;;  %v1535_v13 = vpop.f32.mrf.mxu0  ;;  %v7106_v47 = vld [vmem:[#allocation4_spill] sm:$0xff] }
 0x145   : > { %v6470_v20 = vadd.f32 %v1525_v48, %v1171_v49  ;;  %v1186_v52 = vadd.f32 %v4930_v26, %v6275_v16  ;;  %5231 = vmatprep.mubr.msk.f32.mxu1 %vm411_vm0, %v6095_v23  ;;  %v7108_v23 = vld [vmem:[#allocation5_spill] sm:$0xff] }
 0x146   : > { %v1180_v14 = vpop.f32.mrf.mxu1  ;;  %v4983_v54 = vpop.f32.mrf.mxu0  ;;  %5282 = vmatmul.mubr.msk.f32.gmra.mxu0 %vm411_vm0, %v6300_v32  ;;  %v3176_v32 = vld [vmem:[#allocation2 + $0x1a1] sm:$0xff] }
 0x147   : > { %v6477_v62 = vadd.f32 %v4980_v41, %v1186_v52  ;;  %v1181_v58 = vadd.f32 %v1180_v14, %v7106_v47  ;;  %5284 = vmatprep.mubr.msk.f32.mxu0 %vm411_vm0, %v3562_v36 }
 0x148   : > { %v4933_v59 = vpop.f32.mrf.mxu1  ;;  %5232 = vmatmul.mubr.msk.f32.gmra.mxu1 %vm411_vm0, %v7107_v21  ;;  %v1545_v16 = vpop.f32.mrf.mxu0 }
 0x149   : > { %v6483_v50 = vadd.f32 %v1535_v13, %v1181_v58  ;;  %v1196_v40 = vadd.f32 %v4933_v59, %v7108_v23  ;;  %5234 = vmatprep.mubr.msk.f32.mxu1 %vm411_vm0, %v3175_v55 }
 0x14a   : > { %v1190_v7 = vpop.f32.mrf.mxu1  ;;  %v4986_v46 = vpop.f32.mrf.mxu0  ;;  %5285 = vmatmul.mubr.msk.f32.gmra.mxu0 %vm411_vm0, %v3563_v28 }
 0x14b   : > { %v6488_v4 = vadd.f32 %v4983_v54, %v1196_v40  ;;  %v1191_v10 = vadd.f32 %v1190_v7, %v7109_v17 }
 0x14c   : > { %v4936_v12 = vpop.f32.mrf.mxu1  ;;  %5235 = vmatmul.mubr.msk.f32.gmra.mxu1 %vm411_vm0, %v3176_v32  ;;  %v1555_v33 = vpop.f32.mrf.mxu0 }
 0x14d   : > { %v6492_v3 = vadd.f32 %v1545_v16, %v1191_v10  ;;  %v1206_v43 = vadd.f32 %v4936_v12, %v7110_v45 }
 0x14e   : > { %v1200_v18 = vpop.f32.mrf.mxu1  ;;  %v5041_v31 = vpop.f32.mrf.mxu0 }
 0x14f   : > { %v6495_v56 = vadd.f32 %v4986_v46, %v1206_v43  ;;  %v1201_v48 = vadd.f32 %v1200_v18, %v7111_v61 }
 0x150   : > { %v4991_v51 = vpop.f32.mrf.mxu1  ;;  %v2179_v63 = vpop.f32.mrf.mxu0 }
 0x151   : > { %v6498_v57 = vadd.f32 %v1555_v33, %v1201_v48  ;;  %v1952_v41 = vadd.f32 %v4991_v51, %v6325_v60 }
 0x152   : > { %v1792_v49 = vpop.f32.mrf.mxu1  ;;  %v5044_v26 = vpop.f32.mrf.mxu0 }
 0x153   : > { %v6501_v13 = vadd.f32 %v5041_v31, %v1952_v41  ;;  %v1951_v36 = vadd.f32 %v1792_v49, %v6331_v2 }
 0x154   : > { %v4994_v52 = vpop.f32.mrf.mxu1  ;;  %v2189_v14 = vpop.f32.mrf.mxu0 }
 0x155   : > { %v6504_v54 = vadd.f32 %v2179_v63, %v1951_v36  ;;  %v1954_v55 = vadd.f32 %v4994_v52, %v6337_v38 }
 0x156   : > { %v1802_v47 = vpop.f32.mrf.mxu1  ;;  %v5047_v58 = vpop.f32.mrf.mxu0 }
 0x157   : > { %v6507_v28 = vadd.f32 %v5044_v26, %v1954_v55  ;;  %v1953_v59 = vadd.f32 %v1802_v47, %v6343_v53 }
 0x158   : > { %v4997_v21 = vpop.f32.mrf.mxu1  ;;  %v2199_v60 = vpop.f32.mrf.mxu0 }
 0x159   : > { %v6510_v16 = vadd.f32 %v2189_v14, %v1953_v59  ;;  %v1956_v23 = vadd.f32 %v4997_v21, %v6349_v24 }
 0x15a   : > { %v1812_v40 = vpop.f32.mrf.mxu1  ;;  %v5050_v2 = vpop.f32.mrf.mxu0 }
 0x15b   : > { %v6513_v32 = vadd.f32 %v5047_v58, %v1956_v23  ;;  %v1955_v7 = vadd.f32 %v1812_v40, %v6355_v1 }
 0x15c   : > { %v5000_v46 = vpop.f32.mrf.mxu1  ;;  %v2209_v38 = vpop.f32.mrf.mxu0 }
 0x15d   : > { %v6516_v17 = vadd.f32 %v2199_v60, %v1955_v7  ;;  %v1958_v10 = vadd.f32 %v5000_v46, %v6361_v0 }
 0x15e   : > { %v1822_v12 = vpop.f32.mrf.mxu1  ;;  %v5053_v53 = vpop.f32.mrf.mxu0 }
 0x15f   : > { %v6519_v33 = vadd.f32 %v5050_v2, %v1958_v10  ;;  %v1957_v45 = vadd.f32 %v1822_v12, %v6367_v39 }
 0x160   : > { %v5003_v43 = vpop.f32.mrf.mxu1  ;;  %v2219_v24 = vpop.f32.mrf.mxu0 }
 0x161   : > { %v6522_v18 = vadd.f32 %v2209_v38, %v1957_v45  ;;  %v1960_v31 = vadd.f32 %v5003_v43, %v6373_v5 }
 0x162   : > { %v1832_v61 = vpop.f32.mrf.mxu1  ;;  %v5056_v1 = vpop.f32.mrf.mxu0 }
 0x163   : > { %v6525_v48 = vadd.f32 %v5053_v53, %v1960_v31  ;;  %v1959_v51 = vadd.f32 %v1832_v61, %v6379_v15 }
 0x164   : > { %v5006_v63 = vpop.f32.mrf.mxu1  ;;  %v2229_v0 = vpop.f32.mrf.mxu0 }
 0x165   : > { %v6528_v41 = vadd.f32 %v2219_v24, %v1959_v51  ;;  %v1962_v49 = vadd.f32 %v5006_v63, %v6385_v44 }
 0x166   : > { %v1842_v26 = vpop.f32.mrf.mxu1  ;;  %v5059_v39 = vpop.f32.mrf.mxu0 }
 0x167   : > { %v6531_v36 = vadd.f32 %v5056_v1, %v1962_v49  ;;  %v1961_v52 = vadd.f32 %v1842_v26, %v6391_v35 }
 0x168   : > { %v5009_v14 = vpop.f32.mrf.mxu1  ;;  %v2239_v5 = vpop.f32.mrf.mxu0 }
 0x169   : > { %v6534_v55 = vadd.f32 %v2229_v0, %v1961_v52  ;;  %v1964_v47 = vadd.f32 %v5009_v14, %v6397_v8 }
 0x16a   : > { %v1852_v58 = vpop.f32.mrf.mxu1  ;;  %v5062_v15 = vpop.f32.mrf.mxu0 }
 0x16b   : > { %v6537_v59 = vadd.f32 %v5059_v39, %v1964_v47  ;;  %v1963_v21 = vadd.f32 %v1852_v58, %v6403_v9 }
 0x16c   : > { %v5012_v60 = vpop.f32.mrf.mxu1  ;;  %v2249_v44 = vpop.f32.mrf.mxu0 }
 0x16d   : > { %v6540_v23 = vadd.f32 %v2239_v5, %v1963_v21  ;;  %v1966_v40 = vadd.f32 %v5012_v60, %v6409_v30 }
 0x16e   : > { %v1862_v2 = vpop.f32.mrf.mxu1  ;;  %v5065_v35 = vpop.f32.mrf.mxu0 }
 0x16f   : > { %v6543_v7 = vadd.f32 %v5062_v15, %v1966_v40  ;;  %v1965_v46 = vadd.f32 %v1862_v2, %v6415_v22 }
 0x170   : > { %v5015_v38 = vpop.f32.mrf.mxu1  ;;  %v2259_v8 = vpop.f32.mrf.mxu0 }
 0x171   : > { %v6546_v10 = vadd.f32 %v2249_v44, %v1965_v46  ;;  %v1968_v12 = vadd.f32 %v5015_v38, %v6421_v25 }
 0x172   : > { %v1872_v53 = vpop.f32.mrf.mxu1  ;;  %v5068_v9 = vpop.f32.mrf.mxu0 }
 0x173   : > { %v6549_v45 = vadd.f32 %v5065_v35, %v1968_v12  ;;  %v1967_v43 = vadd.f32 %v1872_v53, %v6427_v34 }
 0x174   : > { %v5018_v24 = vpop.f32.mrf.mxu1  ;;  %v2269_v30 = vpop.f32.mrf.mxu0 }
 0x175   : > { %v6552_v31 = vadd.f32 %v2259_v8, %v1967_v43  ;;  %v1970_v61 = vadd.f32 %v5018_v24, %v6433_v6 }
 0x176   : > { %v1882_v1 = vpop.f32.mrf.mxu1  ;;  %v5071_v22 = vpop.f32.mrf.mxu0 }
 0x177   : > { %v6555_v51 = vadd.f32 %v5068_v9, %v1970_v61  ;;  %v1969_v63 = vadd.f32 %v1882_v1, %v6439_v37 }
 0x178   : > { %v5021_v0 = vpop.f32.mrf.mxu1  ;;  %v2279_v25 = vpop.f32.mrf.mxu0 }
 0x179   : > { %v6558_v49 = vadd.f32 %v2269_v30, %v1969_v63  ;;  %v1972_v26 = vadd.f32 %v5021_v0, %v6444_v29 }
 0x17a   : > { %v1892_v39 = vpop.f32.mrf.mxu1  ;;  %v5074_v34 = vpop.f32.mrf.mxu0 }
 0x17b   : > { %v6561_v52 = vadd.f32 %v5071_v22, %v1972_v26  ;;  %v1971_v14 = vadd.f32 %v1892_v39, %v6449_v42 }
 0x17c   : > { %v5024_v5 = vpop.f32.mrf.mxu1  ;;  %v2289_v6 = vpop.f32.mrf.mxu0 }
 0x17d   : > { %7112 = vst [vmem:[#allocation9_spill] sm:$0xff] %v6561_v52  ;;  %v6564_v47 = vadd.f32 %v2279_v25, %v1971_v14  ;;  %v1974_v58 = vadd.f32 %v5024_v5, %v6454_v11 }
 0x17e   : > { %v1902_v15 = vpop.f32.mrf.mxu1  ;;  %v5077_v37 = vpop.f32.mrf.mxu0 }
 0x17f   : > { %7113 = vst [vmem:[#allocation10_spill] sm:$0xff] %v6564_v47  ;;  %v6567_v21 = vadd.f32 %v5074_v34, %v1974_v58  ;;  %v1973_v60 = vadd.f32 %v1902_v15, %v6459_v19 }
 0x180   : > { %v5027_v44 = vpop.f32.mrf.mxu1  ;;  %v2299_v29 = vpop.f32.mrf.mxu0 }
 0x181   : > { %7114 = vst [vmem:[#allocation11_spill] sm:$0xff] %v6567_v21  ;;  %v6570_v40 = vadd.f32 %v2289_v6, %v1973_v60  ;;  %v1976_v2 = vadd.f32 %v5027_v44, %v6464_v27 }
 0x182   : > { %v1912_v35 = vpop.f32.mrf.mxu1  ;;  %v5080_v42 = vpop.f32.mrf.mxu0 }
 0x183   : > { %7115 = vst [vmem:[#allocation12_spill] sm:$0xff] %v6570_v40  ;;  %v6573_v46 = vadd.f32 %v5077_v37, %v1976_v2  ;;  %v1975_v38 = vadd.f32 %v1912_v35, %v6470_v20 }
 0x184   : > { %v5030_v8 = vpop.f32.mrf.mxu1  ;;  %v2309_v11 = vpop.f32.mrf.mxu0 }
 0x185   : > { %7116 = vst [vmem:[#allocation13_spill] sm:$0xff] %v6573_v46  ;;  %v6576_v12 = vadd.f32 %v2299_v29, %v1975_v38  ;;  %v1978_v53 = vadd.f32 %v5030_v8, %v6477_v62 }
 0x186   : > { %v1922_v9 = vpop.f32.mrf.mxu1  ;;  %v5083_v19 = vpop.f32.mrf.mxu0 }
 0x187   : > { %7117 = vst [vmem:[#allocation14_spill] sm:$0xff] %v6576_v12  ;;  %v6579_v43 = vadd.f32 %v5080_v42, %v1978_v53  ;;  %v1977_v24 = vadd.f32 %v1922_v9, %v6483_v50 }
 0x188   : > { %v5033_v30 = vpop.f32.mrf.mxu1  ;;  %v2319_v27 = vpop.f32.mrf.mxu0 }
 0x189   : > { %7118 = vst [vmem:[#allocation15_spill] sm:$0xff] %v6579_v43  ;;  %v6582_v61 = vadd.f32 %v2309_v11, %v1977_v24  ;;  %v1980_v1 = vadd.f32 %v5033_v30, %v6488_v4 }
 0x18a   : > { %v1932_v22 = vpop.f32.mrf.mxu1  ;;  %v5086_v20 = vpop.f32.mrf.mxu0 }
 0x18b   : > { %7119 = vst [vmem:[#allocation16_spill] sm:$0xff] %v6582_v61  ;;  %v6585_v63 = vadd.f32 %v5083_v19, %v1980_v1  ;;  %v1979_v0 = vadd.f32 %v1932_v22, %v6492_v3 }
 0x18c   : > { %v5036_v25 = vpop.f32.mrf.mxu1  ;;  %v2329_v62 = vpop.f32.mrf.mxu0 }
 0x18d   : > { %7120 = vst [vmem:[#allocation17_spill] sm:$0xff] %v6585_v63  ;;  %v6588_v26 = vadd.f32 %v2319_v27, %v1979_v0  ;;  %v1982_v39 = vadd.f32 %v5036_v25, %v6495_v56 }
 0x18e   : > { %v1942_v34 = vpop.f32.mrf.mxu1  ;;  %v6591_v50 = vpop.f32.mrf.mxu0 }
 0x18f   : > { %7121 = vst [vmem:[#allocation18_spill] sm:$0xff] %v6588_v26  ;;  %v6593_v14 = vadd.f32 %v5086_v20, %v1982_v39  ;;  %v1981_v5 = vadd.f32 %v1942_v34, %v6498_v57 }
 0x190   : > { %v5091_v4 = vpop.f32.mrf.mxu1  ;;  %v6596_v6 = vpop.f32.mrf.mxu0 }
 0x191   : > { %7122 = vst [vmem:[#allocation19_spill] sm:$0xff] %v6593_v14  ;;  %v6598_v58 = vadd.f32 %v2329_v62, %v1981_v5 }
 0x192   : > { %v2566_v15 = vpop.f32.mrf.mxu1  ;;  %v6600_v3 = vpop.f32.mrf.mxu0 }
 0x193   : > { %7123 = vst [vmem:[#allocation20_spill] sm:$0xff] %v6598_v58 }
 0x194   : > { %v5094_v37 = vpop.f32.mrf.mxu1  ;;  %v6602_v60 = vpop.f32.mrf.mxu0 }
 0x196   : > { %v2576_v44 = vpop.f32.mrf.mxu1  ;;  %v6604_v56 = vpop.f32.mrf.mxu0 }
 0x198   : > { %v5097_v29 = vpop.f32.mrf.mxu1  ;;  %v6606_v2 = vpop.f32.mrf.mxu0 }
 0x19a   : > { %v2586_v35 = vpop.f32.mrf.mxu1  ;;  %v6608_v42 = vpop.f32.mrf.mxu0 }
 0x19c   : > { %v5100_v57 = vpop.f32.mrf.mxu1  ;;  %v6610_v38 = vpop.f32.mrf.mxu0 }
 0x19e   : > { %v2596_v8 = vpop.f32.mrf.mxu1  ;;  %v6612_v11 = vpop.f32.mrf.mxu0 }
 0x1a0   : > { %v5103_v53 = vpop.f32.mrf.mxu1  ;;  %v6614_v9 = vpop.f32.mrf.mxu0 }
 0x1a2   : > { %v2606_v19 = vpop.f32.mrf.mxu1  ;;  %v6616_v24 = vpop.f32.mrf.mxu0 }
 0x1a4   : > { %v5106_v30 = vpop.f32.mrf.mxu1  ;;  %v6618_v27 = vpop.f32.mrf.mxu0 }
 0x1a6   : > { %v2616_v1 = vpop.f32.mrf.mxu1  ;;  %v6620_v22 = vpop.f32.mrf.mxu0 }
 0x1a8   : > { %v5109_v20 = vpop.f32.mrf.mxu1  ;;  %v6622_v0 = vpop.f32.mrf.mxu0 }
 0x1a9   : > { %7124 = vst [vmem:[#allocation21_spill] sm:$0xff] %v6622_v0 }
 0x1aa   : > { %v6624_v25 = vpop.f32.mrf.mxu1  ;;  %v6626_v62 = vpop.f32.mrf.mxu0 }
 0x1ab   : > { %7125 = vst [vmem:[#allocation22_spill] sm:$0xff] %v6626_v62 }
 0x1ac   : > { %v6628_v39 = vpop.f32.mrf.mxu1  ;;  %v6630_v34 = vpop.f32.mrf.mxu0 }
 0x1ad   : > { %7126 = vst [vmem:[#allocation23_spill] sm:$0xff] %v6630_v34 }
 0x1ae   : > { %v6632_v5 = vpop.f32.mrf.mxu1  ;;  %v6634_v58 = vpop.f32.mrf.mxu0 }
 0x1af   : > { %7127 = vst [vmem:[#allocation24_spill] sm:$0xff] %v6634_v58 }
 0x1b0   : > { %v6636_v14 = vpop.f32.mrf.mxu1  ;;  %v6638_v26 = vpop.f32.mrf.mxu0 }
 0x1b1   : > { %7128 = vst [vmem:[#allocation25_spill] sm:$0xff] %v6638_v26 }
 0x1b2   : > { %v6640_v63 = vpop.f32.mrf.mxu1  ;;  %v6642_v61 = vpop.f32.mrf.mxu0 }
 0x1b3   : > { %7129 = vst [vmem:[#allocation26_spill] sm:$0xff] %v6642_v61 }
 0x1b4   : > { %v6644_v43 = vpop.f32.mrf.mxu1  ;;  %v6646_v12 = vpop.f32.mrf.mxu0 }
 0x1b5   : > { %7130 = vst [vmem:[#allocation27_spill] sm:$0xff] %v6646_v12 }
 0x1b6   : > { %v6648_v46 = vpop.f32.mrf.mxu1  ;;  %v6650_v40 = vpop.f32.mrf.mxu0 }
 0x1b7   : > { %7131 = vst [vmem:[#allocation28_spill] sm:$0xff] %v6650_v40 }
 0x1b8   : > { %v6652_v21 = vpop.f32.mrf.mxu1  ;;  %v6654_v47 = vpop.f32.mrf.mxu0 }
 0x1b9   : > { %7132 = vst [vmem:[#allocation29_spill] sm:$0xff] %v6652_v21  ;;  %7133 = vst [vmem:[#allocation30_spill] sm:$0xff] %v6654_v47 }
 0x1ba   : > { %v6656_v52 = vpop.f32.mrf.mxu1  ;;  %v6658_v58 = vpop.f32.mrf.mxu0 }
 0x1bb   : > { %7134 = vst [vmem:[#allocation31_spill] sm:$0xff] %v6656_v52  ;;  %7135 = vst [vmem:[#allocation4_spill] sm:$0xff] %v6658_v58 }
 0x1bc   : > { %v6660_v26 = vpop.f32.mrf.mxu1  ;;  %v6662_v34 = vpop.f32.mrf.mxu0 }
 0x1bd   : > { %7136 = vst [vmem:[#allocation3_spill] sm:$0xff] %v6660_v26  ;;  %7137 = vst [vmem:[#allocation5_spill] sm:$0xff] %v6662_v34 }
 0x1be   : > { %v6664_v61 = vpop.f32.mrf.mxu1  ;;  %v6666_v62 = vpop.f32.mrf.mxu0 }
 0x1bf   : > { %7138 = vst [vmem:[#allocation6_spill] sm:$0xff] %v6664_v61  ;;  %7139 = vst [vmem:[#allocation7_spill] sm:$0xff] %v6666_v62 }
 0x1c0   : > { %v6668_v12 = vpop.f32.mrf.mxu1  ;;  %v6670_v0 = vpop.f32.mrf.mxu0 }
 0x1c1   : > { %7140 = vst [vmem:[#allocation8_spill] sm:$0xff] %v6668_v12  ;;  %7141 = vst [vmem:[#allocation32_spill] sm:$0xff] %v6670_v0  ;;  %v2726_v0 = vadd.f32 %v5091_v4, %v6501_v13  ;;  %v2732_v13 = vadd.f32 %v5100_v57, %v6519_v33  ;;  %v2731_v4 = vadd.f32 %v2596_v8, %v6522_v18 }
 0x1c2   : > { %v6672_v40 = vpop.f32.mrf.mxu1  ;;  %v6674_v21 = vpop.f32.mrf.mxu0  ;;  %v2737_v57 = vadd.f32 %v6624_v25, %v6540_v23  ;;  %v2739_v8 = vadd.f32 %v6632_v5, %v6546_v10  ;;  %v2744_v10 = vadd.f32 %v6644_v43, %v6555_v51 }
 0x1c3   : > { %7142 = vst [vmem:[#allocation33_spill] sm:$0xff] %v6672_v40  ;;  %7143 = vst [vmem:[#allocation34_spill] sm:$0xff] %v6674_v21 }
 0x1c4   : > { %v6676_v47 = vpop.f32.mrf.mxu1  ;;  %v6678_v52 = vpop.f32.mrf.mxu0 }
 0x1c5   : > { %7144 = vst [vmem:[#allocation35_spill] sm:$0xff] %v6676_v47  ;;  %7145 = vst [vmem:[#allocation36_spill] sm:$0xff] %v6678_v52  ;;  %v2725_v52 = vadd.f32 %v2566_v15, %v6504_v54  ;;  %v2734_v54 = vadd.f32 %v5103_v53, %v6525_v48 }
 0x1c6   : > { %v6680_v58 = vpop.f32.mrf.mxu1  ;;  %v6682_v26 = vpop.f32.mrf.mxu0 }
 0x1c7   : > { %7146 = vst [vmem:[#allocation37_spill] sm:$0xff] %v6680_v58  ;;  %7147 = vst [vmem:[#allocation38_spill] sm:$0xff] %v6682_v26  ;;  %v2728_v58 = vadd.f32 %v5094_v37, %v6507_v28  ;;  %v2727_v26 = vadd.f32 %v2576_v44, %v6510_v16  ;;  %v2733_v28 = vadd.f32 %v2606_v19, %v6528_v41 }
 0x1c8   : > { %v6684_v34 = vpop.f32.mrf.mxu1  ;;  %v6686_v61 = vpop.f32.mrf.mxu0  ;;  %v2736_v16 = vadd.f32 %v5106_v30, %v6531_v36  ;;  %v3113_v37 = vadd.f32 %v6596_v6, %v2725_v52  ;;  %v2738_v44 = vadd.f32 %v5109_v20, %v6537_v59  ;;  %v6726_v59 = vadd.f32 %v6610_v38, %v2731_v4 }
 0x1c9   : > { %7148 = vst [vmem:[#allocation39_spill] sm:$0xff] %v6684_v34  ;;  %7149 = vst [vmem:[#allocation40_spill] sm:$0xff] %v6686_v61  ;;  %v2730_v34 = vadd.f32 %v5097_v29, %v6513_v32  ;;  %v2729_v61 = vadd.f32 %v2586_v35, %v6516_v17  ;;  %v2735_v32 = vadd.f32 %v2616_v1, %v6534_v55 }
 0x1ca   : > { %v6688_v62 = vpop.f32.mrf.mxu1  ;;  %v6690_v12 = vpop.f32.mrf.mxu0  ;;  %v3116_v29 = vadd.f32 %v6600_v3, %v2728_v58  ;;  %v3115_v33 = vadd.f32 %v6602_v60, %v2727_v26  ;;  %v3120_v55 = vadd.f32 %v6608_v42, %v2732_v13  ;;  %v6729_v26 = vadd.f32 %v6612_v11, %v2734_v54 }
 0x1cb   : > { %7150 = vst [vmem:[#allocation41_spill] sm:$0xff] %v6688_v62  ;;  %7151 = vst [vmem:[#allocation42_spill] sm:$0xff] %v6690_v12  ;;  %v3114_v12 = vadd.f32 %v6591_v50, %v2726_v0  ;;  %v3118_v18 = vadd.f32 %v6604_v56, %v2730_v34  ;;  %v3117_v48 = vadd.f32 %v6606_v2, %v2729_v61 }
 0x1cc   : > { %v6693_v40 = vpop.f32.mrf.mxu1  ;;  %v6695_v21 = vpop.f32.mrf.mxu0  ;;  %v6732_v61 = vadd.f32 %v6614_v9, %v2733_v28  ;;  %v6735_v6 = vadd.f32 %v6616_v24, %v2736_v16  ;;  %v6738_v58 = vadd.f32 %v6618_v27, %v2735_v32  ;;  %v6741_v56 = vadd.f32 %v6620_v22, %v2738_v44  ;;  %v7155_v28 = vld [vmem:[#allocation24_spill] sm:$0xff]  ;;  %v7156_v32 = vld [vmem:[#allocation25_spill] sm:$0xff] }
 0x1cd   : > { %v2740_v38 = vadd.f32 %v6628_v39, %v6543_v7  ;;  %v2742_v11 = vadd.f32 %v6636_v14, %v6549_v45  ;;  %v2741_v7 = vadd.f32 %v6640_v63, %v6552_v31  ;;  %v2743_v22 = vadd.f32 %v6648_v46, %v6558_v49  ;;  %v7153_v63 = vld [vmem:[#allocation22_spill] sm:$0xff]  ;;  %v7154_v49 = vld [vmem:[#allocation23_spill] sm:$0xff] }
 0x1ce   : > { %v6702_v47 = vpop.f32.mrf.mxu1  ;;  %v5241_v62 = vpop.f32.mrf.mxu0  ;;  %v6774_v46 = vadd.f32 %v7154_v49, %v2739_v8 }
 0x1cf   : > { %v6771_v51 = vadd.f32 %v7153_v63, %v2740_v38  ;;  %v6777_v16 = vadd.f32 %v7155_v28, %v2742_v11 }
 0x1d0   : > { %v5191_v15 = vpop.f32.mrf.mxu1  ;;  %v3728_v17 = vpop.f32.mrf.mxu0 }
 0x1d1   : > { %v3501_v50 = vadd.f32 %v5191_v15, %v3114_v12  ;;  %v6780_v15 = vadd.f32 %v7156_v32, %v2741_v7  ;;  %v7164_v32 = vld [vmem:[#allocation30_spill] sm:$0xff] }
 0x1d2   : > { %v3341_v41 = vpop.f32.mrf.mxu1  ;;  %v5244_v36 = vpop.f32.mrf.mxu0 }
 0x1d3   : > { %v3888_v52 = vadd.f32 %v5241_v62, %v3501_v50  ;;  %v3500_v12 = vadd.f32 %v3341_v41, %v3113_v37  ;;  %v7152_v62 = vld [vmem:[#allocation21_spill] sm:$0xff] }
 0x1d4   : > { %v5194_v3 = vpop.f32.mrf.mxu1  ;;  %v3738_v60 = vpop.f32.mrf.mxu0  ;;  %v6768_v31 = vadd.f32 %v7152_v62, %v2737_v57 }
 0x1d5   : > { %3920 = vst.msk [vmem:[%s6722_s7 + $0x8] sm:$0xff] %vm411_vm0, %v3888_v52  ;;  %v4023_v2 = vmul.f32 %v3888_v52, %v3888_v52  ;;  %v3887_v35 = vadd.f32 %v3728_v17, %v3500_v12  ;;  %v3503_v42 = vadd.f32 %v5194_v3, %v3116_v29  ;;  %v3952_v19 = vsel %vm411_vm0, %v3888_v52, 0.0  ;;  %v7157_v29 = vld [vmem:[#allocation26_spill] sm:$0xff]  ;;  %v7159_v52 = vld [vmem:[#allocation9_spill] sm:$0xff] }
 0x1d6   : > { %v3351_v53 = vpop.f32.mrf.mxu1  ;;  %v5247_v9 = vpop.f32.mrf.mxu0  ;;  %v7160_v12 = vld [vmem:[#allocation29_spill] sm:$0xff] }
 0x1d7   : > { %3919 = vst.msk [vmem:[%s6722_s7] sm:$0xff] %vm411_vm0, %v3887_v35  ;;  %v3951_v24 = vsel %vm411_vm0, %v3887_v35, 0.0  ;;  %v4022_v30 = vmul.f32 %v3887_v35, %v3887_v35  ;;  %v3890_v23 = vadd.f32 %v5244_v36, %v3503_v42  ;;  %v3502_v1 = vadd.f32 %v3351_v53, %v3115_v33 }
 0x1d8   : > { %v3953_v27 = vadd.f32 %v3952_v19, %v3951_v24  ;;  %v5197_v45 = vpop.f32.mrf.mxu1  ;;  %v3748_v14 = vpop.f32.mrf.mxu0  ;;  %v4055_v20 = vsel %vm411_vm0, %v4023_v2, 0.0  ;;  %v6786_v33 = vadd.f32 %v7157_v29, %v2744_v10  ;;  %v2746_v3 = vadd.f32 %v7160_v12, %v7159_v52  ;;  %v7161_v10 = vld [vmem:[#allocation10_spill] sm:$0xff] }
 0x1d9   : > { %v4054_v0 = vsel %vm411_vm0, %v4022_v30, 0.0  ;;  %3922 = vst.msk [vmem:[%s6722_s7 + $0x18] sm:$0xff] %vm411_vm0, %v3890_v23  ;;  %v3505_v25 = vadd.f32 %v5197_v45, %v3118_v18  ;;  %v3889_v39 = vadd.f32 %v3738_v60, %v3502_v1  ;;  %v4025_v13 = vmul.f32 %v3890_v23, %v3890_v23  ;;  %v7158_v18 = vld [vmem:[#allocation27_spill] sm:$0xff] }
 0x1da   : > { %v4056_v43 = vadd.f32 %v4055_v20, %v4054_v0  ;;  %v3361_v34 = vpop.f32.mrf.mxu1  ;;  %v5250_v5 = vpop.f32.mrf.mxu0  ;;  %v6789_v41 = vadd.f32 %v7158_v18, %v2743_v22  ;;  %v3956_v60 = vsel %vm411_vm0, %v3890_v23, 0.0 }
 0x1db   : > { %v3892_v4 = vadd.f32 %v5247_v9, %v3505_v25  ;;  %v3504_v54 = vadd.f32 %v3361_v34, %v3117_v48  ;;  %3921 = vst.msk [vmem:[%s6722_s7 + $0x10] sm:$0xff] %vm411_vm0, %v3889_v39  ;;  %v3954_v17 = vsel %vm411_vm0, %v3889_v39, 0.0  ;;  %v4024_v37 = vmul.f32 %v3889_v39, %v3889_v39 }
 0x1dc   : > { %v5200_v44 = vpop.f32.mrf.mxu1  ;;  %v3758_v50 = vpop.f32.mrf.mxu0  ;;  %v3955_v48 = vadd.f32 %v3954_v17, %v3953_v27  ;;  %v4059_v38 = vsel %vm411_vm0, %v4025_v13, 0.0 }
 0x1dd   : > { %3924 = vst.msk [vmem:[%s6722_s7 + $0x28] sm:$0xff] %vm411_vm0, %v3892_v4  ;;  %v3891_v36 = vadd.f32 %v3748_v14, %v3504_v54  ;;  %v4057_v2 = vsel %vm411_vm0, %v4024_v37, 0.0  ;;  %v3507_v35 = vadd.f32 %v5200_v44, %v3120_v55  ;;  %v4027_v9 = vmul.f32 %v3892_v4, %v3892_v4  ;;  %v7162_v55 = vld [vmem:[#allocation31_spill] sm:$0xff] }
 0x1de   : > { %v3371_v42 = vpop.f32.mrf.mxu1  ;;  %v5253_v57 = vpop.f32.mrf.mxu0  ;;  %v4058_v8 = vadd.f32 %v4057_v2, %v4056_v43  ;;  %v3957_v11 = vadd.f32 %v3956_v60, %v3955_v48  ;;  %v2745_v27 = vadd.f32 %v7162_v55, %v7161_v10  ;;  %v3960_v22 = vsel %vm411_vm0, %v3892_v4, 0.0  ;;  %v7165_v37 = vld [vmem:[#allocation11_spill] sm:$0xff]  ;;  %v7170_v55 = vld [vmem:[#allocation8_spill] sm:$0xff] }
 0x1df   : > { %3923 = vst.msk [vmem:[%s6722_s7 + $0x20] sm:$0xff] %vm411_vm0, %v3891_v36  ;;  %v3958_v53 = vsel %vm411_vm0, %v3891_v36, 0.0  ;;  %v4026_v19 = vmul.f32 %v3891_v36, %v3891_v36  ;;  %v3894_v24 = vadd.f32 %v5250_v5, %v3507_v35  ;;  %v3506_v30 = vadd.f32 %v3371_v42, %v6726_v59  ;;  %v7163_v5 = vld [vmem:[#allocation28_spill] sm:$0xff]  ;;  %v7166_v44 = vld [vmem:[#allocation3_spill] sm:$0xff] }
 0x1e0   : > { %v5203_v23 = vpop.f32.mrf.mxu1  ;;  %v3768_v7 = vpop.f32.mrf.mxu0  ;;  %v3959_v1 = vadd.f32 %v3958_v53, %v3957_v11  ;;  %v4060_v45 = vadd.f32 %v4059_v38, %v4058_v8  ;;  %v6811_v49 = vadd.f32 %v7163_v5, %v2746_v3  ;;  %v6818_v17 = vadd.f32 %v7164_v32, %v2745_v27 }
 0x1e1   : > { %v3509_v14 = vadd.f32 %v5203_v23, %v6729_v26  ;;  %v4061_v20 = vsel %vm411_vm0, %v4026_v19, 0.0  ;;  %3926 = vst.msk [vmem:[%s6722_s7 + $0x38] sm:$0xff] %vm411_vm0, %v3894_v24  ;;  %v4029_v0 = vmul.f32 %v3894_v24, %v3894_v24  ;;  %v3893_v25 = vadd.f32 %v3758_v50, %v3506_v30  ;;  %v7167_v23 = vld [vmem:[#allocation12_spill] sm:$0xff] }
 0x1e2   : > { %v3381_v62 = vpop.f32.mrf.mxu1  ;;  %v5256_v59 = vpop.f32.mrf.mxu0  ;;  %v4062_v63 = vadd.f32 %v4061_v20, %v4060_v45  ;;  %v3961_v43 = vadd.f32 %v3960_v22, %v3959_v1  ;;  %v4063_v26 = vsel %vm411_vm0, %v4027_v9, 0.0  ;;  %v2748_v50 = vadd.f32 %v7166_v44, %v7165_v37 }
 0x1e3   : > { %v3896_v39 = vadd.f32 %v5253_v57, %v3509_v14  ;;  %v3508_v34 = vadd.f32 %v3381_v62, %v6732_v61  ;;  %3925 = vst.msk [vmem:[%s6722_s7 + $0x30] sm:$0xff] %vm411_vm0, %v3893_v25  ;;  %v3962_v13 = vsel %vm411_vm0, %v3893_v25, 0.0  ;;  %v4028_v4 = vmul.f32 %v3893_v25, %v3893_v25 }
 0x1e4   : > { %v5206_v54 = vpop.f32.mrf.mxu1  ;;  %v3778_v28 = vpop.f32.mrf.mxu0  ;;  %v3963_v61 = vadd.f32 %v3962_v13, %v3961_v43  ;;  %v4064_v29 = vadd.f32 %v4063_v26, %v4062_v63  ;;  %v3964_v18 = vsel %vm411_vm0, %v3894_v24, 0.0  ;;  %v4067_v60 = vsel %vm411_vm0, %v4029_v0, 0.0 }
 0x1e5   : > { %3928 = vst.msk [vmem:[%s6722_s7 + $0x48] sm:$0xff] %vm411_vm0, %v3896_v39  ;;  %v4065_v48 = vsel %vm411_vm0, %v4028_v4, 0.0  ;;  %v3895_v36 = vadd.f32 %v3768_v7, %v3508_v34  ;;  %v3511_v52 = vadd.f32 %v5206_v54, %v6735_v6  ;;  %v4031_v57 = vmul.f32 %v3896_v39, %v3896_v39  ;;  %v7168_v7 = vld [vmem:[#allocation6_spill] sm:$0xff]  ;;  %v7171_v54 = vld [vmem:[#allocation4_spill] sm:$0xff] }
 0x1e6   : > { %v3391_v12 = vpop.f32.mrf.mxu1  ;;  %v5259_v3 = vpop.f32.mrf.mxu0  ;;  %v4066_v2 = vadd.f32 %v4065_v48, %v4064_v29  ;;  %v3965_v35 = vadd.f32 %v3964_v18, %v3963_v61  ;;  %v2747_v10 = vadd.f32 %v7168_v7, %v7167_v23  ;;  %v3968_v1 = vsel %vm411_vm0, %v3896_v39, 0.0 }
 0x1e7   : > { %v3510_v42 = vadd.f32 %v3391_v12, %v6738_v58  ;;  %3927 = vst.msk [vmem:[%s6722_s7 + $0x40] sm:$0xff] %vm411_vm0, %v3895_v36  ;;  %v3966_v38 = vsel %vm411_vm0, %v3895_v36, 0.0  ;;  %v4030_v8 = vmul.f32 %v3895_v36, %v3895_v36  ;;  %v3898_v11 = vadd.f32 %v5256_v59, %v3511_v52  ;;  %v7169_v58 = vld [vmem:[#allocation13_spill] sm:$0xff] }
 0x1e8   : > { %v5209_v53 = vpop.f32.mrf.mxu1  ;;  %v3788_v9 = vpop.f32.mrf.mxu0  ;;  %v3967_v6 = vadd.f32 %v3966_v38, %v3965_v35  ;;  %v4068_v19 = vadd.f32 %v4067_v60, %v4066_v2  ;;  %v2750_v27 = vadd.f32 %v7170_v55, %v7169_v58  ;;  %v4071_v62 = vsel %vm411_vm0, %v4031_v57, 0.0  ;;  %v7172_v52 = vld [vmem:[#allocation5_spill] sm:$0xff]  ;;  %v7173_v35 = vld [vmem:[#allocation7_spill] sm:$0xff]  ;;  %v7174_v57 = vld [vmem:[#allocation14_spill] sm:$0xff] }
 0x1e9   : > { %v3897_v24 = vadd.f32 %v3778_v28, %v3510_v42  ;;  %v3513_v30 = vadd.f32 %v5209_v53, %v6741_v56  ;;  %v4069_v45 = vsel %vm411_vm0, %v4030_v8, 0.0  ;;  %3930 = vst.msk [vmem:[%s6722_s7 + $0x58] sm:$0xff] %vm411_vm0, %v3898_v11  ;;  %v4033_v59 = vmul.f32 %v3898_v11, %v3898_v11  ;;  %v7175_v38 = vld [vmem:[#allocation33_spill] sm:$0xff] }
 0x1ea   : > { %v3401_v14 = vpop.f32.mrf.mxu1  ;;  %v5262_v22 = vpop.f32.mrf.mxu0  ;;  %v4070_v20 = vadd.f32 %v4069_v45, %v4068_v19  ;;  %v3969_v0 = vadd.f32 %v3968_v1, %v3967_v6  ;;  %v6849_v28 = vadd.f32 %v7171_v54, %v2748_v50  ;;  %v3972_v32 = vsel %vm411_vm0, %v3898_v11, 0.0 }
 0x1eb   : > { %3929 = vst.msk [vmem:[%s6722_s7 + $0x50] sm:$0xff] %vm411_vm0, %v3897_v24  ;;  %v3970_v56 = vsel %vm411_vm0, %v3897_v24, 0.0  ;;  %v4032_v25 = vmul.f32 %v3897_v24, %v3897_v24  ;;  %v3900_v63 = vadd.f32 %v5259_v3, %v3513_v30  ;;  %v3512_v43 = vadd.f32 %v3401_v14, %v6768_v31 }
 0x1ec   : > { %v5212_v39 = vpop.f32.mrf.mxu1  ;;  %v3798_v34 = vpop.f32.mrf.mxu0  ;;  %v3971_v5 = vadd.f32 %v3970_v56, %v3969_v0  ;;  %v4072_v26 = vadd.f32 %v4071_v62, %v4070_v20  ;;  %v6856_v12 = vadd.f32 %v7172_v52, %v2747_v10  ;;  %v6863_v42 = vadd.f32 %v7173_v35, %v2750_v27  ;;  %v7177_v62 = vld [vmem:[#allocation35_spill] sm:$0xff] }
 0x1ed   : > { %v4073_v13 = vsel %vm411_vm0, %v4032_v25, 0.0  ;;  %v3515_v4 = vadd.f32 %v5212_v39, %v6771_v51  ;;  %3932 = vst.msk [vmem:[%s6722_s7 + $0x68] sm:$0xff] %vm411_vm0, %v3900_v63  ;;  %v4035_v37 = vmul.f32 %v3900_v63, %v3900_v63  ;;  %v3899_v44 = vadd.f32 %v3788_v9, %v3512_v43  ;;  %v7176_v25 = vld [vmem:[#allocation15_spill] sm:$0xff] }
 0x1ee   : > { %v3411_v61 = vpop.f32.mrf.mxu1  ;;  %v5265_v31 = vpop.f32.mrf.mxu0  ;;  %v4074_v29 = vadd.f32 %v4073_v13, %v4072_v26  ;;  %v3973_v18 = vadd.f32 %v3972_v32, %v3971_v5  ;;  %v4075_v51 = vsel %vm411_vm0, %v4033_v59, 0.0  ;;  %v2749_v8 = vadd.f32 %v7175_v38, %v7174_v57 }
 0x1ef   : > { %v3902_v48 = vadd.f32 %v5262_v22, %v3515_v4  ;;  %v3514_v36 = vadd.f32 %v3411_v61, %v6774_v46  ;;  %3931 = vst.msk [vmem:[%s6722_s7 + $0x60] sm:$0xff] %vm411_vm0, %v3899_v44  ;;  %v3974_v50 = vsel %vm411_vm0, %v3899_v44, 0.0  ;;  %v4034_v3 = vmul.f32 %v3899_v44, %v3899_v44 }
 0x1f0   : > { %v5215_v60 = vpop.f32.mrf.mxu1  ;;  %v3808_v2 = vpop.f32.mrf.mxu0  ;;  %v3975_v46 = vadd.f32 %v3974_v50, %v3973_v18  ;;  %v4076_v11 = vadd.f32 %v4075_v51, %v4074_v29  ;;  %v3976_v53 = vsel %vm411_vm0, %v3900_v63, 0.0  ;;  %v4079_v23 = vsel %vm411_vm0, %v4035_v37, 0.0  ;;  %v7179_v63 = vld [vmem:[#allocation37_spill] sm:$0xff]  ;;  %v7180_v51 = vld [vmem:[#allocation32_spill] sm:$0xff] }
 0x1f1   : > { %3934 = vst.msk [vmem:[%s6722_s7 + $0x78] sm:$0xff] %vm411_vm0, %v3902_v48  ;;  %v4077_v9 = vsel %vm411_vm0, %v4034_v3, 0.0  ;;  %v3901_v6 = vadd.f32 %v3798_v34, %v3514_v36  ;;  %v3517_v19 = vadd.f32 %v5215_v60, %v6777_v16  ;;  %v4037_v55 = vmul.f32 %v3902_v48, %v3902_v48 }
 0x1f2   : > { %v3421_v24 = vpop.f32.mrf.mxu1  ;;  %v5268_v30 = vpop.f32.mrf.mxu0  ;;  %v4078_v7 = vadd.f32 %v4077_v9, %v4076_v11  ;;  %v3977_v10 = vadd.f32 %v3976_v53, %v3975_v46  ;;  %v2752_v59 = vadd.f32 %v7177_v62, %v7176_v25  ;;  %v3980_v39 = vsel %vm411_vm0, %v3902_v48, 0.0  ;;  %v7181_v53 = vld [vmem:[#allocation34_spill] sm:$0xff] }
 0x1f3   : > { %v3516_v58 = vadd.f32 %v3421_v24, %v6780_v15  ;;  %3933 = vst.msk [vmem:[%s6722_s7 + $0x70] sm:$0xff] %vm411_vm0, %v3901_v6  ;;  %v3978_v27 = vsel %vm411_vm0, %v3901_v6, 0.0  ;;  %v4036_v1 = vmul.f32 %v3901_v6, %v3901_v6  ;;  %v3904_v45 = vadd.f32 %v5265_v31, %v3517_v19  ;;  %v7178_v15 = vld [vmem:[#allocation16_spill] sm:$0xff] }
 0x1f4   : > { %v5218_v14 = vpop.f32.mrf.mxu1  ;;  %v3818_v22 = vpop.f32.mrf.mxu0  ;;  %v3979_v16 = vadd.f32 %v3978_v27, %v3977_v10  ;;  %v4080_v20 = vadd.f32 %v4079_v23, %v4078_v7  ;;  %v2751_v43 = vadd.f32 %v7179_v63, %v7178_v15  ;;  %v4083_v32 = vsel %vm411_vm0, %v4037_v55, 0.0  ;;  %v7183_v7 = vld [vmem:[#allocation17_spill] sm:$0xff]  ;;  %v7184_v10 = vld [vmem:[#allocation39_spill] sm:$0xff] }
 0x1f5   : > { %v3903_v0 = vadd.f32 %v3808_v2, %v3516_v58  ;;  %v3519_v56 = vadd.f32 %v5218_v14, %v6786_v33  ;;  %v4081_v34 = vsel %vm411_vm0, %v4036_v1, 0.0  ;;  %3936 = vst.msk [vmem:[%s6722_s7 + $0x88] sm:$0xff] %vm411_vm0, %v3904_v45  ;;  %v4039_v37 = vmul.f32 %v3904_v45, %v3904_v45 }
 0x1f6   : > { %v3431_v5 = vpop.f32.mrf.mxu1  ;;  %v5271_v26 = vpop.f32.mrf.mxu0  ;;  %v4082_v13 = vadd.f32 %v4081_v34, %v4080_v20  ;;  %v3981_v4 = vadd.f32 %v3980_v39, %v3979_v16  ;;  %v3137_v50 = vadd.f32 %v7180_v51, %v2749_v8  ;;  %v3984_v3 = vsel %vm411_vm0, %v3904_v45, 0.0 }
 0x1f7   : > { %3935 = vst.msk [vmem:[%s6722_s7 + $0x80] sm:$0xff] %vm411_vm0, %v3903_v0  ;;  %v3982_v33 = vsel %vm411_vm0, %v3903_v0, 0.0  ;;  %v4038_v54 = vmul.f32 %v3903_v0, %v3903_v0  ;;  %v3906_v44 = vadd.f32 %v5268_v30, %v3519_v56  ;;  %v3518_v61 = vadd.f32 %v3431_v5, %v6789_v41  ;;  %v7182_v30 = vld [vmem:[#allocation36_spill] sm:$0xff] }
 0x1f8   : > { %v5221_v31 = vpop.f32.mrf.mxu1  ;;  %v3828_v29 = vpop.f32.mrf.mxu0  ;;  %v3983_v18 = vadd.f32 %v3982_v33, %v3981_v4  ;;  %v4084_v48 = vadd.f32 %v4083_v32, %v4082_v13  ;;  %v3140_v9 = vadd.f32 %v7181_v53, %v2752_v59  ;;  %v3139_v23 = vadd.f32 %v7182_v30, %v2751_v43  ;;  %v7185_v13 = vld [vmem:[#allocation18_spill] sm:$0xff]  ;;  %v7186_v4 = vld [vmem:[#allocation41_spill] sm:$0xff]  ;;  %v7189_v30 = vld [vmem:[#allocation40_spill] sm:$0xff] }
 0x1f9   : > { %v4085_v36 = vsel %vm411_vm0, %v4038_v54, 0.0  ;;  %v3521_v52 = vadd.f32 %v5221_v31, %v6811_v49  ;;  %3938 = vst.msk [vmem:[%s6722_s7 + $0x98] sm:$0xff] %vm411_vm0, %v3906_v44  ;;  %v4041_v60 = vmul.f32 %v3906_v44, %v3906_v44  ;;  %v3905_v2 = vadd.f32 %v3818_v22, %v3518_v61 }
 0x1fa   : > { %v3441_v35 = vpop.f32.mrf.mxu1  ;;  %v5274_v57 = vpop.f32.mrf.mxu0  ;;  %v4086_v41 = vadd.f32 %v4085_v36, %v4084_v48  ;;  %v3985_v38 = vadd.f32 %v3984_v3, %v3983_v18  ;;  %v4087_v49 = vsel %vm411_vm0, %v4039_v37, 0.0  ;;  %v2754_v58 = vadd.f32 %v7184_v10, %v7183_v7 }
 0x1fb   : > { %v3908_v46 = vadd.f32 %v5271_v26, %v3521_v52  ;;  %v3520_v11 = vadd.f32 %v3441_v35, %v6818_v17  ;;  %3937 = vst.msk [vmem:[%s6722_s7 + $0x90] sm:$0xff] %vm411_vm0, %v3905_v2  ;;  %v3986_v8 = vsel %vm411_vm0, %v3905_v2, 0.0  ;;  %v4040_v6 = vmul.f32 %v3905_v2, %v3905_v2 }
 0x1fc   : > { %v5224_v19 = vpop.f32.mrf.mxu1  ;;  %v3838_v24 = vpop.f32.mrf.mxu0  ;;  %v3987_v55 = vadd.f32 %v3986_v8, %v3985_v38  ;;  %v4088_v27 = vadd.f32 %v4087_v49, %v4086_v41  ;;  %v3988_v17 = vsel %vm411_vm0, %v3906_v44, 0.0  ;;  %v4091_v20 = vsel %vm411_vm0, %v4041_v60, 0.0  ;;  %v7188_v41 = vld [vmem:[#allocation38_spill] sm:$0xff] }
 0x1fd   : > { %3940 = vst.msk [vmem:[%s6722_s7 + $0xa8] sm:$0xff] %vm411_vm0, %v3908_v46  ;;  %v4089_v1 = vsel %vm411_vm0, %v4040_v6, 0.0  ;;  %v3907_v45 = vadd.f32 %v3828_v29, %v3520_v11  ;;  %v3523_v14 = vadd.f32 %v5224_v19, %v6849_v28  ;;  %v4043_v62 = vmul.f32 %v3908_v46, %v3908_v46 }
 0x1fe   : > { %v3451_v22 = vpop.f32.mrf.mxu1  ;;  %v5277_v16 = vpop.f32.mrf.mxu0  ;;  %v4090_v0 = vadd.f32 %v4089_v1, %v4088_v27  ;;  %v3989_v56 = vadd.f32 %v3988_v17, %v3987_v55  ;;  %v2753_v33 = vadd.f32 %v7186_v4, %v7185_v13  ;;  %v3992_v32 = vsel %vm411_vm0, %v3908_v46, 0.0  ;;  %v7190_v27 = vld [vmem:[#allocation42_spill] sm:$0xff]  ;;  %v7191_v1 = vld [vmem:[#allocation20_spill] sm:$0xff] }
 0x1ff   : > { %v3522_v25 = vadd.f32 %v3451_v22, %v6856_v12  ;;  %3939 = vst.msk [vmem:[%s6722_s7 + $0xa0] sm:$0xff] %vm411_vm0, %v3907_v45  ;;  %v3990_v59 = vsel %vm411_vm0, %v3907_v45, 0.0  ;;  %v4042_v15 = vmul.f32 %v3907_v45, %v3907_v45  ;;  %v3910_v63 = vadd.f32 %v5274_v57, %v3523_v14  ;;  %v7187_v12 = vld [vmem:[#allocation19_spill] sm:$0xff] }
 0x200   : > { %v5227_v43 = vpop.f32.mrf.mxu1  ;;  %v3848_v39 = vpop.f32.mrf.mxu0  ;;  %v3991_v28 = vadd.f32 %v3990_v59, %v3989_v56  ;;  %v4092_v34 = vadd.f32 %v4091_v20, %v4090_v0  ;;  %v2756_v54 = vadd.f32 %v6693_v40, %v7187_v12  ;;  %v4095_v48 = vsel %vm411_vm0, %v4043_v62, 0.0 }
 0x201   : > { %v3909_v5 = vadd.f32 %v3838_v24, %v3522_v25  ;;  %v3525_v26 = vadd.f32 %v5227_v43, %v6863_v42  ;;  %v4093_v37 = vsel %vm411_vm0, %v4042_v15, 0.0  ;;  %3942 = vst.msk [vmem:[%s6722_s7 + $0xb8] sm:$0xff] %vm411_vm0, %v3910_v63  ;;  %v4045_v36 = vmul.f32 %v3910_v63, %v3910_v63 }
 0x202   : > { %v3461_v44 = vpop.f32.mrf.mxu1  ;;  %v5280_v61 = vpop.f32.mrf.mxu0  ;;  %v4094_v31 = vadd.f32 %v4093_v37, %v4092_v34  ;;  %v3993_v29 = vadd.f32 %v3992_v32, %v3991_v28  ;;  %v3142_v38 = vadd.f32 %v7188_v41, %v2754_v58  ;;  %v3996_v46 = vsel %vm411_vm0, %v3910_v63, 0.0 }
 0x203   : > { %3941 = vst.msk [vmem:[%s6722_s7 + $0xb0] sm:$0xff] %vm411_vm0, %v3909_v5  ;;  %v3994_v42 = vsel %vm411_vm0, %v3909_v5, 0.0  ;;  %v4044_v18 = vmul.f32 %v3909_v5, %v3909_v5  ;;  %v3912_v40 = vadd.f32 %v5277_v16, %v3525_v26  ;;  %v3524_v52 = vadd.f32 %v3461_v44, %v3137_v50 }
 0x204   : > { %v5230_v51 = vpop.f32.mrf.mxu1  ;;  %v3858_v3 = vpop.f32.mrf.mxu0  ;;  %v3995_v60 = vadd.f32 %v3994_v42, %v3993_v29  ;;  %v4096_v2 = vadd.f32 %v4095_v48, %v4094_v31  ;;  %v3141_v7 = vadd.f32 %v7189_v30, %v2753_v33  ;;  %v4099_v10 = vsel %vm411_vm0, %v4045_v36, 0.0 }
 0x205   : > { %v4097_v35 = vsel %vm411_vm0, %v4044_v18, 0.0  ;;  %v3527_v57 = vadd.f32 %v5230_v51, %v3140_v9  ;;  %3944 = vst.msk [vmem:[%s6722_s7 + $0xc8] sm:$0xff] %vm411_vm0, %v3912_v40  ;;  %v4047_v11 = vmul.f32 %v3912_v40, %v3912_v40  ;;  %v3911_v53 = vadd.f32 %v3848_v39, %v3524_v52 }
 0x206   : > { %v3471_v49 = vpop.f32.mrf.mxu1  ;;  %v5283_v8 = vpop.f32.mrf.mxu0  ;;  %v4098_v50 = vadd.f32 %v4097_v35, %v4096_v2  ;;  %v3997_v6 = vadd.f32 %v3996_v46, %v3995_v60  ;;  %v3144_v17 = vadd.f32 %v7190_v27, %v2756_v54  ;;  %v2755_v45 = vadd.f32 %v6702_v47, %v7191_v1 }
 0x207   : > { %v3914_v19 = vadd.f32 %v5280_v61, %v3527_v57  ;;  %v3526_v24 = vadd.f32 %v3471_v49, %v3139_v23  ;;  %3943 = vst.msk [vmem:[%s6722_s7 + $0xc0] sm:$0xff] %vm411_vm0, %v3911_v53  ;;  %v3998_v9 = vsel %vm411_vm0, %v3911_v53, 0.0  ;;  %v4046_v58 = vmul.f32 %v3911_v53, %v3911_v53 }
 0x208   : > { %v5233_v55 = vpop.f32.mrf.mxu1  ;;  %v3999_v14 = vadd.f32 %v3998_v9, %v3997_v6  ;;  %v4100_v22 = vadd.f32 %v4099_v10, %v4098_v50  ;;  %v3868_v23 = vpop.f32.mrf.mxu0  ;;  %v4000_v16 = vsel %vm411_vm0, %v3912_v40, 0.0  ;;  %v4103_v62 = vsel %vm411_vm0, %v4047_v11, 0.0 }
 0x209   : > { %3946 = vst.msk [vmem:[%s6722_s7 + $0xd8] sm:$0xff] %vm411_vm0, %v3914_v19  ;;  %v4101_v20 = vsel %vm411_vm0, %v4046_v58, 0.0  ;;  %v3913_v0 = vadd.f32 %v3858_v3, %v3526_v24  ;;  %v3529_v56 = vadd.f32 %v5233_v55, %v3142_v38  ;;  %v4049_v43 = vmul.f32 %v3914_v19, %v3914_v19 }
 0x20a   : > { %v3481_v25 = vpop.f32.mrf.mxu1  ;;  %v4102_v59 = vadd.f32 %v4101_v20, %v4100_v22  ;;  %v4001_v15 = vadd.f32 %v4000_v16, %v3999_v14  ;;  %v5286_v33 = vpop.f32.mrf.mxu0  ;;  %v3143_v12 = vadd.f32 %v6695_v21, %v2755_v45  ;;  %v4004_v54 = vsel %vm411_vm0, %v3914_v19, 0.0 }
 0x20b   : > { %v3528_v63 = vadd.f32 %v3481_v25, %v3141_v7  ;;  %3945 = vst.msk [vmem:[%s6722_s7 + $0xd0] sm:$0xff] %vm411_vm0, %v3913_v0  ;;  %v4002_v47 = vsel %vm411_vm0, %v3913_v0, 0.0  ;;  %v4048_v39 = vmul.f32 %v3913_v0, %v3913_v0  ;;  %v3916_v28 = vadd.f32 %v5283_v8, %v3529_v56 }
 0x20c   : > { %v5236_v34 = vpop.f32.mrf.mxu1  ;;  %v4003_v5 = vadd.f32 %v4002_v47, %v4001_v15  ;;  %v4104_v26 = vadd.f32 %v4103_v62, %v4102_v59  ;;  %v4107_v42 = vsel %vm411_vm0, %v4049_v43, 0.0  ;;  %v3878_v51 = vpop.f32.mrf.mxu0 }
 0x20d   : > { %v3915_v13 = vadd.f32 %v3868_v23, %v3528_v63  ;;  %v3531_v4 = vadd.f32 %v5236_v34, %v3144_v17  ;;  %v4105_v32 = vsel %vm411_vm0, %v4048_v39, 0.0  ;;  %3948 = vst.msk [vmem:[%s6722_s7 + $0xe8] sm:$0xff] %vm411_vm0, %v3916_v28  ;;  %v4051_v18 = vmul.f32 %v3916_v28, %v3916_v28 }
 0x20e   : > { %v3491_v37 = vpop.f32.mrf.mxu1  ;;  %v4106_v44 = vadd.f32 %v4105_v32, %v4104_v26  ;;  %v4005_v61 = vadd.f32 %v4004_v54, %v4003_v5  ;;  %v4008_v3 = vsel %vm411_vm0, %v3916_v28, 0.0 }
 0x20f   : > { %3947 = vst.msk [vmem:[%s6722_s7 + $0xe0] sm:$0xff] %vm411_vm0, %v3915_v13  ;;  %v4006_v31 = vsel %vm411_vm0, %v3915_v13, 0.0  ;;  %v4050_v29 = vmul.f32 %v3915_v13, %v3915_v13  ;;  %v3918_v21 = vadd.f32 %v5286_v33, %v3531_v4  ;;  %v3530_v48 = vadd.f32 %v3491_v37, %v3143_v12 }
 0x210   : > { %v4007_v36 = vadd.f32 %v4006_v31, %v4005_v61  ;;  %v4108_v40 = vadd.f32 %v4107_v42, %v4106_v44  ;;  %v4111_v57 = vsel %vm411_vm0, %v4051_v18, 0.0 }
 0x211   : > { %v4109_v52 = vsel %vm411_vm0, %v4050_v29, 0.0  ;;  %3950 = vst.msk [vmem:[%s6722_s7 + $0xf8] sm:$0xff] %vm411_vm0, %v3918_v21  ;;  %v3917_v60 = vadd.f32 %v3878_v51, %v3530_v48  ;;  %v4053_v41 = vmul.f32 %v3918_v21, %v3918_v21  ;;  %v4012_v49 = vsel %vm411_vm0, %v3918_v21, 0.0 }
 0x212   : > { %v4110_v2 = vadd.f32 %v4109_v52, %v4108_v40  ;;  %v4009_v35 = vadd.f32 %v4008_v3, %v4007_v36 }
 0x213   : > { %3949 = vst.msk [vmem:[%s6722_s7 + $0xf0] sm:$0xff] %vm411_vm0, %v3917_v60  ;;  %v4010_v38 = vsel %vm411_vm0, %v3917_v60, 0.0  ;;  %v4052_v46 = vmul.f32 %v3917_v60, %v3917_v60  ;;  %v4115_v19 = vsel %vm411_vm0, %v4053_v41, 0.0 }
 0x214   : > { %v4011_v11 = vadd.f32 %v4010_v38, %v4009_v35  ;;  %v4112_v53 = vadd.f32 %v4111_v57, %v4110_v2 }
 0x215   : > { %v4113_v8 = vsel %vm411_vm0, %v4052_v46, 0.0 }
 0x216   : > { %v4013_v50 = vadd.f32 %v4012_v49, %v4011_v11  ;;  %v4114_v6 = vadd.f32 %v4113_v8, %v4112_v53 }
 0x218   : > { %v4014_v24 = vrot.slane %v4013_v50, 4  ;;  %v4116_v30 = vadd.f32 %v4115_v19, %v4114_v6 }
 0x21a   : > { %v4015_v7 = vadd.f32 %v4014_v24, %v4013_v50  ;;  %v4117_v10 = vrot.slane %v4116_v30, 4 }
 0x21c   : > { %v4016_v9 = vrot.slane %v4015_v7, 2  ;;  %v4118_v58 = vadd.f32 %v4117_v10, %v4116_v30 }
 0x21e   : > { %v4017_v55 = vadd.f32 %v4016_v9, %v4015_v7  ;;  %v4119_v27 = vrot.slane %v4118_v58, 2 }
 0x220   : > { %v4018_v17 = vrot.slane %v4017_v55, 1  ;;  %v4120_v1 = vadd.f32 %v4119_v27, %v4118_v58 }
 0x222   : > { %v4019_v45 = vadd.f32 %v4018_v17, %v4017_v55  ;;  %v4121_v14 = vrot.slane %v4120_v1, 1 }
 0x224   : > { %4021 = vst.msk [vmem:[%s265_s9] sm:$0x1] %vm4020_vm2, %v4019_v45  ;;  %v4122_v22 = vadd.f32 %v4121_v14, %v4120_v1 }
 0x226   : > { %4123 = vst.msk [vmem:[%s268_s12] sm:$0x1] %vm4020_vm2, %v4122_v22 }
 0x227 PF: > { %s17_s21 = sadd.s32 1, %s5304_s21  }
 0x228   : > { %p14_p4 = scmp.ge.s32.totalorder %s17_s21, 4  }
 0x22a   :  { %16 = sbr.rel (!%p14_p4) target bundleno = 1 (0x1), region = 100 }

</bundles_post_ra>
